<compile_context>
chip_gen: v7x
topology: tpu7x:2x2x1
jax: 0.10.0
libtpu: 0.0.40
codegen_flags: <defaults>
</compile_context>

<pallas_src>
import jax
import jax.numpy as jnp
from jax import lax
from jax.experimental import pallas as pl
from jax.experimental.pallas import tpu as pltpu

K = 7            # conv kernel size
PAD = K // 2     # "same" padding


def _largest_divisor_leq(n, cap):
    d = 1
    for i in range(1, min(n, cap) + 1):
        if n % i == 0:
            d = i
    return d


def cbam_spatial_attention(x, w, b):
    """x: [B, C, H, W], w: [1, 2, K, K] f32, b: [1] f32 -> [B, C, H, W]."""
    B, C, H, W = x.shape
    HW = H * W
    SH = PAD * (W + 1)                        # max |flat tap shift| = PAD*W + PAD
    HWext = 128 * pl.cdiv(HW + 2 * SH, 128)   # lane-aligned extended pooled slab

    # Channel chunk size for the pooling / scale loops (chunk ~<= 32K elements).
    ct_cap = max(1, min(8, 32768 // max(HW, 1)))
    CT = _largest_divisor_leq(C, ct_cap)
    nchunks = C // CT

    # Conv weights packed as (in_channel, tap): one VMEM lane-slice per tap
    # yields a (2,1) column that broadcasts over both pooled rows at once.
    w_pair = w.reshape(2, K * K).astype(jnp.float32)
    b = b.astype(jnp.float32)

    # Flat column index (periodic with W) -> in-kernel column-validity masks.
    col_idx = lax.broadcasted_iota(jnp.int32, (2, HW), 1) % W

    # Free bitcasts in HBM (row-major): flatten spatial, split channels by CT.
    x_flat = x.reshape(B, nchunks, CT, HW)

    def kernel(w_ref, b_ref, col_ref, x_ref, o_ref, pad_ref, attn_ref):
        # ---- channel avg/max pooling on the lane-dense flat view ----
        def pool_body(ci, carry):
            s, m = carry
            chunk = x_ref[0, ci].astype(jnp.float32)            # (CT, HW)
            return (s + jnp.sum(chunk, axis=0, keepdims=True),
                    jnp.maximum(m, jnp.max(chunk, axis=0, keepdims=True)))

        s0 = jnp.zeros((1, HW), jnp.float32)
        m0 = jnp.full((1, HW), -jnp.inf, jnp.float32)
        s, mx = lax.fori_loop(0, nchunks, pool_body, (s0, m0),
                              unroll=nchunks <= 8)
        avg = s * (1.0 / C)

        # ---- pack both pooled maps into one zero-extended flat slab ----
        # row 0 = avg, row 1 = max.  One unmasked zero store per step (megacore
        # safe); the interior [SH, SH+HW) is then overwritten.
        pad_ref[...] = jnp.zeros((2, HWext), jnp.float32)
        pad_ref[0:1, SH:SH + HW] = avg
        pad_ref[1:2, SH:SH + HW] = mx

        # ---- 7x7 "same" conv over the 2 pooled maps (merged accumulator) ----
        col = col_ref[...]                                      # (2, HW) int32
        acc = jnp.zeros((2, HW), jnp.float32)
        for ox in range(-PAD, PAD + 1):
            cm = jnp.logical_and(col + ox >= 0, col + ox < W)   # column validity
            for oy in range(-PAD, PAD + 1):
                t = (oy + PAD) * K + (ox + PAD)
                sft = SH + oy * W + ox
                win = pad_ref[:, sft:sft + HW]                  # (2, HW)
                wv = w_ref[:, t:t + 1]                          # (2, 1)
                acc = acc + jnp.where(cm, wv * win, 0.0)
        pre = jnp.sum(acc, axis=0, keepdims=True) + b_ref[0]    # (1, HW)
        attn_ref[...] = jax.nn.sigmoid(pre)
        # TODO(synk): on v6e/v7x with bf16 inputs, cast attn to bf16 here and
        # scale in bf16 (keep f32 on v5e, which lacks bf16 VALU).

        # ---- elementwise scale, lane-dense stores (attn reloaded per chunk) ----
        def scale_body(ci, carry):
            chunk = x_ref[0, ci].astype(jnp.float32)            # (CT, HW)
            o_ref[0, ci] = (chunk * attn_ref[...]).astype(o_ref.dtype)
            return carry

        lax.fori_loop(0, nchunks, scale_body, 0, unroll=nchunks <= 8)

    # ---- VMEM budget: double-buffered x in/out blocks + scratch + margin ----
    block_bytes = C * HW * x.dtype.itemsize
    scratch_bytes = 4 * (8 * HWext + 8 * HW)        # sublane-padded allocations
    need = 4 * block_bytes + scratch_bytes + (4 << 20)
    try:
        cap = int(pltpu.get_tpu_info().vmem_capacity_bytes) - (16 << 20)
    except Exception:
        cap = 48 << 20                               # v7x-safe fallback
    cap = max(cap, 32 << 20)
    vmem_limit = int(min(max(need, 32 << 20), cap))

    out_flat = pl.pallas_call(
        kernel,
        out_shape=jax.ShapeDtypeStruct((B, nchunks, CT, HW), x.dtype),
        grid_spec=pltpu.PrefetchScalarGridSpec(
            num_scalar_prefetch=0,
            grid=(B,),
            in_specs=[
                pl.BlockSpec((2, K * K), lambda bi: (0, 0)),          # conv weights
                pl.BlockSpec(memory_space=pltpu.MemorySpace.SMEM),    # bias
                pl.BlockSpec((2, HW), lambda bi: (0, 0)),             # column idx
                pl.BlockSpec((1, nchunks, CT, HW),
                             lambda bi: (bi, 0, 0, 0)),               # x
            ],
            out_specs=pl.BlockSpec((1, nchunks, CT, HW),
                                   lambda bi: (bi, 0, 0, 0)),
            scratch_shapes=[
                pltpu.VMEM((2, HWext), jnp.float32),   # packed zero-extended pooled maps
                pltpu.VMEM((1, HW), jnp.float32),      # attention values for scale loop
            ],
        ),
        compiler_params=pltpu.CompilerParams(
            dimension_semantics=("parallel",),
            vmem_limit_bytes=vmem_limit,
        ),
    )(w_pair, b, col_idx, x_flat)

    return out_flat.reshape(B, C, H, W)


def _reference(x, w, b):
    avg = jnp.mean(x, axis=1, keepdims=True)
    mx = jnp.max(x, axis=1, keepdims=True)
    pooled = jnp.concatenate([avg, mx], axis=1)
    attn = jax.lax.conv_general_dilated(
        pooled, w, window_strides=(1, 1), padding="SAME",
        dimension_numbers=("NCHW", "OIHW", "NCHW"),
    ) + b.reshape(1, 1, 1, 1)
    attn = jax.nn.sigmoid(attn)
    return attn * x


if __name__ == "__main__":
    B, C, H, W = 2, 4, 16, 16
    key = jax.random.PRNGKey(0)
    kx, kw, kb = jax.random.split(key, 3)

    x = jax.random.normal(kx, (B, C, H, W), dtype=jnp.float32)
    # deterministic conv parameter init (nn.Conv2d(2, 1, 7, padding=3) shapes)
    fan_in = 2 * K * K
    bound = 1.0 / (fan_in ** 0.5)
    w = jax.random.uniform(kw, (1, 2, K, K), jnp.float32, -bound, bound)
    b = jax.random.uniform(kb, (1,), jnp.float32, -bound, bound)

    out = cbam_spatial_attention(x, w, b)
    out = jax.block_until_ready(out)

    ref = _reference(x, w, b)
    assert out.shape == (B, C, H, W)
    assert jnp.allclose(out, ref, atol=1e-4, rtol=1e-4)

    print("KERNEL_OK")
</pallas_src>

<mosaic_0001>
module attributes {stable_mosaic.version = 11 : i64} {
  func.func @kernel(%arg0: i32, %arg1: memref<2x49xf32, #tpu.memory_space<vmem>>, %arg2: memref<1xf32, #tpu.memory_space<smem>>, %arg3: memref<2x256xi32, #tpu.memory_space<vmem>>, %arg4: memref<1x1x4x256xf32, #tpu.memory_space<vmem>>, %arg5: memref<1x1x4x256xf32, #tpu.memory_space<vmem>>, %arg6: memref<2x384xf32, #tpu.memory_space<vmem>>, %arg7: memref<1x256xf32, #tpu.memory_space<vmem>>) attributes {dimension_semantics = [#tpu.dimension_semantics<parallel>], iteration_bounds = array<i64: 2>, scalar_prefetch = 0 : i64, scratch_operands = 2 : i64, tpu.core_type = #tpu.core_type<tc>, window_params = [{pipeline_mode = #tpu.pipeline_mode<synchronous>, transform_indices = @transform_0, window_bounds = array<i64: 2, 49>}, {transform_indices = @transform_1, window_bounds = array<i64: 1>}, {pipeline_mode = #tpu.pipeline_mode<synchronous>, transform_indices = @transform_2, window_bounds = array<i64: 2, 256>}, {transform_indices = @transform_3, window_bounds = array<i64: 1, 1, 4, 256>}, {transform_indices = @transform_4, window_bounds = array<i64: 1, 1, 4, 256>}]} {
    %cst = arith.constant 0.000000e+00 : f32
    %0 = vector.broadcast %cst : f32 to vector<1x256xf32>
    %cst_0 = arith.constant 0xFF800000 : f32
    %1 = vector.broadcast %cst_0 : f32 to vector<1x256xf32>
    %c0_i32 = arith.constant 0 : i32
    %c0 = arith.constant 0 : index
    %2 = arith.index_cast %c0_i32 : i32 to index
    %c0_1 = arith.constant 0 : index
    %c0_2 = arith.constant 0 : index
    %3 = vector.load %arg4[%c0, %2, %c0_1, %c0_2] : memref<1x1x4x256xf32, #tpu.memory_space<vmem>>, vector<1x1x4x256xf32>
    %4 = vector.shape_cast %3 : vector<1x1x4x256xf32> to vector<4x256xf32>
    %cst_3 = arith.constant dense<0.000000e+00> : vector<256xf32>
    %5 = vector.multi_reduction <add>, %4, %cst_3 [0] : vector<4x256xf32> to vector<256xf32>
    %6 = vector.shape_cast %5 : vector<256xf32> to vector<1x256xf32>
    %7 = arith.addf %0, %6 : vector<1x256xf32>
    %cst_4 = arith.constant dense<0xFF800000> : vector<256xf32>
    %8 = vector.multi_reduction <maximumf>, %4, %cst_4 [0] : vector<4x256xf32> to vector<256xf32>
    %9 = vector.shape_cast %8 : vector<256xf32> to vector<1x256xf32>
    %10 = arith.maximumf %1, %9 : vector<1x256xf32>
    %c1_i32 = arith.constant 1 : i32
    %cst_5 = arith.constant 2.500000e-01 : f32
    %11 = vector.broadcast %cst_5 : f32 to vector<1x256xf32>
    %12 = arith.mulf %7, %11 : vector<1x256xf32>
    %cst_6 = arith.constant 0.000000e+00 : f32
    %13 = vector.broadcast %cst_6 : f32 to vector<2x384xf32>
    %c0_7 = arith.constant 0 : index
    %c0_8 = arith.constant 0 : index
    %14 = vector.load %arg6[%c0_7, %c0_8] : memref<2x384xf32, #tpu.memory_space<vmem>>, vector<2x384xf32>
    tpu.vector_store %arg6[%c0_7, %c0_8], %13 {strides = array<i32>} : memref<2x384xf32, #tpu.memory_space<vmem>>, vector<2x384xf32>,
    %c0_9 = arith.constant 0 : index
    %c51 = arith.constant 51 : index
    %15 = vector.load %arg6[%c0_9, %c51] : memref<2x384xf32, #tpu.memory_space<vmem>>, vector<1x256xf32>
    tpu.vector_store %arg6[%c0_9, %c51], %12 {strides = array<i32>} : memref<2x384xf32, #tpu.memory_space<vmem>>, vector<1x256xf32>,
    %c1 = arith.constant 1 : index
    %c51_10 = arith.constant 51 : index
    %16 = vector.load %arg6[%c1, %c51_10] : memref<2x384xf32, #tpu.memory_space<vmem>>, vector<1x256xf32>
    tpu.vector_store %arg6[%c1, %c51_10], %10 {strides = array<i32>} : memref<2x384xf32, #tpu.memory_space<vmem>>, vector<1x256xf32>,
    %c0_11 = arith.constant 0 : index
    %c0_12 = arith.constant 0 : index
    %17 = vector.load %arg3[%c0_11, %c0_12] : memref<2x256xi32, #tpu.memory_space<vmem>>, vector<2x256xi32>
    %cst_13 = arith.constant 0.000000e+00 : f32
    %18 = vector.broadcast %cst_13 : f32 to vector<2x256xf32>
    %c-3_i32 = arith.constant -3 : i32
    %19 = vector.broadcast %c-3_i32 : i32 to vector<2x256xi32>
    %20 = arith.addi %17, %19 : vector<2x256xi32>
    %c0_i32_14 = arith.constant 0 : i32
    %21 = vector.broadcast %c0_i32_14 : i32 to vector<2x256xi32>
    %22 = arith.cmpi sge, %20, %21 : vector<2x256xi32>
    %c-3_i32_15 = arith.constant -3 : i32
    %23 = vector.broadcast %c-3_i32_15 : i32 to vector<2x256xi32>
    %24 = arith.addi %17, %23 : vector<2x256xi32>
    %c16_i32 = arith.constant 16 : i32
    %25 = vector.broadcast %c16_i32 : i32 to vector<2x256xi32>
    %26 = arith.cmpi slt, %24, %25 : vector<2x256xi32>
    %27 = arith.andi %22, %26 : vector<2x256xi1>
    %c0_16 = arith.constant 0 : index
    %c0_17 = arith.constant 0 : index
    %28 = vector.load %arg6[%c0_16, %c0_17] : memref<2x384xf32, #tpu.memory_space<vmem>>, vector<2x256xf32>
    %c0_18 = arith.constant 0 : index
    %c0_19 = arith.constant 0 : index
    %29 = vector.load %arg1[%c0_18, %c0_19] : memref<2x49xf32, #tpu.memory_space<vmem>>, vector<2x1xf32>
    %30 = vector.broadcast %29 : vector<2x1xf32> to vector<2x256xf32>
    %31 = arith.mulf %30, %28 : vector<2x256xf32>
    %cst_20 = arith.constant 0.000000e+00 : f32
    %32 = vector.broadcast %cst_20 : f32 to vector<2x256xf32>
    %33 = arith.select %27, %31, %32 : vector<2x256xi1>, vector<2x256xf32>
    %34 = arith.addf %18, %33 : vector<2x256xf32>
    %c0_21 = arith.constant 0 : index
    %c16 = arith.constant 16 : index
    %35 = vector.load %arg6[%c0_21, %c16] : memref<2x384xf32, #tpu.memory_space<vmem>>, vector<2x256xf32>
    %c0_22 = arith.constant 0 : index
    %c7 = arith.constant 7 : index
    %36 = vector.load %arg1[%c0_22, %c7] : memref<2x49xf32, #tpu.memory_space<vmem>>, vector<2x1xf32>
    %37 = vector.broadcast %36 : vector<2x1xf32> to vector<2x256xf32>
    %38 = arith.mulf %37, %35 : vector<2x256xf32>
    %cst_23 = arith.constant 0.000000e+00 : f32
    %39 = vector.broadcast %cst_23 : f32 to vector<2x256xf32>
    %40 = arith.select %27, %38, %39 : vector<2x256xi1>, vector<2x256xf32>
    %41 = arith.addf %34, %40 : vector<2x256xf32>
    %c0_24 = arith.constant 0 : index
    %c32 = arith.constant 32 : index
    %42 = vector.load %arg6[%c0_24, %c32] : memref<2x384xf32, #tpu.memory_space<vmem>>, vector<2x256xf32>
    %c0_25 = arith.constant 0 : index
    %c14 = arith.constant 14 : index
    %43 = vector.load %arg1[%c0_25, %c14] : memref<2x49xf32, #tpu.memory_space<vmem>>, vector<2x1xf32>
    %44 = vector.broadcast %43 : vector<2x1xf32> to vector<2x256xf32>
    %45 = arith.mulf %44, %42 : vector<2x256xf32>
    %cst_26 = arith.constant 0.000000e+00 : f32
    %46 = vector.broadcast %cst_26 : f32 to vector<2x256xf32>
    %47 = arith.select %27, %45, %46 : vector<2x256xi1>, vector<2x256xf32>
    %48 = arith.addf %41, %47 : vector<2x256xf32>
    %c0_27 = arith.constant 0 : index
    %c48 = arith.constant 48 : index
    %49 = vector.load %arg6[%c0_27, %c48] : memref<2x384xf32, #tpu.memory_space<vmem>>, vector<2x256xf32>
    %c0_28 = arith.constant 0 : index
    %c21 = arith.constant 21 : index
    %50 = vector.load %arg1[%c0_28, %c21] : memref<2x49xf32, #tpu.memory_space<vmem>>, vector<2x1xf32>
    %51 = vector.broadcast %50 : vector<2x1xf32> to vector<2x256xf32>
    %52 = arith.mulf %51, %49 : vector<2x256xf32>
    %cst_29 = arith.constant 0.000000e+00 : f32
    %53 = vector.broadcast %cst_29 : f32 to vector<2x256xf32>
    %54 = arith.select %27, %52, %53 : vector<2x256xi1>, vector<2x256xf32>
    %55 = arith.addf %48, %54 : vector<2x256xf32>
    %c0_30 = arith.constant 0 : index
    %c64 = arith.constant 64 : index
    %56 = vector.load %arg6[%c0_30, %c64] : memref<2x384xf32, #tpu.memory_space<vmem>>, vector<2x256xf32>
    %c0_31 = arith.constant 0 : index
    %c28 = arith.constant 28 : index
    %57 = vector.load %arg1[%c0_31, %c28] : memref<2x49xf32, #tpu.memory_space<vmem>>, vector<2x1xf32>
    %58 = vector.broadcast %57 : vector<2x1xf32> to vector<2x256xf32>
    %59 = arith.mulf %58, %56 : vector<2x256xf32>
    %cst_32 = arith.constant 0.000000e+00 : f32
    %60 = vector.broadcast %cst_32 : f32 to vector<2x256xf32>
    %61 = arith.select %27, %59, %60 : vector<2x256xi1>, vector<2x256xf32>
    %62 = arith.addf %55, %61 : vector<2x256xf32>
    %c0_33 = arith.constant 0 : index
    %c80 = arith.constant 80 : index
    %63 = vector.load %arg6[%c0_33, %c80] : memref<2x384xf32, #tpu.memory_space<vmem>>, vector<2x256xf32>
    %c0_34 = arith.constant 0 : index
    %c35 = arith.constant 35 : index
    %64 = vector.load %arg1[%c0_34, %c35] : memref<2x49xf32, #tpu.memory_space<vmem>>, vector<2x1xf32>
    %65 = vector.broadcast %64 : vector<2x1xf32> to vector<2x256xf32>
    %66 = arith.mulf %65, %63 : vector<2x256xf32>
    %cst_35 = arith.constant 0.000000e+00 : f32
    %67 = vector.broadcast %cst_35 : f32 to vector<2x256xf32>
    %68 = arith.select %27, %66, %67 : vector<2x256xi1>, vector<2x256xf32>
    %69 = arith.addf %62, %68 : vector<2x256xf32>
    %c0_36 = arith.constant 0 : index
    %c96 = arith.constant 96 : index
    %70 = vector.load %arg6[%c0_36, %c96] : memref<2x384xf32, #tpu.memory_space<vmem>>, vector<2x256xf32>
    %c0_37 = arith.constant 0 : index
    %c42 = arith.constant 42 : index
    %71 = vector.load %arg1[%c0_37, %c42] : memref<2x49xf32, #tpu.memory_space<vmem>>, vector<2x1xf32>
    %72 = vector.broadcast %71 : vector<2x1xf32> to vector<2x256xf32>
    %73 = arith.mulf %72, %70 : vector<2x256xf32>
    %cst_38 = arith.constant 0.000000e+00 : f32
    %74 = vector.broadcast %cst_38 : f32 to vector<2x256xf32>
    %75 = arith.select %27, %73, %74 : vector<2x256xi1>, vector<2x256xf32>
    %76 = arith.addf %69, %75 : vector<2x256xf32>
    %c-2_i32 = arith.constant -2 : i32
    %77 = vector.broadcast %c-2_i32 : i32 to vector<2x256xi32>
    %78 = arith.addi %17, %77 : vector<2x256xi32>
    %c0_i32_39 = arith.constant 0 : i32
    %79 = vector.broadcast %c0_i32_39 : i32 to vector<2x256xi32>
    %80 = arith.cmpi sge, %78, %79 : vector<2x256xi32>
    %c-2_i32_40 = arith.constant -2 : i32
    %81 = vector.broadcast %c-2_i32_40 : i32 to vector<2x256xi32>
    %82 = arith.addi %17, %81 : vector<2x256xi32>
    %c16_i32_41 = arith.constant 16 : i32
    %83 = vector.broadcast %c16_i32_41 : i32 to vector<2x256xi32>
    %84 = arith.cmpi slt, %82, %83 : vector<2x256xi32>
    %85 = arith.andi %80, %84 : vector<2x256xi1>
    %c0_42 = arith.constant 0 : index
    %c1_43 = arith.constant 1 : index
    %86 = vector.load %arg6[%c0_42, %c1_43] : memref<2x384xf32, #tpu.memory_space<vmem>>, vector<2x256xf32>
    %c0_44 = arith.constant 0 : index
    %c1_45 = arith.constant 1 : index
    %87 = vector.load %arg1[%c0_44, %c1_45] : memref<2x49xf32, #tpu.memory_space<vmem>>, vector<2x1xf32>
    %88 = vector.broadcast %87 : vector<2x1xf32> to vector<2x256xf32>
    %89 = arith.mulf %88, %86 : vector<2x256xf32>
    %cst_46 = arith.constant 0.000000e+00 : f32
    %90 = vector.broadcast %cst_46 : f32 to vector<2x256xf32>
    %91 = arith.select %85, %89, %90 : vector<2x256xi1>, vector<2x256xf32>
    %92 = arith.addf %76, %91 : vector<2x256xf32>
    %c0_47 = arith.constant 0 : index
    %c17 = arith.constant 17 : index
    %93 = vector.load %arg6[%c0_47, %c17] : memref<2x384xf32, #tpu.memory_space<vmem>>, vector<2x256xf32>
    %c0_48 = arith.constant 0 : index
    %c8 = arith.constant 8 : index
    %94 = vector.load %arg1[%c0_48, %c8] : memref<2x49xf32, #tpu.memory_space<vmem>>, vector<2x1xf32>
    %95 = vector.broadcast %94 : vector<2x1xf32> to vector<2x256xf32>
    %96 = arith.mulf %95, %93 : vector<2x256xf32>
    %cst_49 = arith.constant 0.000000e+00 : f32
    %97 = vector.broadcast %cst_49 : f32 to vector<2x256xf32>
    %98 = arith.select %85, %96, %97 : vector<2x256xi1>, vector<2x256xf32>
    %99 = arith.addf %92, %98 : vector<2x256xf32>
    %c0_50 = arith.constant 0 : index
    %c33 = arith.constant 33 : index
    %100 = vector.load %arg6[%c0_50, %c33] : memref<2x384xf32, #tpu.memory_space<vmem>>, vector<2x256xf32>
    %c0_51 = arith.constant 0 : index
    %c15 = arith.constant 15 : index
    %101 = vector.load %arg1[%c0_51, %c15] : memref<2x49xf32, #tpu.memory_space<vmem>>, vector<2x1xf32>
    %102 = vector.broadcast %101 : vector<2x1xf32> to vector<2x256xf32>
    %103 = arith.mulf %102, %100 : vector<2x256xf32>
    %cst_52 = arith.constant 0.000000e+00 : f32
    %104 = vector.broadcast %cst_52 : f32 to vector<2x256xf32>
    %105 = arith.select %85, %103, %104 : vector<2x256xi1>, vector<2x256xf32>
    %106 = arith.addf %99, %105 : vector<2x256xf32>
    %c0_53 = arith.constant 0 : index
    %c49 = arith.constant 49 : index
    %107 = vector.load %arg6[%c0_53, %c49] : memref<2x384xf32, #tpu.memory_space<vmem>>, vector<2x256xf32>
    %c0_54 = arith.constant 0 : index
    %c22 = arith.constant 22 : index
    %108 = vector.load %arg1[%c0_54, %c22] : memref<2x49xf32, #tpu.memory_space<vmem>>, vector<2x1xf32>
    %109 = vector.broadcast %108 : vector<2x1xf32> to vector<2x256xf32>
    %110 = arith.mulf %109, %107 : vector<2x256xf32>
    %cst_55 = arith.constant 0.000000e+00 : f32
    %111 = vector.broadcast %cst_55 : f32 to vector<2x256xf32>
    %112 = arith.select %85, %110, %111 : vector<2x256xi1>, vector<2x256xf32>
    %113 = arith.addf %106, %112 : vector<2x256xf32>
    %c0_56 = arith.constant 0 : index
    %c65 = arith.constant 65 : index
    %114 = vector.load %arg6[%c0_56, %c65] : memref<2x384xf32, #tpu.memory_space<vmem>>, vector<2x256xf32>
    %c0_57 = arith.constant 0 : index
    %c29 = arith.constant 29 : index
    %115 = vector.load %arg1[%c0_57, %c29] : memref<2x49xf32, #tpu.memory_space<vmem>>, vector<2x1xf32>
    %116 = vector.broadcast %115 : vector<2x1xf32> to vector<2x256xf32>
    %117 = arith.mulf %116, %114 : vector<2x256xf32>
    %cst_58 = arith.constant 0.000000e+00 : f32
    %118 = vector.broadcast %cst_58 : f32 to vector<2x256xf32>
    %119 = arith.select %85, %117, %118 : vector<2x256xi1>, vector<2x256xf32>
    %120 = arith.addf %113, %119 : vector<2x256xf32>
    %c0_59 = arith.constant 0 : index
    %c81 = arith.constant 81 : index
    %121 = vector.load %arg6[%c0_59, %c81] : memref<2x384xf32, #tpu.memory_space<vmem>>, vector<2x256xf32>
    %c0_60 = arith.constant 0 : index
    %c36 = arith.constant 36 : index
    %122 = vector.load %arg1[%c0_60, %c36] : memref<2x49xf32, #tpu.memory_space<vmem>>, vector<2x1xf32>
    %123 = vector.broadcast %122 : vector<2x1xf32> to vector<2x256xf32>
    %124 = arith.mulf %123, %121 : vector<2x256xf32>
    %cst_61 = arith.constant 0.000000e+00 : f32
    %125 = vector.broadcast %cst_61 : f32 to vector<2x256xf32>
    %126 = arith.select %85, %124, %125 : vector<2x256xi1>, vector<2x256xf32>
    %127 = arith.addf %120, %126 : vector<2x256xf32>
    %c0_62 = arith.constant 0 : index
    %c97 = arith.constant 97 : index
    %128 = vector.load %arg6[%c0_62, %c97] : memref<2x384xf32, #tpu.memory_space<vmem>>, vector<2x256xf32>
    %c0_63 = arith.constant 0 : index
    %c43 = arith.constant 43 : index
    %129 = vector.load %arg1[%c0_63, %c43] : memref<2x49xf32, #tpu.memory_space<vmem>>, vector<2x1xf32>
    %130 = vector.broadcast %129 : vector<2x1xf32> to vector<2x256xf32>
    %131 = arith.mulf %130, %128 : vector<2x256xf32>
    %cst_64 = arith.constant 0.000000e+00 : f32
    %132 = vector.broadcast %cst_64 : f32 to vector<2x256xf32>
    %133 = arith.select %85, %131, %132 : vector<2x256xi1>, vector<2x256xf32>
    %134 = arith.addf %127, %133 : vector<2x256xf32>
    %c-1_i32 = arith.constant -1 : i32
    %135 = vector.broadcast %c-1_i32 : i32 to vector<2x256xi32>
    %136 = arith.addi %17, %135 : vector<2x256xi32>
    %c0_i32_65 = arith.constant 0 : i32
    %137 = vector.broadcast %c0_i32_65 : i32 to vector<2x256xi32>
    %138 = arith.cmpi sge, %136, %137 : vector<2x256xi32>
    %c-1_i32_66 = arith.constant -1 : i32
    %139 = vector.broadcast %c-1_i32_66 : i32 to vector<2x256xi32>
    %140 = arith.addi %17, %139 : vector<2x256xi32>
    %c16_i32_67 = arith.constant 16 : i32
    %141 = vector.broadcast %c16_i32_67 : i32 to vector<2x256xi32>
    %142 = arith.cmpi slt, %140, %141 : vector<2x256xi32>
    %143 = arith.andi %138, %142 : vector<2x256xi1>
    %c0_68 = arith.constant 0 : index
    %c2 = arith.constant 2 : index
    %144 = vector.load %arg6[%c0_68, %c2] : memref<2x384xf32, #tpu.memory_space<vmem>>, vector<2x256xf32>
    %c0_69 = arith.constant 0 : index
    %c2_70 = arith.constant 2 : index
    %145 = vector.load %arg1[%c0_69, %c2_70] : memref<2x49xf32, #tpu.memory_space<vmem>>, vector<2x1xf32>
    %146 = vector.broadcast %145 : vector<2x1xf32> to vector<2x256xf32>
    %147 = arith.mulf %146, %144 : vector<2x256xf32>
    %cst_71 = arith.constant 0.000000e+00 : f32
    %148 = vector.broadcast %cst_71 : f32 to vector<2x256xf32>
    %149 = arith.select %143, %147, %148 : vector<2x256xi1>, vector<2x256xf32>
    %150 = arith.addf %134, %149 : vector<2x256xf32>
    %c0_72 = arith.constant 0 : index
    %c18 = arith.constant 18 : index
    %151 = vector.load %arg6[%c0_72, %c18] : memref<2x384xf32, #tpu.memory_space<vmem>>, vector<2x256xf32>
    %c0_73 = arith.constant 0 : index
    %c9 = arith.constant 9 : index
    %152 = vector.load %arg1[%c0_73, %c9] : memref<2x49xf32, #tpu.memory_space<vmem>>, vector<2x1xf32>
    %153 = vector.broadcast %152 : vector<2x1xf32> to vector<2x256xf32>
    %154 = arith.mulf %153, %151 : vector<2x256xf32>
    %cst_74 = arith.constant 0.000000e+00 : f32
    %155 = vector.broadcast %cst_74 : f32 to vector<2x256xf32>
    %156 = arith.select %143, %154, %155 : vector<2x256xi1>, vector<2x256xf32>
    %157 = arith.addf %150, %156 : vector<2x256xf32>
    %c0_75 = arith.constant 0 : index
    %c34 = arith.constant 34 : index
    %158 = vector.load %arg6[%c0_75, %c34] : memref<2x384xf32, #tpu.memory_space<vmem>>, vector<2x256xf32>
    %c0_76 = arith.constant 0 : index
    %c16_77 = arith.constant 16 : index
    %159 = vector.load %arg1[%c0_76, %c16_77] : memref<2x49xf32, #tpu.memory_space<vmem>>, vector<2x1xf32>
    %160 = vector.broadcast %159 : vector<2x1xf32> to vector<2x256xf32>
    %161 = arith.mulf %160, %158 : vector<2x256xf32>
    %cst_78 = arith.constant 0.000000e+00 : f32
    %162 = vector.broadcast %cst_78 : f32 to vector<2x256xf32>
    %163 = arith.select %143, %161, %162 : vector<2x256xi1>, vector<2x256xf32>
    %164 = arith.addf %157, %163 : vector<2x256xf32>
    %c0_79 = arith.constant 0 : index
    %c50 = arith.constant 50 : index
    %165 = vector.load %arg6[%c0_79, %c50] : memref<2x384xf32, #tpu.memory_space<vmem>>, vector<2x256xf32>
    %c0_80 = arith.constant 0 : index
    %c23 = arith.constant 23 : index
    %166 = vector.load %arg1[%c0_80, %c23] : memref<2x49xf32, #tpu.memory_space<vmem>>, vector<2x1xf32>
    %167 = vector.broadcast %166 : vector<2x1xf32> to vector<2x256xf32>
    %168 = arith.mulf %167, %165 : vector<2x256xf32>
    %cst_81 = arith.constant 0.000000e+00 : f32
    %169 = vector.broadcast %cst_81 : f32 to vector<2x256xf32>
    %170 = arith.select %143, %168, %169 : vector<2x256xi1>, vector<2x256xf32>
    %171 = arith.addf %164, %170 : vector<2x256xf32>
    %c0_82 = arith.constant 0 : index
    %c66 = arith.constant 66 : index
    %172 = vector.load %arg6[%c0_82, %c66] : memref<2x384xf32, #tpu.memory_space<vmem>>, vector<2x256xf32>
    %c0_83 = arith.constant 0 : index
    %c30 = arith.constant 30 : index
    %173 = vector.load %arg1[%c0_83, %c30] : memref<2x49xf32, #tpu.memory_space<vmem>>, vector<2x1xf32>
    %174 = vector.broadcast %173 : vector<2x1xf32> to vector<2x256xf32>
    %175 = arith.mulf %174, %172 : vector<2x256xf32>
    %cst_84 = arith.constant 0.000000e+00 : f32
    %176 = vector.broadcast %cst_84 : f32 to vector<2x256xf32>
    %177 = arith.select %143, %175, %176 : vector<2x256xi1>, vector<2x256xf32>
    %178 = arith.addf %171, %177 : vector<2x256xf32>
    %c0_85 = arith.constant 0 : index
    %c82 = arith.constant 82 : index
    %179 = vector.load %arg6[%c0_85, %c82] : memref<2x384xf32, #tpu.memory_space<vmem>>, vector<2x256xf32>
    %c0_86 = arith.constant 0 : index
    %c37 = arith.constant 37 : index
    %180 = vector.load %arg1[%c0_86, %c37] : memref<2x49xf32, #tpu.memory_space<vmem>>, vector<2x1xf32>
    %181 = vector.broadcast %180 : vector<2x1xf32> to vector<2x256xf32>
    %182 = arith.mulf %181, %179 : vector<2x256xf32>
    %cst_87 = arith.constant 0.000000e+00 : f32
    %183 = vector.broadcast %cst_87 : f32 to vector<2x256xf32>
    %184 = arith.select %143, %182, %183 : vector<2x256xi1>, vector<2x256xf32>
    %185 = arith.addf %178, %184 : vector<2x256xf32>
    %c0_88 = arith.constant 0 : index
    %c98 = arith.constant 98 : index
    %186 = vector.load %arg6[%c0_88, %c98] : memref<2x384xf32, #tpu.memory_space<vmem>>, vector<2x256xf32>
    %c0_89 = arith.constant 0 : index
    %c44 = arith.constant 44 : index
    %187 = vector.load %arg1[%c0_89, %c44] : memref<2x49xf32, #tpu.memory_space<vmem>>, vector<2x1xf32>
    %188 = vector.broadcast %187 : vector<2x1xf32> to vector<2x256xf32>
    %189 = arith.mulf %188, %186 : vector<2x256xf32>
    %cst_90 = arith.constant 0.000000e+00 : f32
    %190 = vector.broadcast %cst_90 : f32 to vector<2x256xf32>
    %191 = arith.select %143, %189, %190 : vector<2x256xi1>, vector<2x256xf32>
    %192 = arith.addf %185, %191 : vector<2x256xf32>
    %c0_i32_91 = arith.constant 0 : i32
    %193 = vector.broadcast %c0_i32_91 : i32 to vector<2x256xi32>
    %194 = arith.addi %17, %193 : vector<2x256xi32>
    %c0_i32_92 = arith.constant 0 : i32
    %195 = vector.broadcast %c0_i32_92 : i32 to vector<2x256xi32>
    %196 = arith.cmpi sge, %194, %195 : vector<2x256xi32>
    %c0_i32_93 = arith.constant 0 : i32
    %197 = vector.broadcast %c0_i32_93 : i32 to vector<2x256xi32>
    %198 = arith.addi %17, %197 : vector<2x256xi32>
    %c16_i32_94 = arith.constant 16 : i32
    %199 = vector.broadcast %c16_i32_94 : i32 to vector<2x256xi32>
    %200 = arith.cmpi slt, %198, %199 : vector<2x256xi32>
    %201 = arith.andi %196, %200 : vector<2x256xi1>
    %c0_95 = arith.constant 0 : index
    %c3 = arith.constant 3 : index
    %202 = vector.load %arg6[%c0_95, %c3] : memref<2x384xf32, #tpu.memory_space<vmem>>, vector<2x256xf32>
    %c0_96 = arith.constant 0 : index
    %c3_97 = arith.constant 3 : index
    %203 = vector.load %arg1[%c0_96, %c3_97] : memref<2x49xf32, #tpu.memory_space<vmem>>, vector<2x1xf32>
    %204 = vector.broadcast %203 : vector<2x1xf32> to vector<2x256xf32>
    %205 = arith.mulf %204, %202 : vector<2x256xf32>
    %cst_98 = arith.constant 0.000000e+00 : f32
    %206 = vector.broadcast %cst_98 : f32 to vector<2x256xf32>
    %207 = arith.select %201, %205, %206 : vector<2x256xi1>, vector<2x256xf32>
    %208 = arith.addf %192, %207 : vector<2x256xf32>
    %c0_99 = arith.constant 0 : index
    %c19 = arith.constant 19 : index
    %209 = vector.load %arg6[%c0_99, %c19] : memref<2x384xf32, #tpu.memory_space<vmem>>, vector<2x256xf32>
    %c0_100 = arith.constant 0 : index
    %c10 = arith.constant 10 : index
    %210 = vector.load %arg1[%c0_100, %c10] : memref<2x49xf32, #tpu.memory_space<vmem>>, vector<2x1xf32>
    %211 = vector.broadcast %210 : vector<2x1xf32> to vector<2x256xf32>
    %212 = arith.mulf %211, %209 : vector<2x256xf32>
    %cst_101 = arith.constant 0.000000e+00 : f32
    %213 = vector.broadcast %cst_101 : f32 to vector<2x256xf32>
    %214 = arith.select %201, %212, %213 : vector<2x256xi1>, vector<2x256xf32>
    %215 = arith.addf %208, %214 : vector<2x256xf32>
    %c0_102 = arith.constant 0 : index
    %c35_103 = arith.constant 35 : index
    %216 = vector.load %arg6[%c0_102, %c35_103] : memref<2x384xf32, #tpu.memory_space<vmem>>, vector<2x256xf32>
    %c0_104 = arith.constant 0 : index
    %c17_105 = arith.constant 17 : index
    %217 = vector.load %arg1[%c0_104, %c17_105] : memref<2x49xf32, #tpu.memory_space<vmem>>, vector<2x1xf32>
    %218 = vector.broadcast %217 : vector<2x1xf32> to vector<2x256xf32>
    %219 = arith.mulf %218, %216 : vector<2x256xf32>
    %cst_106 = arith.constant 0.000000e+00 : f32
    %220 = vector.broadcast %cst_106 : f32 to vector<2x256xf32>
    %221 = arith.select %201, %219, %220 : vector<2x256xi1>, vector<2x256xf32>
    %222 = arith.addf %215, %221 : vector<2x256xf32>
    %c0_107 = arith.constant 0 : index
    %c51_108 = arith.constant 51 : index
    %223 = vector.load %arg6[%c0_107, %c51_108] : memref<2x384xf32, #tpu.memory_space<vmem>>, vector<2x256xf32>
    %c0_109 = arith.constant 0 : index
    %c24 = arith.constant 24 : index
    %224 = vector.load %arg1[%c0_109, %c24] : memref<2x49xf32, #tpu.memory_space<vmem>>, vector<2x1xf32>
    %225 = vector.broadcast %224 : vector<2x1xf32> to vector<2x256xf32>
    %226 = arith.mulf %225, %223 : vector<2x256xf32>
    %cst_110 = arith.constant 0.000000e+00 : f32
    %227 = vector.broadcast %cst_110 : f32 to vector<2x256xf32>
    %228 = arith.select %201, %226, %227 : vector<2x256xi1>, vector<2x256xf32>
    %229 = arith.addf %222, %228 : vector<2x256xf32>
    %c0_111 = arith.constant 0 : index
    %c67 = arith.constant 67 : index
    %230 = vector.load %arg6[%c0_111, %c67] : memref<2x384xf32, #tpu.memory_space<vmem>>, vector<2x256xf32>
    %c0_112 = arith.constant 0 : index
    %c31 = arith.constant 31 : index
    %231 = vector.load %arg1[%c0_112, %c31] : memref<2x49xf32, #tpu.memory_space<vmem>>, vector<2x1xf32>
    %232 = vector.broadcast %231 : vector<2x1xf32> to vector<2x256xf32>
    %233 = arith.mulf %232, %230 : vector<2x256xf32>
    %cst_113 = arith.constant 0.000000e+00 : f32
    %234 = vector.broadcast %cst_113 : f32 to vector<2x256xf32>
    %235 = arith.select %201, %233, %234 : vector<2x256xi1>, vector<2x256xf32>
    %236 = arith.addf %229, %235 : vector<2x256xf32>
    %c0_114 = arith.constant 0 : index
    %c83 = arith.constant 83 : index
    %237 = vector.load %arg6[%c0_114, %c83] : memref<2x384xf32, #tpu.memory_space<vmem>>, vector<2x256xf32>
    %c0_115 = arith.constant 0 : index
    %c38 = arith.constant 38 : index
    %238 = vector.load %arg1[%c0_115, %c38] : memref<2x49xf32, #tpu.memory_space<vmem>>, vector<2x1xf32>
    %239 = vector.broadcast %238 : vector<2x1xf32> to vector<2x256xf32>
    %240 = arith.mulf %239, %237 : vector<2x256xf32>
    %cst_116 = arith.constant 0.000000e+00 : f32
    %241 = vector.broadcast %cst_116 : f32 to vector<2x256xf32>
    %242 = arith.select %201, %240, %241 : vector<2x256xi1>, vector<2x256xf32>
    %243 = arith.addf %236, %242 : vector<2x256xf32>
    %c0_117 = arith.constant 0 : index
    %c99 = arith.constant 99 : index
    %244 = vector.load %arg6[%c0_117, %c99] : memref<2x384xf32, #tpu.memory_space<vmem>>, vector<2x256xf32>
    %c0_118 = arith.constant 0 : index
    %c45 = arith.constant 45 : index
    %245 = vector.load %arg1[%c0_118, %c45] : memref<2x49xf32, #tpu.memory_space<vmem>>, vector<2x1xf32>
    %246 = vector.broadcast %245 : vector<2x1xf32> to vector<2x256xf32>
    %247 = arith.mulf %246, %244 : vector<2x256xf32>
    %cst_119 = arith.constant 0.000000e+00 : f32
    %248 = vector.broadcast %cst_119 : f32 to vector<2x256xf32>
    %249 = arith.select %201, %247, %248 : vector<2x256xi1>, vector<2x256xf32>
    %250 = arith.addf %243, %249 : vector<2x256xf32>
    %c1_i32_120 = arith.constant 1 : i32
    %251 = vector.broadcast %c1_i32_120 : i32 to vector<2x256xi32>
    %252 = arith.addi %17, %251 : vector<2x256xi32>
    %c0_i32_121 = arith.constant 0 : i32
    %253 = vector.broadcast %c0_i32_121 : i32 to vector<2x256xi32>
    %254 = arith.cmpi sge, %252, %253 : vector<2x256xi32>
    %c1_i32_122 = arith.constant 1 : i32
    %255 = vector.broadcast %c1_i32_122 : i32 to vector<2x256xi32>
    %256 = arith.addi %17, %255 : vector<2x256xi32>
    %c16_i32_123 = arith.constant 16 : i32
    %257 = vector.broadcast %c16_i32_123 : i32 to vector<2x256xi32>
    %258 = arith.cmpi slt, %256, %257 : vector<2x256xi32>
    %259 = arith.andi %254, %258 : vector<2x256xi1>
    %c0_124 = arith.constant 0 : index
    %c4 = arith.constant 4 : index
    %260 = vector.load %arg6[%c0_124, %c4] : memref<2x384xf32, #tpu.memory_space<vmem>>, vector<2x256xf32>
    %c0_125 = arith.constant 0 : index
    %c4_126 = arith.constant 4 : index
    %261 = vector.load %arg1[%c0_125, %c4_126] : memref<2x49xf32, #tpu.memory_space<vmem>>, vector<2x1xf32>
    %262 = vector.broadcast %261 : vector<2x1xf32> to vector<2x256xf32>
    %263 = arith.mulf %262, %260 : vector<2x256xf32>
    %cst_127 = arith.constant 0.000000e+00 : f32
    %264 = vector.broadcast %cst_127 : f32 to vector<2x256xf32>
    %265 = arith.select %259, %263, %264 : vector<2x256xi1>, vector<2x256xf32>
    %266 = arith.addf %250, %265 : vector<2x256xf32>
    %c0_128 = arith.constant 0 : index
    %c20 = arith.constant 20 : index
    %267 = vector.load %arg6[%c0_128, %c20] : memref<2x384xf32, #tpu.memory_space<vmem>>, vector<2x256xf32>
    %c0_129 = arith.constant 0 : index
    %c11 = arith.constant 11 : index
    %268 = vector.load %arg1[%c0_129, %c11] : memref<2x49xf32, #tpu.memory_space<vmem>>, vector<2x1xf32>
    %269 = vector.broadcast %268 : vector<2x1xf32> to vector<2x256xf32>
    %270 = arith.mulf %269, %267 : vector<2x256xf32>
    %cst_130 = arith.constant 0.000000e+00 : f32
    %271 = vector.broadcast %cst_130 : f32 to vector<2x256xf32>
    %272 = arith.select %259, %270, %271 : vector<2x256xi1>, vector<2x256xf32>
    %273 = arith.addf %266, %272 : vector<2x256xf32>
    %c0_131 = arith.constant 0 : index
    %c36_132 = arith.constant 36 : index
    %274 = vector.load %arg6[%c0_131, %c36_132] : memref<2x384xf32, #tpu.memory_space<vmem>>, vector<2x256xf32>
    %c0_133 = arith.constant 0 : index
    %c18_134 = arith.constant 18 : index
    %275 = vector.load %arg1[%c0_133, %c18_134] : memref<2x49xf32, #tpu.memory_space<vmem>>, vector<2x1xf32>
    %276 = vector.broadcast %275 : vector<2x1xf32> to vector<2x256xf32>
    %277 = arith.mulf %276, %274 : vector<2x256xf32>
    %cst_135 = arith.constant 0.000000e+00 : f32
    %278 = vector.broadcast %cst_135 : f32 to vector<2x256xf32>
    %279 = arith.select %259, %277, %278 : vector<2x256xi1>, vector<2x256xf32>
    %280 = arith.addf %273, %279 : vector<2x256xf32>
    %c0_136 = arith.constant 0 : index
    %c52 = arith.constant 52 : index
    %281 = vector.load %arg6[%c0_136, %c52] : memref<2x384xf32, #tpu.memory_space<vmem>>, vector<2x256xf32>
    %c0_137 = arith.constant 0 : index
    %c25 = arith.constant 25 : index
    %282 = vector.load %arg1[%c0_137, %c25] : memref<2x49xf32, #tpu.memory_space<vmem>>, vector<2x1xf32>
    %283 = vector.broadcast %282 : vector<2x1xf32> to vector<2x256xf32>
    %284 = arith.mulf %283, %281 : vector<2x256xf32>
    %cst_138 = arith.constant 0.000000e+00 : f32
    %285 = vector.broadcast %cst_138 : f32 to vector<2x256xf32>
    %286 = arith.select %259, %284, %285 : vector<2x256xi1>, vector<2x256xf32>
    %287 = arith.addf %280, %286 : vector<2x256xf32>
    %c0_139 = arith.constant 0 : index
    %c68 = arith.constant 68 : index
    %288 = vector.load %arg6[%c0_139, %c68] : memref<2x384xf32, #tpu.memory_space<vmem>>, vector<2x256xf32>
    %c0_140 = arith.constant 0 : index
    %c32_141 = arith.constant 32 : index
    %289 = vector.load %arg1[%c0_140, %c32_141] : memref<2x49xf32, #tpu.memory_space<vmem>>, vector<2x1xf32>
    %290 = vector.broadcast %289 : vector<2x1xf32> to vector<2x256xf32>
    %291 = arith.mulf %290, %288 : vector<2x256xf32>
    %cst_142 = arith.constant 0.000000e+00 : f32
    %292 = vector.broadcast %cst_142 : f32 to vector<2x256xf32>
    %293 = arith.select %259, %291, %292 : vector<2x256xi1>, vector<2x256xf32>
    %294 = arith.addf %287, %293 : vector<2x256xf32>
    %c0_143 = arith.constant 0 : index
    %c84 = arith.constant 84 : index
    %295 = vector.load %arg6[%c0_143, %c84] : memref<2x384xf32, #tpu.memory_space<vmem>>, vector<2x256xf32>
    %c0_144 = arith.constant 0 : index
    %c39 = arith.constant 39 : index
    %296 = vector.load %arg1[%c0_144, %c39] : memref<2x49xf32, #tpu.memory_space<vmem>>, vector<2x1xf32>
    %297 = vector.broadcast %296 : vector<2x1xf32> to vector<2x256xf32>
    %298 = arith.mulf %297, %295 : vector<2x256xf32>
    %cst_145 = arith.constant 0.000000e+00 : f32
    %299 = vector.broadcast %cst_145 : f32 to vector<2x256xf32>
    %300 = arith.select %259, %298, %299 : vector<2x256xi1>, vector<2x256xf32>
    %301 = arith.addf %294, %300 : vector<2x256xf32>
    %c0_146 = arith.constant 0 : index
    %c100 = arith.constant 100 : index
    %302 = vector.load %arg6[%c0_146, %c100] : memref<2x384xf32, #tpu.memory_space<vmem>>, vector<2x256xf32>
    %c0_147 = arith.constant 0 : index
    %c46 = arith.constant 46 : index
    %303 = vector.load %arg1[%c0_147, %c46] : memref<2x49xf32, #tpu.memory_space<vmem>>, vector<2x1xf32>
    %304 = vector.broadcast %303 : vector<2x1xf32> to vector<2x256xf32>
    %305 = arith.mulf %304, %302 : vector<2x256xf32>
    %cst_148 = arith.constant 0.000000e+00 : f32
    %306 = vector.broadcast %cst_148 : f32 to vector<2x256xf32>
    %307 = arith.select %259, %305, %306 : vector<2x256xi1>, vector<2x256xf32>
    %308 = arith.addf %301, %307 : vector<2x256xf32>
    %c2_i32 = arith.constant 2 : i32
    %309 = vector.broadcast %c2_i32 : i32 to vector<2x256xi32>
    %310 = arith.addi %17, %309 : vector<2x256xi32>
    %c0_i32_149 = arith.constant 0 : i32
    %311 = vector.broadcast %c0_i32_149 : i32 to vector<2x256xi32>
    %312 = arith.cmpi sge, %310, %311 : vector<2x256xi32>
    %c2_i32_150 = arith.constant 2 : i32
    %313 = vector.broadcast %c2_i32_150 : i32 to vector<2x256xi32>
    %314 = arith.addi %17, %313 : vector<2x256xi32>
    %c16_i32_151 = arith.constant 16 : i32
    %315 = vector.broadcast %c16_i32_151 : i32 to vector<2x256xi32>
    %316 = arith.cmpi slt, %314, %315 : vector<2x256xi32>
    %317 = arith.andi %312, %316 : vector<2x256xi1>
    %c0_152 = arith.constant 0 : index
    %c5 = arith.constant 5 : index
    %318 = vector.load %arg6[%c0_152, %c5] : memref<2x384xf32, #tpu.memory_space<vmem>>, vector<2x256xf32>
    %c0_153 = arith.constant 0 : index
    %c5_154 = arith.constant 5 : index
    %319 = vector.load %arg1[%c0_153, %c5_154] : memref<2x49xf32, #tpu.memory_space<vmem>>, vector<2x1xf32>
    %320 = vector.broadcast %319 : vector<2x1xf32> to vector<2x256xf32>
    %321 = arith.mulf %320, %318 : vector<2x256xf32>
    %cst_155 = arith.constant 0.000000e+00 : f32
    %322 = vector.broadcast %cst_155 : f32 to vector<2x256xf32>
    %323 = arith.select %317, %321, %322 : vector<2x256xi1>, vector<2x256xf32>
    %324 = arith.addf %308, %323 : vector<2x256xf32>
    %c0_156 = arith.constant 0 : index
    %c21_157 = arith.constant 21 : index
    %325 = vector.load %arg6[%c0_156, %c21_157] : memref<2x384xf32, #tpu.memory_space<vmem>>, vector<2x256xf32>
    %c0_158 = arith.constant 0 : index
    %c12 = arith.constant 12 : index
    %326 = vector.load %arg1[%c0_158, %c12] : memref<2x49xf32, #tpu.memory_space<vmem>>, vector<2x1xf32>
    %327 = vector.broadcast %326 : vector<2x1xf32> to vector<2x256xf32>
    %328 = arith.mulf %327, %325 : vector<2x256xf32>
    %cst_159 = arith.constant 0.000000e+00 : f32
    %329 = vector.broadcast %cst_159 : f32 to vector<2x256xf32>
    %330 = arith.select %317, %328, %329 : vector<2x256xi1>, vector<2x256xf32>
    %331 = arith.addf %324, %330 : vector<2x256xf32>
    %c0_160 = arith.constant 0 : index
    %c37_161 = arith.constant 37 : index
    %332 = vector.load %arg6[%c0_160, %c37_161] : memref<2x384xf32, #tpu.memory_space<vmem>>, vector<2x256xf32>
    %c0_162 = arith.constant 0 : index
    %c19_163 = arith.constant 19 : index
    %333 = vector.load %arg1[%c0_162, %c19_163] : memref<2x49xf32, #tpu.memory_space<vmem>>, vector<2x1xf32>
    %334 = vector.broadcast %333 : vector<2x1xf32> to vector<2x256xf32>
    %335 = arith.mulf %334, %332 : vector<2x256xf32>
    %cst_164 = arith.constant 0.000000e+00 : f32
    %336 = vector.broadcast %cst_164 : f32 to vector<2x256xf32>
    %337 = arith.select %317, %335, %336 : vector<2x256xi1>, vector<2x256xf32>
    %338 = arith.addf %331, %337 : vector<2x256xf32>
    %c0_165 = arith.constant 0 : index
    %c53 = arith.constant 53 : index
    %339 = vector.load %arg6[%c0_165, %c53] : memref<2x384xf32, #tpu.memory_space<vmem>>, vector<2x256xf32>
    %c0_166 = arith.constant 0 : index
    %c26 = arith.constant 26 : index
    %340 = vector.load %arg1[%c0_166, %c26] : memref<2x49xf32, #tpu.memory_space<vmem>>, vector<2x1xf32>
    %341 = vector.broadcast %340 : vector<2x1xf32> to vector<2x256xf32>
    %342 = arith.mulf %341, %339 : vector<2x256xf32>
    %cst_167 = arith.constant 0.000000e+00 : f32
    %343 = vector.broadcast %cst_167 : f32 to vector<2x256xf32>
    %344 = arith.select %317, %342, %343 : vector<2x256xi1>, vector<2x256xf32>
    %345 = arith.addf %338, %344 : vector<2x256xf32>
    %c0_168 = arith.constant 0 : index
    %c69 = arith.constant 69 : index
    %346 = vector.load %arg6[%c0_168, %c69] : memref<2x384xf32, #tpu.memory_space<vmem>>, vector<2x256xf32>
    %c0_169 = arith.constant 0 : index
    %c33_170 = arith.constant 33 : index
    %347 = vector.load %arg1[%c0_169, %c33_170] : memref<2x49xf32, #tpu.memory_space<vmem>>, vector<2x1xf32>
    %348 = vector.broadcast %347 : vector<2x1xf32> to vector<2x256xf32>
    %349 = arith.mulf %348, %346 : vector<2x256xf32>
    %cst_171 = arith.constant 0.000000e+00 : f32
    %350 = vector.broadcast %cst_171 : f32 to vector<2x256xf32>
    %351 = arith.select %317, %349, %350 : vector<2x256xi1>, vector<2x256xf32>
    %352 = arith.addf %345, %351 : vector<2x256xf32>
    %c0_172 = arith.constant 0 : index
    %c85 = arith.constant 85 : index
    %353 = vector.load %arg6[%c0_172, %c85] : memref<2x384xf32, #tpu.memory_space<vmem>>, vector<2x256xf32>
    %c0_173 = arith.constant 0 : index
    %c40 = arith.constant 40 : index
    %354 = vector.load %arg1[%c0_173, %c40] : memref<2x49xf32, #tpu.memory_space<vmem>>, vector<2x1xf32>
    %355 = vector.broadcast %354 : vector<2x1xf32> to vector<2x256xf32>
    %356 = arith.mulf %355, %353 : vector<2x256xf32>
    %cst_174 = arith.constant 0.000000e+00 : f32
    %357 = vector.broadcast %cst_174 : f32 to vector<2x256xf32>
    %358 = arith.select %317, %356, %357 : vector<2x256xi1>, vector<2x256xf32>
    %359 = arith.addf %352, %358 : vector<2x256xf32>
    %c0_175 = arith.constant 0 : index
    %c101 = arith.constant 101 : index
    %360 = vector.load %arg6[%c0_175, %c101] : memref<2x384xf32, #tpu.memory_space<vmem>>, vector<2x256xf32>
    %c0_176 = arith.constant 0 : index
    %c47 = arith.constant 47 : index
    %361 = vector.load %arg1[%c0_176, %c47] : memref<2x49xf32, #tpu.memory_space<vmem>>, vector<2x1xf32>
    %362 = vector.broadcast %361 : vector<2x1xf32> to vector<2x256xf32>
    %363 = arith.mulf %362, %360 : vector<2x256xf32>
    %cst_177 = arith.constant 0.000000e+00 : f32
    %364 = vector.broadcast %cst_177 : f32 to vector<2x256xf32>
    %365 = arith.select %317, %363, %364 : vector<2x256xi1>, vector<2x256xf32>
    %366 = arith.addf %359, %365 : vector<2x256xf32>
    %c3_i32 = arith.constant 3 : i32
    %367 = vector.broadcast %c3_i32 : i32 to vector<2x256xi32>
    %368 = arith.addi %17, %367 : vector<2x256xi32>
    %c0_i32_178 = arith.constant 0 : i32
    %369 = vector.broadcast %c0_i32_178 : i32 to vector<2x256xi32>
    %370 = arith.cmpi sge, %368, %369 : vector<2x256xi32>
    %c3_i32_179 = arith.constant 3 : i32
    %371 = vector.broadcast %c3_i32_179 : i32 to vector<2x256xi32>
    %372 = arith.addi %17, %371 : vector<2x256xi32>
    %c16_i32_180 = arith.constant 16 : i32
    %373 = vector.broadcast %c16_i32_180 : i32 to vector<2x256xi32>
    %374 = arith.cmpi slt, %372, %373 : vector<2x256xi32>
    %375 = arith.andi %370, %374 : vector<2x256xi1>
    %c0_181 = arith.constant 0 : index
    %c6 = arith.constant 6 : index
    %376 = vector.load %arg6[%c0_181, %c6] : memref<2x384xf32, #tpu.memory_space<vmem>>, vector<2x256xf32>
    %c0_182 = arith.constant 0 : index
    %c6_183 = arith.constant 6 : index
    %377 = vector.load %arg1[%c0_182, %c6_183] : memref<2x49xf32, #tpu.memory_space<vmem>>, vector<2x1xf32>
    %378 = vector.broadcast %377 : vector<2x1xf32> to vector<2x256xf32>
    %379 = arith.mulf %378, %376 : vector<2x256xf32>
    %cst_184 = arith.constant 0.000000e+00 : f32
    %380 = vector.broadcast %cst_184 : f32 to vector<2x256xf32>
    %381 = arith.select %375, %379, %380 : vector<2x256xi1>, vector<2x256xf32>
    %382 = arith.addf %366, %381 : vector<2x256xf32>
    %c0_185 = arith.constant 0 : index
    %c22_186 = arith.constant 22 : index
    %383 = vector.load %arg6[%c0_185, %c22_186] : memref<2x384xf32, #tpu.memory_space<vmem>>, vector<2x256xf32>
    %c0_187 = arith.constant 0 : index
    %c13 = arith.constant 13 : index
    %384 = vector.load %arg1[%c0_187, %c13] : memref<2x49xf32, #tpu.memory_space<vmem>>, vector<2x1xf32>
    %385 = vector.broadcast %384 : vector<2x1xf32> to vector<2x256xf32>
    %386 = arith.mulf %385, %383 : vector<2x256xf32>
    %cst_188 = arith.constant 0.000000e+00 : f32
    %387 = vector.broadcast %cst_188 : f32 to vector<2x256xf32>
    %388 = arith.select %375, %386, %387 : vector<2x256xi1>, vector<2x256xf32>
    %389 = arith.addf %382, %388 : vector<2x256xf32>
    %c0_189 = arith.constant 0 : index
    %c38_190 = arith.constant 38 : index
    %390 = vector.load %arg6[%c0_189, %c38_190] : memref<2x384xf32, #tpu.memory_space<vmem>>, vector<2x256xf32>
    %c0_191 = arith.constant 0 : index
    %c20_192 = arith.constant 20 : index
    %391 = vector.load %arg1[%c0_191, %c20_192] : memref<2x49xf32, #tpu.memory_space<vmem>>, vector<2x1xf32>
    %392 = vector.broadcast %391 : vector<2x1xf32> to vector<2x256xf32>
    %393 = arith.mulf %392, %390 : vector<2x256xf32>
    %cst_193 = arith.constant 0.000000e+00 : f32
    %394 = vector.broadcast %cst_193 : f32 to vector<2x256xf32>
    %395 = arith.select %375, %393, %394 : vector<2x256xi1>, vector<2x256xf32>
    %396 = arith.addf %389, %395 : vector<2x256xf32>
    %c0_194 = arith.constant 0 : index
    %c54 = arith.constant 54 : index
    %397 = vector.load %arg6[%c0_194, %c54] : memref<2x384xf32, #tpu.memory_space<vmem>>, vector<2x256xf32>
    %c0_195 = arith.constant 0 : index
    %c27 = arith.constant 27 : index
    %398 = vector.load %arg1[%c0_195, %c27] : memref<2x49xf32, #tpu.memory_space<vmem>>, vector<2x1xf32>
    %399 = vector.broadcast %398 : vector<2x1xf32> to vector<2x256xf32>
    %400 = arith.mulf %399, %397 : vector<2x256xf32>
    %cst_196 = arith.constant 0.000000e+00 : f32
    %401 = vector.broadcast %cst_196 : f32 to vector<2x256xf32>
    %402 = arith.select %375, %400, %401 : vector<2x256xi1>, vector<2x256xf32>
    %403 = arith.addf %396, %402 : vector<2x256xf32>
    %c0_197 = arith.constant 0 : index
    %c70 = arith.constant 70 : index
    %404 = vector.load %arg6[%c0_197, %c70] : memref<2x384xf32, #tpu.memory_space<vmem>>, vector<2x256xf32>
    %c0_198 = arith.constant 0 : index
    %c34_199 = arith.constant 34 : index
    %405 = vector.load %arg1[%c0_198, %c34_199] : memref<2x49xf32, #tpu.memory_space<vmem>>, vector<2x1xf32>
    %406 = vector.broadcast %405 : vector<2x1xf32> to vector<2x256xf32>
    %407 = arith.mulf %406, %404 : vector<2x256xf32>
    %cst_200 = arith.constant 0.000000e+00 : f32
    %408 = vector.broadcast %cst_200 : f32 to vector<2x256xf32>
    %409 = arith.select %375, %407, %408 : vector<2x256xi1>, vector<2x256xf32>
    %410 = arith.addf %403, %409 : vector<2x256xf32>
    %c0_201 = arith.constant 0 : index
    %c86 = arith.constant 86 : index
    %411 = vector.load %arg6[%c0_201, %c86] : memref<2x384xf32, #tpu.memory_space<vmem>>, vector<2x256xf32>
    %c0_202 = arith.constant 0 : index
    %c41 = arith.constant 41 : index
    %412 = vector.load %arg1[%c0_202, %c41] : memref<2x49xf32, #tpu.memory_space<vmem>>, vector<2x1xf32>
    %413 = vector.broadcast %412 : vector<2x1xf32> to vector<2x256xf32>
    %414 = arith.mulf %413, %411 : vector<2x256xf32>
    %cst_203 = arith.constant 0.000000e+00 : f32
    %415 = vector.broadcast %cst_203 : f32 to vector<2x256xf32>
    %416 = arith.select %375, %414, %415 : vector<2x256xi1>, vector<2x256xf32>
    %417 = arith.addf %410, %416 : vector<2x256xf32>
    %c0_204 = arith.constant 0 : index
    %c102 = arith.constant 102 : index
    %418 = vector.load %arg6[%c0_204, %c102] : memref<2x384xf32, #tpu.memory_space<vmem>>, vector<2x256xf32>
    %c0_205 = arith.constant 0 : index
    %c48_206 = arith.constant 48 : index
    %419 = vector.load %arg1[%c0_205, %c48_206] : memref<2x49xf32, #tpu.memory_space<vmem>>, vector<2x1xf32>
    %420 = vector.broadcast %419 : vector<2x1xf32> to vector<2x256xf32>
    %421 = arith.mulf %420, %418 : vector<2x256xf32>
    %cst_207 = arith.constant 0.000000e+00 : f32
    %422 = vector.broadcast %cst_207 : f32 to vector<2x256xf32>
    %423 = arith.select %375, %421, %422 : vector<2x256xi1>, vector<2x256xf32>
    %424 = arith.addf %417, %423 : vector<2x256xf32>
    %cst_208 = arith.constant dense<0.000000e+00> : vector<256xf32>
    %425 = vector.multi_reduction <add>, %424, %cst_208 [0] : vector<2x256xf32> to vector<256xf32>
    %426 = vector.shape_cast %425 : vector<256xf32> to vector<1x256xf32>
    %c0_209 = arith.constant 0 : index
    %427 = memref.load %arg2[%c0_209] : memref<1xf32, #tpu.memory_space<smem>>
    %428 = vector.broadcast %427 : f32 to vector<1x256xf32>
    %429 = arith.addf %426, %428 : vector<1x256xf32>
    %430 = arith.negf %429 : vector<1x256xf32>
    %431 = math.exp %430 : vector<1x256xf32>
    %cst_210 = arith.constant 1.000000e+00 : f32
    %432 = vector.broadcast %cst_210 : f32 to vector<1x256xf32>
    %433 = arith.addf %432, %431 : vector<1x256xf32>
    %434 = arith.divf %432, %433 : vector<1x256xf32>
    %c0_211 = arith.constant 0 : index
    %c0_212 = arith.constant 0 : index
    %435 = vector.load %arg7[%c0_211, %c0_212] : memref<1x256xf32, #tpu.memory_space<vmem>>, vector<1x256xf32>
    tpu.vector_store %arg7[%c0_211, %c0_212], %434 {strides = array<i32>} : memref<1x256xf32, #tpu.memory_space<vmem>>, vector<1x256xf32>,
    %c0_i32_213 = arith.constant 0 : i32
    %c0_214 = arith.constant 0 : index
    %436 = arith.index_cast %c0_i32_213 : i32 to index
    %c0_215 = arith.constant 0 : index
    %c0_216 = arith.constant 0 : index
    %437 = vector.load %arg4[%c0_214, %436, %c0_215, %c0_216] : memref<1x1x4x256xf32, #tpu.memory_space<vmem>>, vector<1x1x4x256xf32>
    %438 = vector.shape_cast %437 : vector<1x1x4x256xf32> to vector<4x256xf32>
    %c0_217 = arith.constant 0 : index
    %c0_218 = arith.constant 0 : index
    %439 = vector.load %arg7[%c0_217, %c0_218] : memref<1x256xf32, #tpu.memory_space<vmem>>, vector<1x256xf32>
    %440 = vector.broadcast %439 : vector<1x256xf32> to vector<4x256xf32>
    %441 = arith.mulf %438, %440 : vector<4x256xf32>
    %c0_219 = arith.constant 0 : index
    %442 = arith.index_cast %c0_i32_213 : i32 to index
    %c0_220 = arith.constant 0 : index
    %c0_221 = arith.constant 0 : index
    %443 = vector.load %arg5[%c0_219, %442, %c0_220, %c0_221] : memref<1x1x4x256xf32, #tpu.memory_space<vmem>>, vector<1x1x4x256xf32>
    %444 = vector.shape_cast %443 : vector<1x1x4x256xf32> to vector<4x256xf32>
    %445 = vector.shape_cast %441 : vector<4x256xf32> to vector<1x1x4x256xf32>
    tpu.vector_store %arg5[%c0_219, %442, %c0_220, %c0_221], %445 {strides = array<i32>} : memref<1x1x4x256xf32, #tpu.memory_space<vmem>>, vector<1x1x4x256xf32>,
    %c1_i32_222 = arith.constant 1 : i32
    return
  }
  func.func @transform_0(%arg0: i32) -> (i32, i32) {
    %c0_i32 = arith.constant 0 : i32
    %c0_i32_0 = arith.constant 0 : i32
    %c0_i32_1 = arith.constant 0 : i32
    return %c0_i32, %c0_i32_0 : i32, i32
  }
  func.func @transform_1(%arg0: i32) -> i32 {
    %c0_i32 = arith.constant 0 : i32
    %c0_i32_0 = arith.constant 0 : i32
    return %c0_i32 : i32
  }
  func.func @transform_2(%arg0: i32) -> (i32, i32) {
    %c0_i32 = arith.constant 0 : i32
    %c0_i32_0 = arith.constant 0 : i32
    %c0_i32_1 = arith.constant 0 : i32
    return %c0_i32, %c0_i32_0 : i32, i32
  }
  func.func @transform_3(%arg0: i32) -> (i32, i32, i32, i32) {
    %c0_i32 = arith.constant 0 : i32
    %c0_i32_0 = arith.constant 0 : i32
    %c0_i32_1 = arith.constant 0 : i32
    %c0_i32_2 = arith.constant 0 : i32
    return %arg0, %c0_i32, %c0_i32_0, %c0_i32_1 : i32, i32, i32, i32
  }
  func.func @transform_4(%arg0: i32) -> (i32, i32, i32, i32) {
    %c0_i32 = arith.constant 0 : i32
    %c0_i32_0 = arith.constant 0 : i32
    %c0_i32_1 = arith.constant 0 : i32
    %c0_i32_2 = arith.constant 0 : i32
    return %arg0, %c0_i32, %c0_i32_0, %c0_i32_1 : i32, i32, i32, i32
  }
}

</mosaic_0001>

<bundles_post_ra>
// kernel: tpu_custom_call.1
= control target key start
LH: loop header
LB: loop body
LE: loop exit
PB: predicated region body
PF: predicated region fallthrough
CT: control target
= control target key end

     0   :  { %s5161_s0 = inlined_call_operand.vmem [shape: f32[2,49], index: 0, kind: input, shape index: {}]   ;;  %s5162_s1 = inlined_call_operand.<no memory space> [shape: f32[1], index: 1, kind: input, shape index: {}]   ;;  %s5163_s2 = inlined_call_operand.vmem [shape: s32[2,256], index: 2, kind: input, shape index: {}]   ;;  %s5164_s3 = inlined_call_operand.hbm [shape: f32[2,1,4,256], index: 3, kind: input, shape index: {}]   ;;  %s5165_s4 = inlined_call_operand.hbm [shape: f32[2,1,4,256], index: 4, kind: output, shape index: {}]  }
   0x1   :  { %9 = sst [smem:[#allocation4]] %s5162_s1 }
   0x2   :  { %10 = vsyncpa [#allocation6], 0 }
   0x3   :  { %12 = vsyncpa [#allocation6 + $0x1], 0 }
   0x4   :  { %13 = vsyncpa [#allocation7], 0 }
   0x5   :  { %15 = vsyncpa [#allocation7 + $0x1], 0  ;;  %s3433_s17 = smov 0   ;;  %s3435_s18 = smov 0  }
   0x6   :  { %s3437_s19 = smov 0   ;;  %s3439_s20 = smov 0  }
   0x7 LB: > { %s3454_s1 = sadd.s32 4294967295, %s3300_s20   ;;  %s2930_s21 = sadd.s32 4294967294, %s3300_s20   ;;  %s3300_s20 = sphi %s3439_s20, %s5409_s20   ;;  %s3296_s19 = sphi %s3437_s19, %s5408_s19   ;;  %s3292_s18 = sphi %s3435_s18, %s5407_s18   ;;  %s3288_s17 = sphi %s3433_s17, %s5406_s17  }
   0x8   : > { %s3458_s22 = sadd.s32 1, %s3300_s20   ;;  %s91_s23 = sadd.s32 1, %s3296_s19 }
   0x9   : > { %s88_s24 = ssub.s32 %s3300_s20, %s3458_s22  ;;  %p98_p0 = scmp.ne.s32.totalorder %s3296_s19, %s3292_s18 }
   0xa   : > { %p89_p1 = scmp.eq.s32.totalorder %s88_s24, 0  ;;  %p99_p2 = scmp.eq.s32.totalorder %s3300_s20, 0 }
   0xb   : > { %p104_p3 = scmp.ne.s32.totalorder %s3292_s18, %s3288_s17  ;;  %p105_p4 = scmp.eq.s32.totalorder %s3454_s1, 0 }
   0xc   : > { %s3470_s25 = scalar_select %p89_p1, %s3296_s19, %s91_s23  }
   0xd   : > { %p3472_p5 = por %p99_p2, %p98_p0  ;;  %p3476_p6 = por %p105_p4, %p104_p3 }
   0xe   : > { %p128_p7 = scmp.eq.s32.totalorder %s3454_s1, 1  ;;  %p134_p8 = scmp.eq.s32.totalorder %s2930_s21, 1 }
   0xf   : > { %p2961_p10 = scmp.lt.s32.totalorder %s3300_s20, 2  ;;  %s163_s30 = sand.u32 1, %s3296_s19  }
  0x10   : > { %p3483_p11 = por %p128_p7, %p98_p0  ;;  %p3487_p12 = por %p134_p8, %p104_p3 }
  0x11   : > { %s2947_s5 = sshll.u32 %s3300_s20, 7  ;;  %s2933_s6 = sshll.u32 %s163_s30, 3 }
  0x12   : > { %s5233_s28 = scalar_select %p3483_p11, 1, 0 }
  0x13   : > { %s5234_s29 = scalar_select %p3487_p12, 1, 0 }
  0x14   : > { %s3496_s9 = scalar_lea.hbm %s5164_s3, %s2947_s5  ;;  %s167_s10 = scalar_lea.vmem [#allocation5], %s2933_s6 }
  0x15   : > { %s175_s11 = sshll.u32 %s167_s10, 4  ;;  %p3500_p13 = pnand %p2961_p10, %p3472_p5  ;;  %s3504_s11 = int_to_ptr.vmem [resolvable:$true] %s175_s11 }
  0x16   : > { %s164_s13 = scalar_lea.sflag [#allocation6], %s163_s30  ;;  %s3204_s14 = scalar_lea.hbm %s3496_s9, 128 }
  0x17   : > { %p3205_p2 = scmp.ne.s32.totalorder %s3496_s9, %s3204_s14  ;;  %p3206_p3 = pneg %p3500_p13 }
  0x18   : > { %s3209_s21 = scalar_lea.hbm %s5164_s3, 256  ;;  %p3210_p5 = scmp.lt.u32.totalorder %s3496_s9, %s5164_s3 }
  0x19   : > { %p3207_p4 = pnand %p3206_p3, %p3205_p2  ;;  %p3211_p8 = scmp.lt.u32.totalorder %s3209_s21, %s3204_s14 }
  0x1a   : > { %p3213_p9 = scmp.lt.u32.totalorder %s3204_s14, %s3496_s9 }
  0x1b   : > { %p3208_p7 = pneg %p3207_p4  ;;  %p3212_p10 = por %p3211_p8, %p3210_p5 }
  0x1d   : > { %p3214_p0 = por %p3213_p9, %p3212_p10 }
  0x1f   : > { %p3215_p1 = pnand %p3214_p0, %p3208_p7 }
  0x21   : > { %3218 = shalt.err (!%p3215_p1)
}
  0x22   : > { %s3219_s26 = scalar_lea.vmem %s3504_s11, 128  ;;  %s3302_s30 = smov [#allocation5]  }
  0x23   : > { %p3220_p2 = scmp.ne.s32.totalorder %s3504_s11, %s3219_s26  ;;  %s3224_s5 = sshll.u32 %s3302_s30, 4  ;;  %s3225_s5 = int_to_ptr.vmem [resolvable:$false] %s3224_s5 }
  0x24   : > { %s3226_s6 = scalar_lea.vmem %s3225_s5, 256  ;;  %p3227_p11 = scmp.lt.s32.totalorder %s3504_s11, %s3225_s5 }
  0x25   : > { %p3222_p4 = pnand %p3220_p2, %p3206_p3  ;;  %p3228_p5 = scmp.lt.s32.totalorder %s3226_s6, %s3219_s26 }
  0x27   : > { %p3223_p12 = pneg %p3222_p4  ;;  %p3229_p8 = por %p3228_p5, %p3227_p11 }
  0x29   : > { %p3230_p9 = pnand %p3229_p8, %p3223_p12 }
  0x2b   : > { %3233 = shalt.err (!%p3230_p9)
}
  0x2c   : > { %2956 = dma.hbm_to_vmem [thread:$0]  (!%p3500_p13), %s3496_s9, 128, %s3504_s11, %s164_s13  }
  0x2d   : > { %p5236_p0 = scmp.lt.s32.totalorder %s3300_s20, 3  ;;  %p5237_p1 = scmp.ge.s32.totalorder %s3300_s20, 1 }
  0x2f   : > { %p181_p3 = pnand %p5237_p1, %p5236_p0 }
  0x31   : > { %184 = sbr.rel (%p181_p3) target bundleno = 808 (0x328), region = 36 }
  0x38   : > { %s3538_s7 = sand.u32 1, %s3292_s18  }
  0x39   : > { %s5167_s8 = sshll.u32 %s3538_s7, 3  ;;  %s187_s10 = scalar_lea.sflag [#allocation6], %s3538_s7 }
  0x3a   : > { %s3544_s12 = scalar_lea.vmem [#allocation5], %s5167_s8 }
  0x3b   : > { %3279 = dma.done.wait (%p3476_p6), %s187_s10, 128  }
  0x3c   : > { %3281 = vsyncadd (%p3476_p6), %s187_s10, 4294967168  ;;  %v3303_v0 = vmov 0   ;;  %vm219_vm0 = vcmask 1043456   ;;  %v215_v1 = vld [vmem:[%s3544_s12] sm:$0xff]  ;;  %v311_v2 = vld [vmem:[%s5161_s0] sm:$0x3]  ;;  %v5174_v17 = vlaneseq }
  0x3d   : > { %3096 = vset.pattern.permute.xlu1 %v3303_v0  ;;  %v217_v3 = vcombine.high %v215_v1, %v215_v1  ;;  %v236_v4 = vsel %vm219_vm0, %v215_v1, -inf  ;;  %v220_v5 = vsel %vm219_vm0, %v215_v1, 0.0  ;;  %v344_v10 = vld [vmem:[%s5161_s0] sm:$0x3]  ;;  %v3304_v15 = vmov 1966171168  }
  0x3e   : > { %314 = vperm.xlu1 %3096, %v311_v2   ;;  %v237_v6 = vrot.slane %v236_v4, 4  ;;  %v221_v7 = vrot.slane %v220_v5, 4  ;;  %v257_v16 = vunpack.c.l.s4 %v3304_v15  ;;  %v3305_v18 = vmov 7   ;;  %v394_v27 = vld [vmem:[%s5161_s0] sm:$0x3]  ;;  %s3310_s26 = smov 51  }
  0x3f   : > { %v243_v8 = vsel %vm219_vm0, %v217_v3, -inf  ;;  %v227_v9 = vsel %vm219_vm0, %v217_v3, 0.0  ;;  %v3561_v29 = vshrl.u32 %v5174_v17, 7  ;;  %v3306_v34 = vmov 14   ;;  %v444_v40 = vld [vmem:[%s5161_s0] sm:$0x3] }
  0x40   : > { %v238_v11 = vmax.f32 %v236_v4, %v237_v6  ;;  %v244_v12 = vrot.slane %v243_v8, 4  ;;  %v222_v13 = vadd.f32 %v221_v7, %v220_v5  ;;  %v228_v14 = vrot.slane %v227_v9, 4  ;;  %v494_v50 = vld [vmem:[%s5161_s0] sm:$0x3]  ;;  %s3329_s6 = smov 112   ;;  %s3330_s10 = smov 96  }
  0x41   : > { %v258_v28 = vunpack.c.0.s8 %v257_v16  ;;  %5238 = vst [vmem:[#allocation11_spill] sm:$0xff] %v3561_v29  ;;  %v3307_v35 = vmov 0.0   ;;  %v3308_v45 = vmov 21   ;;  %v3309_v53 = vmov 28   ;;  %v544_v55 = vld [vmem:[%s5161_s0] sm:$0x3] }
  0x42   : > { %3097 = vset.pattern.permute.xlu1 %v3305_v18  ;;  %v239_v19 = vrot.slane %v238_v11, 2  ;;  %v245_v20 = vmax.f32 %v243_v8, %v244_v12  ;;  %v223_v21 = vrot.slane %v222_v13, 2  ;;  %v229_v22 = vadd.f32 %v228_v14, %v227_v9  ;;  %252 = vst [vmem:[#allocation2] sm:$0x3f] %v3307_v35  ;;  %v594_v57 = vld [vmem:[%s5161_s0] sm:$0x3] }
  0x43   : > { %347 = vperm.xlu1 %3097, %v344_v10   ;;  %v3567_v42 = vsub.s32 %v258_v28, %v3561_v29  ;;  %v3311_v56 = vmov 35   ;;  %v3312_v58 = vmov 42   ;;  %v648_v59 = vld [vmem:[%s5161_s0] sm:$0x3]  ;;  %v3313_v60 = vmov 1   ;;  %s3331_s9 = smov 80  }
  0x44   : > { %v240_v23 = vmax.f32 %v238_v11, %v239_v19  ;;  %v246_v24 = vrot.slane %v245_v20, 2  ;;  %v224_v25 = vadd.f32 %v223_v21, %v222_v13  ;;  %v230_v26 = vrot.slane %v229_v22, 2  ;;  %v698_v61 = vld [vmem:[%s5161_s0] sm:$0x3]  ;;  %s3332_s11 = smov 64   ;;  %s3333_s13 = smov 48  }
  0x45   : > { %5239 = vst [vmem:[#allocation12_spill] sm:$0xff] %v3567_v42  ;;  %v3314_v62 = vmov 8   ;;  %v748_v63 = vld [vmem:[%s5161_s0] sm:$0x3]  ;;  %v3315_v0 = vmov 15   ;;  %v3316_v2 = vmov 22  }
  0x46   : > { %v241_v30 = vrot.slane %v240_v23, 1  ;;  %v247_v31 = vmax.f32 %v245_v20, %v246_v24  ;;  %v225_v32 = vrot.slane %v224_v25, 1  ;;  %v231_v33 = vadd.f32 %v230_v26, %v229_v22  ;;  %v798_v1 = vld [vmem:[%s5161_s0] sm:$0x3]  ;;  %s3334_s27 = smov 32   ;;  %s3335_s14 = smov 127  }
  0x47   : > { %3098 = vset.pattern.permute.xlu1 %v3306_v34  ;;  %v848_v3 = vld [vmem:[%s5161_s0] sm:$0x3]  ;;  %v3317_v4 = vmov 29   ;;  %v3318_v6 = vmov 36   ;;  %v3319_v8 = vmov 43   ;;  %v3320_v10 = vmov 2  }
  0x48   : > { %397 = vperm.xlu1 %3098, %v394_v27   ;;  %v242_v36 = vmax.f32 %v240_v23, %v241_v30  ;;  %v248_v37 = vrot.slane %v247_v31, 1  ;;  %v226_v38 = vadd.f32 %v225_v32, %v224_v25  ;;  %v232_v39 = vrot.slane %v231_v33, 1  ;;  %v898_v5 = vld [vmem:[%s5161_s0] sm:$0x3]  ;;  %s3336_s15 = smov 111   ;;  %s3337_s16 = smov 95  }
  0x49   : > { %v948_v7 = vld [vmem:[%s5161_s0] sm:$0x3]  ;;  %v3321_v12 = vmov 9   ;;  %v3322_v14 = vmov 16   ;;  %v3323_v16 = vmov 23   ;;  %v3324_v19 = vmov 30  }
  0x4a   : > { %v249_v41 = vmax.f32 %v247_v31, %v248_v37  ;;  %v233_v43 = vadd.f32 %v232_v39, %v231_v33  ;;  %v250_v44 = vmul.f32 0.25, %v226_v38  ;;  %v1002_v9 = vld [vmem:[%s5161_s0] sm:$0x3]  ;;  %v3325_v21 = vmov 37   ;;  %s3338_s21 = smov 79   ;;  %s3339_s23 = smov 63  }
  0x4b   : > { %v1052_v11 = vld [vmem:[%s5161_s0] sm:$0x3]  ;;  %v3326_v23 = vmov 44   ;;  %v3327_v24 = vmov 3   ;;  %vm277_vm1 = vcmp.ge.s32.totalorder %v5174_v17, 51  ;;  %vm278_vm2 = vcmp.lt.s32.totalorder %v5174_v17, 307 }
  0x4c   : > { %3099 = vset.pattern.permute.xlu1 %v3308_v45  ;;  %v283_v46 = vcombine.low %v242_v36, %v249_v41  ;;  %v251_v47 = vmul.f32 0.25, %v233_v43  ;;  %v1102_v13 = vld [vmem:[%s5161_s0] sm:$0x3]  ;;  %vm273_vm3 = vcmask 416768   ;;  %vm279_vm4 = vmand %vm277_vm1, %vm278_vm2  ;;  %v3328_v28 = vmov 1983009808  }
  0x4d   : > { %447 = vperm.xlu1 %3099, %v444_v40   ;;  %v1152_v15 = vld [vmem:[%s5161_s0] sm:$0x3]  ;;  %v334_v30 = vunpack.c.l.s4 %v3328_v28  ;;  %s3340_s24 = smov 47   ;;  %s5168_s30 = smov 126   ;;  %vm373_vm8 = vcmask 916480   ;;  %vm423_vm9 = vcmask 785408  }
  0x4e   : > { %v290_v48 = vrot.slane %v283_v46, %v3567_v42  ;;  %v255_v49 = vcombine.low %v250_v44, %v251_v47  ;;  %v1202_v18 = vld [vmem:[%s5161_s0] sm:$0x3]  ;;  %s5169_s5 = smov 110   ;;  %s5170_s8 = smov 94   ;;  %vm473_vm10 = vcmask 654336   ;;  %vm523_vm11 = vcmask 523264  }
  0x4f   : > { %v1252_v20 = vld [vmem:[%s5161_s0] sm:$0x3]  ;;  %v335_v34 = vunpack.c.0.s8 %v334_v30  ;;  %vm573_vm12 = vcmask 392192   ;;  %vm623_vm13 = vcmask 261120   ;;  %vm677_vm14 = vcmask 1039360   ;;  %p5403_p11 = scmp.ne.s32.totalorder %s5233_s28, 0 }
  0x50   : > { %v297_v51 = vrot.slane %v290_v48, %v3567_v42  ;;  %v262_v52 = vrot.slane %v255_v49, %v3567_v42  ;;  %v1302_v22 = vld [vmem:[%s5161_s0] sm:$0x3]  ;;  %vm727_vm15 = vcmask 908288   ;;  %vm777_vm0 = vcmask 777216  }
  0x51   : > { %3100 = vset.pattern.permute.xlu1 %v3309_v53  ;;  %v3629_v36 = vsub.s32 %v335_v34, %v3561_v29  ;;  %vm827_vm1 = vcmask 646144   ;;  %vm877_vm2 = vcmask 515072  }
  0x52   : > { %497 = vperm.xlu1 %3100, %v494_v50   ;;  %298 = vrot.lane.b32.xlu0 %v297_v51, %s3310_s26  ;;  %v269_v54 = vrot.slane %v262_v52, %v3567_v42 }
  0x56   : > { %3101 = vset.pattern.permute.xlu1 %v3311_v56  ;;  %270 = vrot.lane.b32.xlu0 %v269_v54, %s3310_s26  ;;  %s3341_s26 = smov 31  }
  0x57   : > { %547 = vperm.xlu1 %3101, %v544_v55  }
  0x5b   : > { %3102 = vset.pattern.permute.xlu1 %v3312_v58 }
  0x5c   : > { %597 = vperm.xlu1 %3102, %v594_v57  }
  0x60   : > { %3103 = vset.pattern.permute.xlu1 %v3313_v60 }
  0x61   : > { %651 = vperm.xlu1 %3103, %v648_v59  }
  0x65   : > { %3104 = vset.pattern.permute.xlu1 %v3314_v62 }
  0x66   : > { %701 = vperm.xlu1 %3104, %v698_v61  }
  0x6a   : > { %3105 = vset.pattern.permute.xlu1 %v3315_v0 }
  0x6b   : > { %751 = vperm.xlu1 %3105, %v748_v63  }
  0x6f   : > { %3106 = vset.pattern.permute.xlu1 %v3316_v2 }
  0x70   : > { %801 = vperm.xlu1 %3106, %v798_v1  }
  0x74   : > { %3107 = vset.pattern.permute.xlu1 %v3317_v4 }
  0x75   : > { %851 = vperm.xlu1 %3107, %v848_v3  }
  0x79   : > { %3108 = vset.pattern.permute.xlu1 %v3318_v6 }
  0x7a   : > { %901 = vperm.xlu1 %3108, %v898_v5  }
  0x7e   : > { %3109 = vset.pattern.permute.xlu1 %v3319_v8 }
  0x7f   : > { %951 = vperm.xlu1 %3109, %v948_v7  }
  0x83   : > { %3110 = vset.pattern.permute.xlu1 %v3320_v10 }
  0x84   : > { %1005 = vperm.xlu1 %3110, %v1002_v9  }
  0x88   : > { %3111 = vset.pattern.permute.xlu1 %v3321_v12 }
  0x89   : > { %1055 = vperm.xlu1 %3111, %v1052_v11  }
  0x8d   : > { %3112 = vset.pattern.permute.xlu1 %v3322_v14 }
  0x8e   : > { %1105 = vperm.xlu1 %3112, %v1102_v13  }
  0x92   : > { %3113 = vset.pattern.permute.xlu1 %v3323_v16 }
  0x93   : > { %1155 = vperm.xlu1 %3113, %v1152_v15  }
  0x97   : > { %3114 = vset.pattern.permute.xlu1 %v3324_v19 }
  0x98   : > { %1205 = vperm.xlu1 %3114, %v1202_v18  }
  0x9c   : > { %3115 = vset.pattern.permute.xlu1 %v3325_v21 }
  0x9d   : > { %1255 = vperm.xlu1 %3115, %v1252_v20  }
  0xa1   : > { %3116 = vset.pattern.permute.xlu1 %v3326_v23 }
  0xa2   : > { %1305 = vperm.xlu1 %3116, %v1302_v22  }
  0xa6   : > { %3117 = vset.pattern.permute.xlu1 %v3327_v24 }
  0xbd   : > { %v3626_v35 = vpop.permute.xlu1 %314 }
  0xc2   : > { %v3631_v37 = vpop.permute.xlu1 %347 }
  0xc4   : > { %v299_v25 = vpop.permute.xlu0 %298 }
  0xc5   : > { %v300_v26 = vrot.slane %v299_v25, 7 }
  0xc7   : > { %v301_v27 = vsel %vm273_vm3, %v300_v26, %v299_v25  ;;  %v3645_v45 = vpop.permute.xlu1 %397 }
  0xc8   : > { %304 = vst.msk [vmem:[#allocation2 + $0x1] ss:$2 sm:$0x7] %vm279_vm4, %v301_v27  ;;  %v271_v31 = vpop.permute.xlu0 %270 }
  0xc9   : > { %v272_v32 = vrot.slane %v271_v31, 7 }
  0xcb   : > { %v274_v33 = vsel %vm273_vm3, %v272_v32, %v271_v31  ;;  %vm927_vm3 = vcmask 384000  }
  0xcc   : > { %280 = vst.msk [vmem:[#allocation2] ss:$2 sm:$0x7] %vm279_vm4, %v274_v33  ;;  %v3656_v51 = vpop.permute.xlu1 %447  ;;  %vm977_vm4 = vcmask 252928  }
  0xd1   : > { %v3667_v56 = vpop.permute.xlu1 %497 }
  0xd3   : > { %v3633_v38 = vld [vmem:[#allocation2] sm:$0x3f] }
  0xd4   : > { %v358_v39 = vrot.slane %v3633_v38, %v3629_v36  ;;  %v3637_v40 = vld [vmem:[#allocation2] sm:$0x3f] }
  0xd5   : > { %v408_v43 = vrot.slane %v3637_v40, %v3629_v36  ;;  %v3642_v44 = vld [vmem:[#allocation2] sm:$0x3f] }
  0xd6   : > { %367 = vrot.lane.b32.xlu0 %v358_v39, %s3329_s6  ;;  %v366_v41 = vcombine.high %v358_v39, %v358_v39  ;;  %v458_v47 = vrot.slane %v3642_v44, %v3629_v36  ;;  %v3650_v48 = vld [vmem:[#allocation2] sm:$0x3f]  ;;  %v3678_v62 = vpop.permute.xlu1 %547 }
  0xd7   : > { %v416_v46 = vcombine.high %v408_v43, %v408_v43  ;;  %v508_v50 = vrot.slane %v3650_v48, %v3629_v36  ;;  %v3658_v52 = vld [vmem:[#allocation2] sm:$0x3f] }
  0xd8   : > { %369 = vrot.lane.b32.xlu1 %v366_v41, %s3329_s6  ;;  %v466_v49 = vcombine.high %v458_v47, %v458_v47  ;;  %v558_v54 = vrot.slane %v3658_v52, %v3629_v36  ;;  %v3664_v55 = vld [vmem:[#allocation2] sm:$0x3f] }
  0xd9   : > { %v516_v53 = vcombine.high %v508_v50, %v508_v50  ;;  %v608_v58 = vrot.slane %v3664_v55, %v3629_v36  ;;  %v3672_v59 = vld [vmem:[#allocation2] sm:$0x3f] }
  0xda   : > { %417 = vrot.lane.b32.xlu0 %v408_v43, %s3330_s10  ;;  %v566_v57 = vcombine.high %v558_v54, %v558_v54  ;;  %v662_v61 = vrot.slane %v3672_v59, %v3629_v36  ;;  %v3680_v63 = vld [vmem:[#allocation2] sm:$0x3f] }
  0xdb   : > { %v616_v60 = vcombine.high %v608_v58, %v608_v58  ;;  %v712_v1 = vrot.slane %v3680_v63, %v3629_v36  ;;  %v3686_v2 = vld [vmem:[#allocation2] sm:$0x3f]  ;;  %v3689_v3 = vpop.permute.xlu1 %597 }
  0xdc   : > { %419 = vrot.lane.b32.xlu1 %v416_v46, %s3330_s10  ;;  %v670_v0 = vcombine.high %v662_v61, %v662_v61  ;;  %v762_v5 = vrot.slane %v3686_v2, %v3629_v36  ;;  %v3694_v6 = vld [vmem:[#allocation2] sm:$0x3f] }
  0xdd   : > { %v720_v4 = vcombine.high %v712_v1, %v712_v1  ;;  %v812_v8 = vrot.slane %v3694_v6, %v3629_v36  ;;  %v3702_v10 = vld [vmem:[#allocation2] sm:$0x3f] }
  0xde   : > { %467 = vrot.lane.b32.xlu0 %v458_v47, %s3331_s9  ;;  %v770_v7 = vcombine.high %v762_v5, %v762_v5  ;;  %v862_v12 = vrot.slane %v3702_v10, %v3629_v36  ;;  %v3708_v13 = vld [vmem:[#allocation2] sm:$0x3f] }
  0xdf   : > { %v820_v11 = vcombine.high %v812_v8, %v812_v8  ;;  %v912_v16 = vrot.slane %v3708_v13, %v3629_v36  ;;  %v3716_v18 = vld [vmem:[#allocation2] sm:$0x3f] }
  0xe0   : > { %469 = vrot.lane.b32.xlu1 %v466_v49, %s3331_s9  ;;  %v3700_v9 = vpop.permute.xlu1 %651  ;;  %v870_v15 = vcombine.high %v862_v12, %v862_v12  ;;  %v962_v20 = vrot.slane %v3716_v18, %v3629_v36  ;;  %v3724_v22 = vld [vmem:[#allocation2] sm:$0x3f] }
  0xe1   : > { %v920_v19 = vcombine.high %v912_v16, %v912_v16  ;;  %v1016_v24 = vrot.slane %v3724_v22, %v3629_v36  ;;  %v3730_v25 = vld [vmem:[#allocation2] sm:$0x3f] }
  0xe2   : > { %517 = vrot.lane.b32.xlu0 %v508_v50, %s3332_s11  ;;  %v970_v23 = vcombine.high %v962_v20, %v962_v20  ;;  %v1066_v28 = vrot.slane %v3730_v25, %v3629_v36  ;;  %v3738_v30 = vld [vmem:[#allocation2] sm:$0x3f] }
  0xe3   : > { %v1024_v27 = vcombine.high %v1016_v24, %v1016_v24  ;;  %v1116_v32 = vrot.slane %v3738_v30, %v3629_v36  ;;  %v3746_v34 = vld [vmem:[#allocation2] sm:$0x3f] }
  0xe4   : > { %519 = vrot.lane.b32.xlu1 %v516_v53, %s3332_s11  ;;  %v1074_v31 = vcombine.high %v1066_v28, %v1066_v28  ;;  %v1166_v41 = vrot.slane %v3746_v34, %v3629_v36  ;;  %v3752_v43 = vld [vmem:[#allocation2] sm:$0x3f] }
  0xe5   : > { %v3711_v14 = vpop.permute.xlu1 %701  ;;  %v1124_v39 = vcombine.high %v1116_v32, %v1116_v32  ;;  %v1216_v49 = vrot.slane %v3752_v43, %v3629_v36  ;;  %v3760_v50 = vld [vmem:[#allocation2] sm:$0x3f] }
  0xe6   : > { %567 = vrot.lane.b32.xlu0 %v558_v54, %s3333_s13  ;;  %v1174_v47 = vcombine.high %v1166_v41, %v1166_v41  ;;  %v1266_v54 = vrot.slane %v3760_v50, %v3629_v36 }
  0xe7   : > { %v1224_v53 = vcombine.high %v1216_v49, %v1216_v49 }
  0xe8   : > { %569 = vrot.lane.b32.xlu1 %v566_v57, %s3333_s13 }
  0xea   : > { %617 = vrot.lane.b32.xlu0 %v608_v58, %s3334_s27  ;;  %v3722_v21 = vpop.permute.xlu1 %751  ;;  %v3768_v58 = vld [vmem:[#allocation2] sm:$0x3f] }
  0xeb   : > { %5240 = vst [vmem:[#allocation13_spill] sm:$0xff] %v3722_v21  ;;  %v4345_v21 = vld [vmem:[#allocation2] sm:$0x3f] }
  0xec   : > { %619 = vrot.lane.b32.xlu1 %v616_v60, %s3334_s27  ;;  %v1274_v60 = vcombine.high %v1266_v54, %v1266_v54  ;;  %5308 = vst [vmem:[#allocation73_spill] sm:$0xff] %v4345_v21 }
  0xee   : > { %671 = vrot.lane.b32.xlu0 %v662_v61, %s3335_s14  ;;  %v1316_v61 = vrot.slane %v3768_v58, %v3629_v36 }
  0xef   : > { %v3733_v26 = vpop.permute.xlu1 %801 }
  0xf0   : > { %673 = vrot.lane.b32.xlu1 %v670_v0, %s3335_s14  ;;  %5241 = vst [vmem:[#allocation14_spill] sm:$0xff] %v3733_v26  ;;  %v351_v0 = vcombine.high %v3633_v38, %v3633_v38 }
  0xf2   : > { %721 = vrot.lane.b32.xlu0 %v712_v1, %s3336_s15 }
  0xf4   : > { %723 = vrot.lane.b32.xlu1 %v720_v4, %s3336_s15  ;;  %v3744_v33 = vpop.permute.xlu1 %851  ;;  %v1324_v4 = vcombine.high %v1316_v61, %v1316_v61 }
  0xf5   : > { %5242 = vst [vmem:[#allocation15_spill] sm:$0xff] %v3744_v33 }
  0xf6   : > { %771 = vrot.lane.b32.xlu0 %v762_v5, %s3337_s16  ;;  %v3780_v5 = vld [vmem:[#allocation2] sm:$0x3f] }
  0xf7   : > { %v3792_v38 = vrot.slane %v3780_v5, %v3629_v36 }
  0xf8   : > { %773 = vrot.lane.b32.xlu1 %v770_v7, %s3337_s16  ;;  %v365_v7 = vrot.slane %v351_v0, %v3629_v36 }
  0xf9   : > { %v3755_v46 = vpop.permute.xlu1 %901 }
  0xfa   : > { %821 = vrot.lane.b32.xlu0 %v812_v8, %s3338_s21  ;;  %5243 = vst [vmem:[#allocation16_spill] sm:$0xff] %v3755_v46  ;;  %v401_v8 = vcombine.high %v3637_v40, %v3637_v40  ;;  %v1377_v40 = vcombine.high %v3792_v38, %v3792_v38 }
  0xfc   : > { %823 = vrot.lane.b32.xlu1 %v820_v11, %s3338_s21  ;;  %v1355_v11 = vld [vmem:[%s5161_s0] sm:$0x3] }
  0xfe   : > { %871 = vrot.lane.b32.xlu0 %v862_v12, %s3339_s23  ;;  %v3766_v57 = vpop.permute.xlu1 %951 }
  0xff   : > { %5244 = vst [vmem:[#allocation17_spill] sm:$0xff] %v3766_v57  ;;  %v3369_v57 = vmov 25  }
 0x100   : > { %873 = vrot.lane.b32.xlu1 %v870_v15, %s3339_s23  ;;  %v415_v15 = vrot.slane %v401_v8, %v3629_v36  ;;  %v705_v8 = vcombine.high %v3680_v63, %v3680_v63  ;;  %v755_v63 = vcombine.high %v3686_v2, %v3686_v2  ;;  %v1555_v2 = vld [vmem:[%s5161_s0] sm:$0x3] }
 0x102   : > { %921 = vrot.lane.b32.xlu0 %v912_v16, %s3340_s24  ;;  %v451_v16 = vcombine.high %v3642_v44, %v3642_v44  ;;  %v1405_v44 = vld [vmem:[%s5161_s0] sm:$0x3] }
 0x103   : > { %v3777_v1 = vpop.permute.xlu1 %1005 }
 0x104   : > { %923 = vrot.lane.b32.xlu1 %v920_v19, %s3340_s24  ;;  %5245 = vst [vmem:[#allocation18_spill] sm:$0xff] %v3777_v1  ;;  %v3802_v19 = vld [vmem:[#allocation2] sm:$0x3f] }
 0x106   : > { %971 = vrot.lane.b32.xlu0 %v962_v20, %s3341_s26  ;;  %v465_v20 = vrot.slane %v451_v16, %v3629_v36 }
 0x108   : > { %973 = vrot.lane.b32.xlu1 %v970_v23, %s3341_s26  ;;  %v3794_v12 = vpop.permute.xlu1 %1055  ;;  %v501_v23 = vcombine.high %v3650_v48, %v3650_v48  ;;  %v551_v48 = vcombine.high %v3658_v52, %v3658_v52  ;;  %v1455_v52 = vld [vmem:[%s5161_s0] sm:$0x3] }
 0x109   : > { %5246 = vst [vmem:[#allocation19_spill] sm:$0xff] %v3794_v12  ;;  %v1858_v12 = vld [vmem:[#allocation2] sm:$0x3f] }
 0x10a   : > { %1025 = vrot.lane.b32.xlu0 %v1016_v24, %s5168_s30 }
 0x10c   : > { %1027 = vrot.lane.b32.xlu1 %v1024_v27, %s5168_s30  ;;  %s5171_s30 = smov 78   ;;  %v3350_v27 = vmov 10  }
 0x10d   : > { %v3808_v24 = vpop.permute.xlu1 %1105 }
 0x10e   : > { %1075 = vrot.lane.b32.xlu0 %v1066_v28, %s5169_s5  ;;  %5247 = vst [vmem:[#allocation20_spill] sm:$0xff] %v3808_v24  ;;  %v3816_v28 = vrot.slane %v3802_v19, %v3629_v36 }
 0x110   : > { %1077 = vrot.lane.b32.xlu1 %v1074_v31, %s5169_s5  ;;  %s5172_s5 = smov 62   ;;  %v515_v31 = vrot.slane %v501_v23, %v3629_v36  ;;  %v3870_v23 = vld [vmem:[#allocation2] sm:$0x3f] }
 0x112   : > { %1125 = vrot.lane.b32.xlu0 %v1116_v32, %s5170_s8  ;;  %v1427_v32 = vcombine.high %v3816_v28, %v3816_v28 }
 0x114   : > { %1127 = vrot.lane.b32.xlu1 %v1124_v39, %s5170_s8  ;;  %s5173_s8 = smov 46   ;;  %v3824_v39 = vpop.permute.xlu1 %1155 }
 0x115   : > { %5248 = vst [vmem:[#allocation21_spill] sm:$0xff] %v3824_v39 }
 0x116   : > { %1175 = vrot.lane.b32.xlu0 %v1166_v41, %s5171_s30  ;;  %v3826_v41 = vld [vmem:[#allocation2] sm:$0x3f] }
 0x118   : > { %1177 = vrot.lane.b32.xlu1 %v1174_v47, %s5171_s30  ;;  %s3348_s30 = smov 30   ;;  %v565_v47 = vrot.slane %v551_v48, %v3629_v36  ;;  %v3356_v48 = vmov 31  }
 0x11a   : > { %1225 = vrot.lane.b32.xlu0 %v1216_v49, %s5172_s5  ;;  %v601_v49 = vcombine.high %v3664_v55, %v3664_v55  ;;  %v655_v55 = vcombine.high %v3672_v59, %v3672_v59  ;;  %v1505_v59 = vld [vmem:[%s5161_s0] sm:$0x3] }
 0x11c   : > { %1227 = vrot.lane.b32.xlu1 %v1224_v53, %s5172_s5  ;;  %v3352_v53 = vmov 17   ;;  %s5256_s5 = smov 62  }
 0x11e   : > { %1275 = vrot.lane.b32.xlu0 %v1266_v54, %s5173_s8  ;;  %v3838_v54 = vrot.slane %v3826_v41, %v3629_v36 }
 0x120   : > { %1277 = vrot.lane.b32.xlu1 %v1274_v60, %s5173_s8  ;;  %s3349_s8 = smov 125   ;;  %v615_v60 = vrot.slane %v601_v49, %v3629_v36  ;;  %v1477_v0 = vcombine.high %v3838_v54, %v3838_v54 }
 0x122   : > { %1325 = vrot.lane.b32.xlu0 %v1316_v61, %s3348_s30  ;;  %v3841_v61 = vpop.permute.xlu1 %1205 }
 0x123   : > { %5249 = vst [vmem:[#allocation22_spill] sm:$0xff] %v3841_v61 }
 0x124   : > { %1327 = vrot.lane.b32.xlu1 %v1324_v4, %s3348_s30  ;;  %v3848_v4 = vld [vmem:[#allocation2] sm:$0x3f] }
 0x125   : > { %v3862_v16 = vrot.slane %v3848_v4, %v3629_v36 }
 0x126   : > { %371 = vrot.lane.b32.xlu0 %v365_v7, %s3329_s6  ;;  %v669_v7 = vrot.slane %v655_v55, %v3629_v36  ;;  %s3364_s6 = smov 124  }
 0x128   : > { %1358 = vperm.xlu1 %3117, %v1355_v11   ;;  %v3354_v11 = vmov 24  }
 0x12a   : > { %421 = vrot.lane.b32.xlu0 %v415_v15, %s3330_s10  ;;  %s3351_s10 = smov 109   ;;  %v3858_v15 = vpop.permute.xlu1 %1255 }
 0x12b   : > { %5250 = vst [vmem:[#allocation23_spill] sm:$0xff] %v3858_v15 }
 0x12c   : > { %1380 = vrot.lane.b32.xlu1 %v1377_v40, %s3349_s8  ;;  %v719_v40 = vrot.slane %v705_v8, %v3629_v36  ;;  %v1605_v8 = vld [vmem:[%s5161_s0] sm:$0x3] }
 0x12d   : > { %3118 = vset.pattern.permute.xlu1 %v3350_v27 }
 0x12e   : > { %471 = vrot.lane.b32.xlu0 %v465_v20, %s3331_s9  ;;  %v1527_v20 = vcombine.high %v3862_v16, %v3862_v16  ;;  %v3873_v27 = vpop.permute.xlu1 %1305  ;;  %s5253_s9 = smov 110  }
 0x12f   : > { %5251 = vst [vmem:[#allocation24_spill] sm:$0xff] %v3873_v27 }
 0x130   : > { %1408 = vperm.xlu1 %3118, %v1405_v44   ;;  %v769_v44 = vrot.slane %v755_v63, %v3629_v36 }
 0x132   : > { %521 = vrot.lane.b32.xlu0 %v515_v31, %s3332_s11  ;;  %s3353_s11 = smov 93   ;;  %v805_v31 = vcombine.high %v3694_v6, %v3694_v6  ;;  %v855_v6 = vcombine.high %v3702_v10, %v3702_v10  ;;  %v3358_v10 = vmov 38  }
 0x134   : > { %1430 = vrot.lane.b32.xlu1 %v1427_v32, %s3351_s10  ;;  %v3884_v32 = vrot.slane %v3870_v23, %v3629_v36  ;;  %v819_v49 = vrot.slane %v805_v31, %v3629_v36  ;;  %v3924_v31 = vld [vmem:[#allocation2] sm:$0x3f] }
 0x135   : > { %3119 = vset.pattern.permute.xlu1 %v3352_v53 }
 0x136   : > { %571 = vrot.lane.b32.xlu0 %v565_v47, %s3333_s13  ;;  %s5252_s13 = smov 126  }
 0x138   : > { %1458 = vperm.xlu1 %3119, %v1455_v52   ;;  %v1577_v52 = vcombine.high %v3884_v32, %v3884_v32 }
 0x13a   : > { %621 = vrot.lane.b32.xlu0 %v615_v60, %s3334_s27  ;;  %s3355_s27 = smov 77   ;;  %v3896_v60 = vld [vmem:[#allocation2] sm:$0x3f] }
 0x13c   : > { %1480 = vrot.lane.b32.xlu1 %v1477_v0, %s3353_s11  ;;  %v869_v0 = vrot.slane %v855_v6, %v3629_v36  ;;  %v3361_v6 = vmov 45  }
 0x13d   : > { %3120 = vset.pattern.permute.xlu1 %v3354_v11 }
 0x13e   : > { %675 = vrot.lane.b32.xlu0 %v669_v7, %s3335_s14  ;;  %v905_v7 = vcombine.high %v3708_v13, %v3708_v13  ;;  %v955_v13 = vcombine.high %v3716_v18, %v3716_v18  ;;  %v1009_v18 = vcombine.high %v3724_v22, %v3724_v22  ;;  %v1059_v22 = vcombine.high %v3730_v25, %v3730_v25  ;;  %s3366_s14 = smov 108  }
 0x13f   : > { %v3363_v25 = vmov 4  }
 0x140   : > { %1508 = vperm.xlu1 %3120, %v1505_v59   ;;  %v3912_v59 = vrot.slane %v3896_v60, %v3629_v36  ;;  %v919_v63 = vrot.slane %v905_v7, %v3629_v36  ;;  %v3940_v7 = vrot.slane %v3924_v31, %v3629_v36 }
 0x142   : > { %725 = vrot.lane.b32.xlu0 %v719_v40, %s3336_s15  ;;  %s3357_s15 = smov 61  }
 0x144   : > { %1530 = vrot.lane.b32.xlu1 %v1527_v20, %s3355_s27 }
 0x145   : > { %3121 = vset.pattern.permute.xlu1 %v3356_v48  ;;  %v3359_v48 = vmov 32  }
 0x146   : > { %775 = vrot.lane.b32.xlu0 %v769_v44, %s3337_s16  ;;  %v1627_v44 = vcombine.high %v3912_v59, %v3912_v59  ;;  %s5254_s16 = smov 94  }
 0x147   : > { %3128 = vset.pattern.permute.xlu0 %v3359_v48 }
 0x148   : > { %v3886_v47 = vpop.permute.xlu0 %367  ;;  %1558 = vperm.xlu1 %3121, %v1555_v2  }
 0x14a   : > { %v3891_v53 = vpop.permute.xlu1 %369  ;;  %825 = vrot.lane.b32.xlu0 %v819_v49, %s3338_s21  ;;  %s3360_s21 = smov 45   ;;  %v969_v49 = vrot.slane %v955_v13, %v3629_v36  ;;  %v1677_v13 = vcombine.high %v3940_v7, %v3940_v7 }
 0x14c   : > { %v3898_v55 = vpop.permute.xlu0 %417  ;;  %1580 = vrot.lane.b32.xlu1 %v1577_v52, %s3357_s15  ;;  %v1655_v52 = vld [vmem:[%s5161_s0] sm:$0x3] }
 0x14d   : > { %3122 = vset.pattern.permute.xlu1 %v3358_v10 }
 0x14e   : > { %v3907_v11 = vpop.permute.xlu1 %419  ;;  %875 = vrot.lane.b32.xlu0 %v869_v0, %s3339_s23  ;;  %s5257_s23 = smov 46  }
 0x150   : > { %v3914_v40 = vpop.permute.xlu0 %467  ;;  %1608 = vperm.xlu1 %3122, %v1605_v8   ;;  %v1023_v8 = vrot.slane %v1009_v18, %v3629_v36  ;;  %v1109_v18 = vcombine.high %v3738_v30, %v3738_v30  ;;  %v1159_v30 = vcombine.high %v3746_v34, %v3746_v34  ;;  %v3365_v34 = vmov 11  }
 0x152   : > { %v3919_v20 = vpop.permute.xlu1 %469  ;;  %925 = vrot.lane.b32.xlu0 %v919_v63, %s3340_s24  ;;  %s3368_s24 = smov 92  }
 0x154   : > { %v3926_v2 = vpop.permute.xlu0 %517  ;;  %1630 = vrot.lane.b32.xlu1 %v1627_v44, %s3360_s21  ;;  %v3952_v44 = vld [vmem:[#allocation2] sm:$0x3f] }
 0x155   : > { %3123 = vset.pattern.permute.xlu1 %v3361_v6  ;;  %v1709_v6 = vld [vmem:[%s5161_s0] sm:$0x3] }
 0x156   : > { %v3935_v0 = vpop.permute.xlu1 %519  ;;  %975 = vrot.lane.b32.xlu0 %v969_v49, %s3341_s26  ;;  %s3362_s26 = smov 29   ;;  %v1073_v49 = vrot.slane %v1059_v22, %v3629_v36  ;;  %v1123_v22 = vrot.slane %v1109_v18, %v3629_v36  ;;  %v1209_v18 = vcombine.high %v3752_v43, %v3752_v43  ;;  %v1259_v43 = vcombine.high %v3760_v50, %v3760_v50 }
 0x157   : > { %v3367_v50 = vmov 18  }
 0x158   : > { %v3942_v10 = vpop.permute.xlu0 %567  ;;  %1658 = vperm.xlu1 %3123, %v1655_v52  }
 0x15a   : > { %v3947_v63 = vpop.permute.xlu1 %569  ;;  %1029 = vrot.lane.b32.xlu0 %v1023_v8, %s5252_s13  ;;  %v3968_v8 = vrot.slane %v3952_v44, %v3629_v36  ;;  %s5255_s13 = smov 78  }
 0x15c   : > { %v3954_v48 = vpop.permute.xlu0 %617  ;;  %1680 = vrot.lane.b32.xlu1 %v1677_v13, %s3362_s26  ;;  %v1731_v17 = vcombine.high %v3968_v8, %v3968_v8 }
 0x15d   : > { %3124 = vset.pattern.permute.xlu1 %v3363_v25 }
 0x15e   : > { %v3963_v52 = vpop.permute.xlu1 %619  ;;  %1079 = vrot.lane.b32.xlu0 %v1073_v49, %s5253_s9  ;;  %v3980_v49 = vld [vmem:[#allocation2] sm:$0x3f]  ;;  %s3391_s9 = smov 27  }
 0x15f   : > { %v3996_v27 = vrot.slane %v3980_v49, %v3629_v36 }
 0x160   : > { %v3970_v13 = vpop.permute.xlu0 %671  ;;  %1712 = vperm.xlu1 %3124, %v1709_v6   ;;  %v1173_v6 = vrot.slane %v1159_v30, %v3629_v36  ;;  %v1223_v30 = vrot.slane %v1209_v18, %v3629_v36  ;;  %v1309_v18 = vcombine.high %v3768_v58, %v3768_v58 }
 0x161   : > { %v1781_v15 = vcombine.high %v3996_v27, %v3996_v27 }
 0x162   : > { %v3975_v25 = vpop.permute.xlu1 %673  ;;  %1129 = vrot.lane.b32.xlu0 %v1123_v22, %s5254_s16  ;;  %v1759_v22 = vld [vmem:[%s5161_s0] sm:$0x3]  ;;  %s3400_s16 = smov 74  }
 0x164   : > { %v3982_v29 = vpop.permute.xlu0 %721  ;;  %1734 = vrot.lane.b32.xlu1 %v1731_v17, %s3364_s6 }
 0x165   : > { %3125 = vset.pattern.permute.xlu1 %v3365_v34 }
 0x166   : > { %v3991_v42 = vpop.permute.xlu1 %723  ;;  %1179 = vrot.lane.b32.xlu0 %v1173_v6, %s5255_s13  ;;  %v4008_v6 = vld [vmem:[#allocation2] sm:$0x3f] }
 0x167   : > { %v4024_v24 = vrot.slane %v4008_v6, %v3629_v36 }
 0x168   : > { %v3998_v17 = vpop.permute.xlu0 %771  ;;  %1762 = vperm.xlu1 %3125, %v1759_v22   ;;  %v1273_v22 = vrot.slane %v1259_v43, %v3629_v36  ;;  %v1323_v43 = vrot.slane %v1309_v18, %v3629_v36  ;;  %v1859_v18 = vld [vmem:[%s5161_s0] sm:$0x3] }
 0x16a   : > { %v4003_v34 = vpop.permute.xlu1 %773  ;;  %1229 = vrot.lane.b32.xlu0 %v1223_v30, %s5256_s5  ;;  %v1809_v30 = vld [vmem:[%s5161_s0] sm:$0x3]  ;;  %s3386_s5 = smov 59  }
 0x16c   : > { %v4010_v61 = vpop.permute.xlu0 %821  ;;  %1784 = vrot.lane.b32.xlu1 %v1781_v15, %s3366_s14 }
 0x16d   : > { %3126 = vset.pattern.permute.xlu1 %v3367_v50  ;;  %v1831_v50 = vcombine.high %v4024_v24, %v4024_v24 }
 0x16e   : > { %v4019_v39 = vpop.permute.xlu1 %823  ;;  %1279 = vrot.lane.b32.xlu0 %v1273_v22, %s5257_s23  ;;  %v1362_v22 = vcombine.high %v3780_v5, %v3780_v5  ;;  %s3396_s23 = smov 106  }
 0x170   : > { %v4026_v15 = vpop.permute.xlu0 %871  ;;  %1812 = vperm.xlu1 %3126, %v1809_v30  }
 0x171   : > { %5258 = vst [vmem:[#allocation25_spill] sm:$0xff] %v4026_v15  ;;  %v3385_v15 = vmov 47  }
 0x172   : > { %v4029_v58 = vpop.permute.xlu1 %873  ;;  %1329 = vrot.lane.b32.xlu0 %v1323_v43, %s3348_s30  ;;  %v4047_v43 = vrot.slane %v1858_v12, %v3629_v36  ;;  %s3370_s30 = smov 76  }
 0x173   : > { %5259 = vst [vmem:[#allocation26_spill] sm:$0xff] %v4029_v58  ;;  %v4277_v58 = vld [vmem:[#allocation2] sm:$0x3f] }
 0x174   : > { %v4034_v1 = vpop.permute.xlu0 %921  ;;  %1834 = vrot.lane.b32.xlu1 %v1831_v50, %s3368_s24  ;;  %v1376_v50 = vrot.slane %v1362_v22, %v3629_v36  ;;  %v1959_v22 = vld [vmem:[%s5161_s0] sm:$0x3]  ;;  %5292 = vst [vmem:[#allocation59_spill] sm:$0xff] %v4277_v58 }
 0x175   : > { %5260 = vst [vmem:[#allocation27_spill] sm:$0xff] %v4034_v1  ;;  %3127 = vset.pattern.permute.xlu1 %v3369_v57  ;;  %v1881_v57 = vcombine.high %v4047_v43, %v4047_v43  ;;  %v3371_v1 = vmov 39  }
 0x176   : > { %v4042_v30 = vpop.permute.xlu1 %923  ;;  %1378 = vrot.lane.b32.xlu0 %v3792_v38, %s3349_s8  ;;  %v1412_v38 = vcombine.high %v3802_v19, %v3802_v19 }
 0x177   : > { %5261 = vst [vmem:[#allocation28_spill] sm:$0xff] %v4042_v30  ;;  %v4220_v30 = vld [vmem:[#allocation2] sm:$0x3f] }
 0x178   : > { %v4049_v46 = vpop.permute.xlu0 %971  ;;  %1862 = vperm.xlu1 %3127, %v1859_v18   ;;  %v1866_v18 = vcombine.high %v1858_v12, %v1858_v12  ;;  %v1462_v12 = vcombine.high %v3826_v41, %v3826_v41 }
 0x179   : > { %5262 = vst [vmem:[#allocation29_spill] sm:$0xff] %v4049_v46 }
 0x17a   : > { %v4052_v5 = vpop.permute.xlu1 %973  ;;  %1382 = vrot.lane.b32.xlu0 %v1376_v50, %s3349_s8  ;;  %v1880_v19 = vrot.slane %v1866_v18, %v3629_v36  ;;  %s3373_s8 = smov 60   ;;  %v1476_v18 = vrot.slane %v1462_v12, %v3629_v36 }
 0x17b   : > { %5263 = vst [vmem:[#allocation30_spill] sm:$0xff] %v4052_v5  ;;  %v4194_v5 = vld [vmem:[#allocation2] sm:$0x3f] }
 0x17c   : > { %v4057_v33 = vpop.permute.xlu0 %1025  ;;  %1884 = vrot.lane.b32.xlu1 %v1881_v57, %s3370_s30  ;;  %v1426_v57 = vrot.slane %v1412_v38, %v3629_v36 }
 0x17d   : > { %5264 = vst [vmem:[#allocation31_spill] sm:$0xff] %v4057_v33  ;;  %3129 = vset.pattern.permute.xlu1 %v3371_v1  ;;  %v4074_v1 = vld [vmem:[#allocation2] sm:$0x3f] }
 0x17e   : > { %1428 = vrot.lane.b32.xlu0 %v3816_v28, %s3351_s10  ;;  %v4067_v50 = vpop.permute.xlu1 %1027  ;;  %v1923_v38 = vrot.slane %v4074_v1, %v3629_v36 }
 0x17f   : > { %5265 = vst [vmem:[#allocation32_spill] sm:$0xff] %v4067_v50  ;;  %v3372_v50 = vmov 5  }
 0x180   : > { %v4069_v46 = vpop.permute.xlu0 %1075  ;;  %1962 = vperm.xlu1 %3129, %v1959_v22   ;;  %v1931_v41 = vcombine.high %v1923_v38, %v1923_v38 }
 0x181   : > { %5266 = vst [vmem:[#allocation33_spill] sm:$0xff] %v4069_v46  ;;  %v3379_v46 = vmov 26  }
 0x182   : > { %1432 = vrot.lane.b32.xlu0 %v1426_v57, %s3351_s10  ;;  %v4081_v28 = vpop.permute.xlu1 %1077  ;;  %s3394_s10 = smov 122  }
 0x183   : > { %5268 = vst [vmem:[#allocation35_spill] sm:$0xff] %v4081_v28 }
 0x184   : > { %v4076_v33 = vpop.permute.xlu0 %1125  ;;  %1886 = vrot.lane.b32.xlu1 %v1880_v19, %s3370_s30  ;;  %v4094_v19 = vld [vmem:[#allocation2] sm:$0x3f] }
 0x185   : > { %5267 = vst [vmem:[#allocation34_spill] sm:$0xff] %v4076_v33  ;;  %3131 = vset.pattern.permute.xlu1 %v3372_v50  ;;  %v4108_v12 = vrot.slane %v4094_v19, %v3629_v36 }
 0x186   : > { %1478 = vrot.lane.b32.xlu0 %v3838_v54, %s3353_s11  ;;  %v4092_v57 = vpop.permute.xlu1 %1127  ;;  %v1512_v54 = vcombine.high %v3848_v4, %v3848_v4 }
 0x187   : > { %5270 = vst [vmem:[#allocation37_spill] sm:$0xff] %v4092_v57  ;;  %v4168_v57 = vld [vmem:[#allocation2] sm:$0x3f] }
 0x188   : > { %v4087_v22 = vpop.permute.xlu0 %1175  ;;  %1932 = vrot.lane.b32.xlu1 %v1923_v38, %s3373_s8  ;;  %v1526_v4 = vrot.slane %v1512_v54, %v3629_v36  ;;  %v2113_v54 = vld [vmem:[%s5161_s0] sm:$0x3] }
 0x189   : > { %5269 = vst [vmem:[#allocation36_spill] sm:$0xff] %v4087_v22  ;;  %v2063_v22 = vld [vmem:[%s5161_s0] sm:$0x3] }
 0x18a   : > { %1482 = vrot.lane.b32.xlu0 %v1476_v18, %s3353_s11  ;;  %v4113_v18 = vpop.permute.xlu1 %1177  ;;  %s3374_s11 = smov 44  }
 0x18b   : > { %5273 = vst [vmem:[#allocation40_spill] sm:$0xff] %v4113_v18  ;;  %v3377_v18 = vmov 19  }
 0x18c   : > { %v4098_v50 = vpop.permute.xlu0 %1225  ;;  %1934 = vrot.lane.b32.xlu1 %v1931_v41, %s3373_s8  ;;  %v1981_v41 = vcombine.high %v4108_v12, %v4108_v12 }
 0x18d   : > { %5271 = vst [vmem:[#allocation38_spill] sm:$0xff] %v4098_v50  ;;  %v4118_v50 = vld [vmem:[#allocation2] sm:$0x3f] }
 0x18e   : > { %1528 = vrot.lane.b32.xlu0 %v3862_v16, %s3355_s27  ;;  %v1562_v16 = vcombine.high %v3870_v23, %v3870_v23 }
 0x190   : > { %v4110_v38 = vpop.permute.xlu0 %1275  ;;  %2066 = vperm.xlu1 %3131, %v2063_v22   ;;  %v3375_v22 = vmov 12   ;;  %v1576_v23 = vrot.slane %v1562_v16, %v3629_v36  ;;  %v2163_v16 = vld [vmem:[%s5161_s0] sm:$0x3] }
 0x191   : > { %5272 = vst [vmem:[#allocation39_spill] sm:$0xff] %v4110_v38  ;;  %v4142_v38 = vld [vmem:[#allocation2] sm:$0x3f] }
 0x192   : > { %1532 = vrot.lane.b32.xlu0 %v1526_v4, %s3355_s27  ;;  %v4132_v4 = vrot.slane %v4118_v50, %v3629_v36  ;;  %s3376_s27 = smov 28  }
 0x194   : > { %v4120_v33 = vpop.permute.xlu0 %1325  ;;  %1984 = vrot.lane.b32.xlu1 %v1981_v41, %s3374_s11 }
 0x195   : > { %5274 = vst [vmem:[#allocation41_spill] sm:$0xff] %v4120_v33  ;;  %3132 = vset.pattern.permute.xlu1 %v3375_v22  ;;  %v4134_v33 = vpop.permute.xlu1 %1227  ;;  %v2031_v22 = vcombine.high %v4132_v4, %v4132_v4 }
 0x196   : > { %1578 = vrot.lane.b32.xlu0 %v3884_v32, %s3357_s15  ;;  %5275 = vst [vmem:[#allocation42_spill] sm:$0xff] %v4134_v33  ;;  %v1612_v33 = vcombine.high %v3896_v60, %v3896_v60 }
 0x198   : > { %2116 = vperm.xlu1 %3132, %v2113_v54   ;;  %v4136_v41 = vpop.permute.xlu0 %371  ;;  %v1626_v60 = vrot.slane %v1612_v33, %v3629_v36  ;;  %v2213_v33 = vld [vmem:[%s5161_s0] sm:$0x3] }
 0x199   : > { %v4149_v54 = vpop.permute.xlu1 %1277 }
 0x19a   : > { %1582 = vrot.lane.b32.xlu0 %v1576_v23, %s3357_s15  ;;  %5276 = vst [vmem:[#allocation43_spill] sm:$0xff] %v4149_v54  ;;  %v4158_v23 = vrot.slane %v4142_v38, %v3629_v36  ;;  %s3378_s15 = smov 123  }
 0x19c   : > { %2034 = vrot.lane.b32.xlu1 %v2031_v22, %s3376_s27  ;;  %v4145_v32 = vpop.permute.xlu0 %421  ;;  %5277 = vst [vmem:[#allocation44_spill] sm:$0xff] %v4158_v23 }
 0x19d   : > { %3133 = vset.pattern.permute.xlu1 %v3377_v18  ;;  %v2085_v18 = vcombine.high %v4158_v23, %v4158_v23  ;;  %v4166_v54 = vpop.permute.xlu1 %1327  ;;  %v4246_v23 = vld [vmem:[#allocation2] sm:$0x3f] }
 0x19e   : > { %1628 = vrot.lane.b32.xlu0 %v3912_v59, %s3360_s21  ;;  %5278 = vst [vmem:[#allocation45_spill] sm:$0xff] %v4166_v54 }
 0x1a0   : > { %2166 = vperm.xlu1 %3133, %v2163_v16   ;;  %v4160_v22 = vpop.permute.xlu0 %471  ;;  %v1662_v16 = vcombine.high %v3924_v31, %v3924_v31 }
 0x1a2   : > { %1632 = vrot.lane.b32.xlu0 %v1626_v60, %s3360_s21  ;;  %v4182_v60 = vrot.slane %v4168_v57, %v3629_v36  ;;  %v1676_v31 = vrot.slane %v1662_v16, %v3629_v36  ;;  %s3380_s21 = smov 107   ;;  %v2263_v16 = vld [vmem:[%s5161_s0] sm:$0x3] }
 0x1a4   : > { %2088 = vrot.lane.b32.xlu1 %v2085_v18, %s3378_s15  ;;  %v4171_v59 = vpop.permute.xlu0 %521  ;;  %5279 = vst [vmem:[#allocation46_spill] sm:$0xff] %v4182_v60 }
 0x1a5   : > { %3134 = vset.pattern.permute.xlu1 %v3379_v46  ;;  %v2135_v46 = vcombine.high %v4182_v60, %v4182_v60 }
 0x1a6   : > { %1678 = vrot.lane.b32.xlu0 %v3940_v7, %s3362_s26 }
 0x1a7   : > { %v4184_v54 = vpop.permute.xlu1 %1358 }
 0x1a8   : > { %5280 = vst [vmem:[#allocation47_spill] sm:$0xff] %v4184_v54  ;;  %2216 = vperm.xlu1 %3134, %v2213_v33   ;;  %v4186_v18 = vpop.permute.xlu0 %571  ;;  %v1716_v33 = vcombine.high %v3952_v44, %v3952_v44  ;;  %v3381_v54 = vmov 33  }
 0x1aa   : > { %1682 = vrot.lane.b32.xlu0 %v1676_v31, %s3362_s26  ;;  %v4208_v31 = vrot.slane %v4194_v5, %v3629_v36  ;;  %v1730_v44 = vrot.slane %v1716_v33, %v3629_v36  ;;  %s3382_s26 = smov 91   ;;  %v2313_v33 = vld [vmem:[%s5161_s0] sm:$0x3] }
 0x1ab   : > { %v4192_v28 = vpop.permute.xlu1 %1380 }
 0x1ac   : > { %5281 = vst [vmem:[#allocation48_spill] sm:$0xff] %v4192_v28  ;;  %2138 = vrot.lane.b32.xlu1 %v2135_v46, %s3380_s21  ;;  %v4197_v7 = vpop.permute.xlu0 %621  ;;  %5282 = vst [vmem:[#allocation49_spill] sm:$0xff] %v4208_v31 }
 0x1ad   : > { %3135 = vset.pattern.permute.xlu1 %v3381_v54  ;;  %v2185_v54 = vcombine.high %v4208_v31, %v4208_v31 }
 0x1ae   : > { %1732 = vrot.lane.b32.xlu0 %v3968_v8, %s3364_s6 }
 0x1af   : > { %v4210_v28 = vpop.permute.xlu1 %1408 }
 0x1b0   : > { %5283 = vst [vmem:[#allocation50_spill] sm:$0xff] %v4210_v28  ;;  %2266 = vperm.xlu1 %3135, %v2263_v16   ;;  %v4212_v46 = vpop.permute.xlu0 %675  ;;  %v1766_v16 = vcombine.high %v3980_v49, %v3980_v49  ;;  %v3383_v28 = vmov 40  }
 0x1b2   : > { %1736 = vrot.lane.b32.xlu0 %v1730_v44, %s3364_s6  ;;  %v4234_v44 = vrot.slane %v4220_v30, %v3629_v36  ;;  %v1780_v49 = vrot.slane %v1766_v16, %v3629_v36  ;;  %s3384_s6 = smov 75   ;;  %v2363_v16 = vld [vmem:[%s5161_s0] sm:$0x3] }
 0x1b3   : > { %v4218_v60 = vpop.permute.xlu1 %1430 }
 0x1b4   : > { %5284 = vst [vmem:[#allocation51_spill] sm:$0xff] %v4218_v60  ;;  %2188 = vrot.lane.b32.xlu1 %v2185_v54, %s3382_s26  ;;  %v4223_v8 = vpop.permute.xlu0 %725  ;;  %5285 = vst [vmem:[#allocation52_spill] sm:$0xff] %v4234_v44 }
 0x1b5   : > { %3136 = vset.pattern.permute.xlu1 %v3383_v28  ;;  %v2235_v28 = vcombine.high %v4234_v44, %v4234_v44 }
 0x1b6   : > { %1782 = vrot.lane.b32.xlu0 %v3996_v27, %s3366_s14 }
 0x1b7   : > { %v4236_v60 = vpop.permute.xlu1 %1458 }
 0x1b8   : > { %5286 = vst [vmem:[#allocation53_spill] sm:$0xff] %v4236_v60  ;;  %2316 = vperm.xlu1 %3136, %v2313_v33   ;;  %v4238_v54 = vpop.permute.xlu0 %775  ;;  %v1816_v33 = vcombine.high %v4008_v6, %v4008_v6  ;;  %v2939_v60 = vld.sshfl [vmem:[#allocation2] sm:$0x33 pattern:$0x76325410] }
 0x1b9   : > { %v325_v44 = vcombine.high %v2939_v60, %v2939_v60 }
 0x1ba   : > { %1786 = vrot.lane.b32.xlu0 %v1780_v49, %s3366_s14  ;;  %v4260_v49 = vrot.slane %v4246_v23, %v3629_v36  ;;  %v1830_v6 = vrot.slane %v1816_v33, %v3629_v36  ;;  %s3401_s14 = smov 58  }
 0x1bb   : > { %v4244_v31 = vpop.permute.xlu1 %1480 }
 0x1bc   : > { %5287 = vst [vmem:[#allocation54_spill] sm:$0xff] %v4244_v31  ;;  %2238 = vrot.lane.b32.xlu1 %v2235_v28, %s3384_s6  ;;  %v4249_v27 = vpop.permute.xlu0 %825  ;;  %5288 = vst [vmem:[#allocation55_spill] sm:$0xff] %v4260_v49 }
 0x1bd   : > { %3137 = vset.pattern.permute.xlu1 %v3385_v15  ;;  %v2285_v15 = vcombine.high %v4260_v49, %v4260_v49  ;;  %v2417_v49 = vld [vmem:[%s5161_s0] sm:$0x3] }
 0x1be   : > { %1832 = vrot.lane.b32.xlu0 %v4024_v24, %s3368_s24  ;;  %v4273_v24 = vld [vmem:[%s5163_s2] sm:$0xf] }
 0x1bf   : > { %v4262_v28 = vpop.permute.xlu1 %1508 }
 0x1c0   : > { %5289 = vst [vmem:[#allocation56_spill] sm:$0xff] %v4262_v28  ;;  %2366 = vperm.xlu1 %3137, %v2363_v16   ;;  %v4264_v31 = vpop.permute.xlu0 %875  ;;  %v329_v16 = vmul.f32 %v325_v44, %v3626_v35  ;;  %v306_v28 = vadd.s32 4294967293, %v4273_v24  ;;  %v4292_v44 = vrot.slane %v4277_v58, %v3629_v36  ;;  %v3390_v58 = vmov 46  }
 0x1c1   : > { %5290 = vst [vmem:[#allocation57_spill] sm:$0xff] %v4264_v31  ;;  %v328_v31 = vmul.f32 %v2939_v60, %v3626_v35  ;;  %v4305_v60 = vld [vmem:[#allocation2] sm:$0x3f] }
 0x1c2   : > { %1836 = vrot.lane.b32.xlu0 %v1830_v6, %s3368_s24  ;;  %v3387_v6 = vmov 6   ;;  %5294 = vst [vmem:[#allocation61_spill] sm:$0xff] %v4292_v44  ;;  %vm307_vm5 = vcmp.ge.s32.totalorder %v306_v28, 0  ;;  %vm308_vm6 = vcmp.lt.s32.totalorder %v306_v28, 16  ;;  %v2335_v35 = vcombine.high %v4292_v44, %v4292_v44  ;;  %5298 = vst [vmem:[#allocation65_spill] sm:$0xff] %v4305_v60  ;;  %s3398_s24 = smov 90  }
 0x1c3   : > { %v4275_v26 = vpop.permute.xlu1 %1530  ;;  %v4316_v28 = vld [vmem:[#allocation2] sm:$0x3f]  ;;  %vm4318_vm7 = vmand %vm307_vm5, %vm308_vm6 }
 0x1c4   : > { %5291 = vst [vmem:[#allocation58_spill] sm:$0xff] %v4275_v26  ;;  %2288 = vrot.lane.b32.xlu1 %v2285_v15, %s3386_s5  ;;  %v4281_v33 = vpop.permute.xlu0 %925  ;;  %v332_v26 = vcombine.low %v328_v31, %v329_v16  ;;  %5300 = vst [vmem:[#allocation67_spill] sm:$0xff] %v4316_v28  ;;  %v4327_v44 = vld [vmem:[#allocation2] sm:$0x3f] }
 0x1c5   : > { %5293 = vst [vmem:[#allocation60_spill] sm:$0xff] %v4281_v33  ;;  %3138 = vset.pattern.permute.xlu1 %v3387_v6  ;;  %v1909_v6 = vld [vmem:[%s5161_s0] sm:$0x3]  ;;  %5303 = vst [vmem:[#allocation68_spill] sm:$0xff] %v4327_v44 }
 0x1c6   : > { %1882 = vrot.lane.b32.xlu0 %v4047_v43, %s3370_s30  ;;  %s3388_s30 = smov 43  }
 0x1c7   : > { %v4294_v15 = vpop.permute.xlu1 %1558 }
 0x1c8   : > { %5295 = vst [vmem:[#allocation62_spill] sm:$0xff] %v4294_v15  ;;  %2420 = vperm.xlu1 %3138, %v2417_v49   ;;  %v4299_v33 = vpop.permute.xlu0 %975  ;;  %v4308_v15 = vrot.slane %v332_v26, %v3629_v36  ;;  %v2009_v49 = vld [vmem:[%s5161_s0] sm:$0x3] }
 0x1c9   : > { %5296 = vst [vmem:[#allocation63_spill] sm:$0xff] %v4299_v33  ;;  %v2467_v26 = vld [vmem:[%s5161_s0] sm:$0x3] }
 0x1ca   : > { %1912 = vperm.xlu0 %3128, %v1909_v6   ;;  %v3389_v6 = vmov 13  }
 0x1cb   : > { %v4303_v43 = vpop.permute.xlu1 %1580 }
 0x1cc   : > { %5297 = vst [vmem:[#allocation64_spill] sm:$0xff] %v4303_v43  ;;  %2338 = vrot.lane.b32.xlu1 %v2335_v35, %s3388_s30  ;;  %v4311_v31 = vpop.permute.xlu0 %1029  ;;  %v1916_v35 = vcombine.high %v4074_v1, %v4074_v1  ;;  %v4331_v43 = vrot.slane %v4305_v60, %v3629_v36  ;;  %v4341_v1 = vrot.slane %v4316_v28, %v3629_v36 }
 0x1cd   : > { %5299 = vst [vmem:[#allocation66_spill] sm:$0xff] %v4311_v31  ;;  %3139 = vset.pattern.permute.xlu1 %v3389_v6  ;;  %v1966_v31 = vcombine.high %v4094_v19, %v4094_v19  ;;  %v4335_v6 = vld [vmem:[#allocation2] sm:$0x3f]  ;;  %v2070_v28 = vcombine.high %v4142_v38, %v4142_v38  ;;  %v2120_v19 = vcombine.high %v4168_v57, %v4168_v57 }
 0x1ce   : > { %3130 = vset.pattern.permute.xlu0 %v3390_v58  ;;  %5304 = vst [vmem:[#allocation69_spill] sm:$0xff] %v4331_v43  ;;  %5305 = vst [vmem:[#allocation70_spill] sm:$0xff] %v4335_v6  ;;  %v2016_v58 = vcombine.high %v4118_v50, %v4118_v50  ;;  %v1930_v50 = vrot.slane %v1916_v35, %v3629_v36  ;;  %v375_v38 = vsel %vm373_vm8, %v3891_v53, %v4136_v41 }
 0x1cf   : > { %v4337_v33 = vpop.permute.xlu1 %1608  ;;  %2012 = vperm.xlu0 %3130, %v2009_v49   ;;  %5307 = vst [vmem:[#allocation72_spill] sm:$0xff] %v4341_v1  ;;  %v4354_v49 = vrot.slane %v4327_v44, %v3629_v36  ;;  %v4370_v44 = vrot.slane %v4345_v21, %v3629_v36  ;;  %v2439_v57 = vcombine.high %v4341_v1, %v4341_v1  ;;  %v5227_v1 = vmov 48  }
 0x1d0   : > { %5306 = vst [vmem:[#allocation71_spill] sm:$0xff] %v4337_v33  ;;  %2470 = vperm.xlu1 %3139, %v2467_v26   ;;  %v4350_v60 = vpop.permute.xlu0 %1079  ;;  %v4361_v33 = vrot.slane %v4335_v6, %v3629_v36  ;;  %v2385_v26 = vcombine.high %v4331_v43, %v4331_v43  ;;  %v4381_v6 = vrot.slane %v2016_v58, %v3629_v36  ;;  %v4383_v43 = vld [vmem:[#allocation2] sm:$0x3f] }
 0x1d1   : > { %5309 = vst [vmem:[#allocation74_spill] sm:$0xff] %v4350_v60  ;;  %v1980_v60 = vrot.slane %v1966_v31, %v3629_v36  ;;  %5311 = vst [vmem:[#allocation76_spill] sm:$0xff] %v4383_v43  ;;  %v425_v31 = vsel %vm423_vm9, %v3907_v11, %v4145_v32  ;;  %v4394_v21 = vrot.slane %v2070_v28, %v3629_v36  ;;  %v2666_v58 = vld [vmem:[#allocation2] sm:$0x3f]  ;;  %v3393_v32 = vmov 20  }
 0x1d2   : > { %v4406_v28 = vrot.slane %v2120_v19, %v3629_v36  ;;  %v4421_v19 = vrot.slane %v4383_v43, %v3629_v36 }
 0x1d3   : > { %v4375_v35 = vpop.permute.xlu1 %1630  ;;  %1936 = vrot.lane.b32.xlu0 %v1930_v50, %s3373_s8 }
 0x1d4   : > { %5310 = vst [vmem:[#allocation75_spill] sm:$0xff] %v4375_v35  ;;  %2388 = vrot.lane.b32.xlu1 %v2385_v26, %s3391_s9  ;;  %v4389_v41 = vpop.permute.xlu0 %1129  ;;  %3145 = vset.pattern.permute.xlu0 %v5227_v1  ;;  %v374_v35 = vsel %vm373_vm8, %v3886_v47, %v3891_v53  ;;  %v2517_v26 = vld [vmem:[%s5161_s0] sm:$0x3]  ;;  %v2170_v1 = vcombine.high %v4194_v5, %v4194_v5  ;;  %vm1031_vm8 = vcmask 1031168  }
 0x1d5   : > { %5312 = vst [vmem:[#allocation77_spill] sm:$0xff] %v4389_v41  ;;  %3140 = vset.pattern.permute.xlu1 %v3393_v32  ;;  %v4410_v41 = vld [vmem:[#allocation2] sm:$0x3f]  ;;  %v424_v47 = vsel %vm423_vm9, %v3898_v55, %v3907_v11  ;;  %v379_v53 = vmul.f32 %v375_v38, %v3631_v37  ;;  %v475_v32 = vsel %vm473_vm10, %v3919_v20, %v4160_v22  ;;  %vm1081_vm9 = vcmask 900096  }
 0x1d6   : > { %v429_v5 = vmul.f32 %v425_v31, %v3645_v45  ;;  %v4431_v11 = vrot.slane %v2666_v58, %v3629_v36  ;;  %v2220_v22 = vcombine.high %v4220_v30, %v4220_v30  ;;  %v378_v38 = vmul.f32 %v374_v35, %v3631_v37 }
 0x1d7   : > { %v4424_v50 = vpop.permute.xlu1 %1658  ;;  %1982 = vrot.lane.b32.xlu0 %v4108_v12, %s3374_s11  ;;  %v474_v31 = vsel %vm473_vm10, %v3914_v40, %v3919_v20  ;;  %v2674_v12 = vcombine.high %v2666_v58, %v2666_v58  ;;  %v4443_v55 = vrot.slane %v4410_v41, %v3629_v36  ;;  %v525_v37 = vsel %vm523_vm11, %v3935_v0, %v4171_v59 }
 0x1d8   : > { %5313 = vst [vmem:[#allocation78_spill] sm:$0xff] %v4424_v50  ;;  %5314 = vst [vmem:[#allocation79_spill] sm:$0xff] %v4431_v11  ;;  %2520 = vperm.xlu1 %3140, %v2517_v26   ;;  %v4439_v43 = vpop.permute.xlu0 %1179  ;;  %v428_v50 = vmul.f32 %v424_v47, %v3645_v45  ;;  %v479_v11 = vmul.f32 %v475_v32, %v3656_v51  ;;  %v4451_v30 = vrot.slane %v2170_v1, %v3629_v36  ;;  %vm1131_vm10 = vcmask 769024  }
 0x1d9   : > { %v382_v40 = vcombine.low %v378_v38, %v379_v53  ;;  %v2639_v20 = vcombine.high %v4421_v19, %v4421_v19  ;;  %v2270_v35 = vcombine.high %v4246_v23, %v4246_v23  ;;  %v478_v58 = vmul.f32 %v474_v31, %v3656_v51 }
 0x1da   : > { %v524_v45 = vsel %vm523_vm11, %v3926_v2, %v3935_v0  ;;  %v432_v26 = vcombine.low %v428_v50, %v429_v5  ;;  %v575_v59 = vsel %vm573_vm12, %v3947_v63, %v4186_v18  ;;  %v574_v47 = vsel %vm573_vm12, %v3942_v10, %v3947_v63 }
 0x1db   : > { %v4464_v1 = vpop.permute.xlu1 %1680  ;;  %1986 = vrot.lane.b32.xlu0 %v1980_v60, %s3374_s11  ;;  %v529_v51 = vmul.f32 %v525_v37, %v3667_v56  ;;  %v4472_v53 = vadd.s32 4294967294, %v4273_v24  ;;  %v4478_v0 = vrot.slane %v2220_v22, %v3629_v36  ;;  %v624_v18 = vsel %vm623_vm13, %v3954_v48, %v3963_v52 }
 0x1dc   : > { %2442 = vrot.lane.b32.xlu1 %v2439_v57, %s3394_s10  ;;  %v4475_v2 = vpop.permute.xlu0 %1229  ;;  %v482_v60 = vcombine.low %v478_v58, %v479_v11  ;;  %v625_v10 = vsel %vm623_vm13, %v3963_v52, %v4197_v7  ;;  %v3395_v63 = vmov 27   ;;  %v2567_v57 = vld [vmem:[%s5161_s0] sm:$0x3]  ;;  %v4490_v50 = vrot.slane %v2674_v12, %v3629_v36 }
 0x1dd   : > { %3141 = vset.pattern.permute.xlu1 %v3395_v63  ;;  %v528_v32 = vmul.f32 %v524_v45, %v3667_v56  ;;  %v389_v5 = vrot.slane %v382_v40, %v3629_v36  ;;  %v579_v48 = vmul.f32 %v575_v59, %v3678_v62  ;;  %v2739_v11 = vcombine.high %v4443_v55, %v4443_v55  ;;  %v2617_v63 = vld [vmem:[%s5161_s0] sm:$0x3] }
 0x1de   : > { %v578_v52 = vmul.f32 %v574_v47, %v3678_v62  ;;  %v439_v7 = vrot.slane %v432_v26, %v3629_v36  ;;  %v679_v22 = vsel %vm677_vm14, %v3975_v25, %v4212_v46  ;;  %v4503_v38 = vadd.s32 4294967295, %v4273_v24 }
 0x1df   : > { %v4505_v56 = vpop.permute.xlu1 %1712  ;;  %2032 = vrot.lane.b32.xlu0 %v4132_v4, %s3376_s27  ;;  %v628_v31 = vmul.f32 %v624_v18, %v3689_v3  ;;  %v678_v62 = vsel %vm677_vm14, %v3970_v13, %v3975_v25  ;;  %v532_v12 = vcombine.low %v528_v32, %v529_v51  ;;  %v629_v37 = vmul.f32 %v625_v10, %v3689_v3  ;;  %v5316_v51 = vld [vmem:[#allocation13_spill] sm:$0xff] }
 0x1e0   : > { %vm644_vm5 = vcmp.ge.s32.totalorder %v4472_v53, 0  ;;  %vm645_vm6 = vcmp.lt.s32.totalorder %v4472_v53, 16  ;;  %2570 = vperm.xlu1 %3141, %v2567_v57   ;;  %v4516_v46 = vpop.permute.xlu0 %1279  ;;  %v728_v4 = vsel %vm727_vm15, %v3982_v29, %v3991_v42  ;;  %v778_v40 = vsel %vm777_vm0, %v3998_v17, %v4003_v34 }
 0x1e1   : > { %v489_v13 = vrot.slane %v482_v60, %v3629_v36  ;;  %v729_v3 = vsel %vm727_vm15, %v3991_v42, %v4223_v8  ;;  %v391_v25 = vsel %vm4318_vm7, %v389_v5, 0.0  ;;  %v582_v58 = vcombine.low %v578_v52, %v579_v48  ;;  %v5318_v5 = vld [vmem:[#allocation57_spill] sm:$0xff]  ;;  %v5319_v48 = vld [vmem:[#allocation26_spill] sm:$0xff]  ;;  %vm4603_vm13 = vmand %vm644_vm5, %vm645_vm6 }
 0x1e2   : > { %v683_v45 = vmul.f32 %v679_v22, %v3700_v9  ;;  %v682_v26 = vmul.f32 %v678_v62, %v3700_v9  ;;  %v828_v29 = vsel %vm827_vm1, %v4010_v61, %v4019_v39  ;;  %v441_v17 = vsel %vm4318_vm7, %v439_v7, 0.0  ;;  %v5321_v22 = vld [vmem:[#allocation25_spill] sm:$0xff] }
 0x1e3   : > { %v779_v42 = vsel %vm777_vm0, %v4003_v34, %v4238_v54  ;;  %v4540_v8 = vpop.permute.xlu1 %1734  ;;  %2036 = vrot.lane.b32.xlu0 %v4381_v6, %s3376_s27  ;;  %v539_v9 = vrot.slane %v532_v12, %v3629_v36  ;;  %v632_v59 = vcombine.low %v628_v31, %v629_v37  ;;  %v733_v47 = vmul.f32 %v729_v3, %v3711_v14 }
 0x1e4   : > { %v829_v61 = vsel %vm827_vm1, %v4019_v39, %v4249_v27  ;;  %v5315_v34 = vcombine.high %v4354_v49, %v4354_v49  ;;  %v4553_v54 = vpop.permute.xlu0 %1329  ;;  %v732_v6 = vmul.f32 %v728_v4, %v3711_v14  ;;  %v782_v18 = vmul.f32 %v778_v40, %v5316_v51  ;;  %v5322_v4 = vld [vmem:[#allocation44_spill] sm:$0xff] }
 0x1e5   : > { %v5317_v60 = vsel %vm4318_vm7, %v4308_v15, 0.0  ;;  %v491_v39 = vsel %vm4318_vm7, %v489_v13, 0.0  ;;  %v3397_v27 = vmov 34   ;;  %v589_v57 = vrot.slane %v582_v58, %v3629_v36  ;;  %v5320_v15 = vld [vmem:[#allocation14_spill] sm:$0xff]  ;;  %v5323_v58 = vld [vmem:[#allocation28_spill] sm:$0xff] }
 0x1e6   : > { %2492 = vrot.lane.b32.xlu1 %v5315_v34, %s3396_s23  ;;  %v392_v10 = vadd.f32 %v391_v25, %v5317_v60  ;;  %v686_v14 = vcombine.low %v682_v26, %v683_v45  ;;  %v783_v32 = vmul.f32 %v779_v42, %v5316_v51  ;;  %v879_v52 = vsel %vm877_vm2, %v5319_v48, %v5318_v5  ;;  %v5324_v45 = vld [vmem:[#allocation27_spill] sm:$0xff]  ;;  %v5327_v51 = vld [vmem:[#allocation30_spill] sm:$0xff]  ;;  %v5328_v60 = vld [vmem:[#allocation29_spill] sm:$0xff] }
 0x1e7   : > { %3142 = vset.pattern.permute.xlu1 %v3397_v27  ;;  %v832_v7 = vmul.f32 %v828_v29, %v5320_v15  ;;  %v878_v31 = vsel %vm877_vm2, %v5321_v22, %v5319_v48  ;;  %v833_v12 = vmul.f32 %v829_v61, %v5320_v15  ;;  %v4576_v37 = vpop.permute.xlu1 %1762  ;;  %2086 = vrot.lane.b32.xlu0 %v5322_v4, %s3378_s15  ;;  %v541_v40 = vsel %vm4318_vm7, %v539_v9, 0.0  ;;  %v5326_v61 = vld [vmem:[#allocation60_spill] sm:$0xff]  ;;  %v5331_v5 = vld [vmem:[#allocation63_spill] sm:$0xff]  ;;  %v5334_v22 = vld [vmem:[#allocation17_spill] sm:$0xff] }
 0x1e8   : > { %v442_v62 = vadd.f32 %v441_v17, %v392_v10  ;;  %v639_v13 = vrot.slane %v632_v59, %v3629_v36  ;;  %v736_v3 = vcombine.low %v732_v6, %v733_v47  ;;  %v4583_v25 = vpop.permute.xlu0 %1378  ;;  %v928_v26 = vsel %vm927_vm3, %v5324_v45, %v5323_v58  ;;  %v5325_v17 = vld [vmem:[#allocation15_spill] sm:$0xff]  ;;  %v5336_v4 = vld [vmem:[#allocation32_spill] sm:$0xff] }
 0x1e9   : > { %v883_v42 = vmul.f32 %v879_v52, %v5325_v17  ;;  %v929_v34 = vsel %vm927_vm3, %v5323_v58, %v5326_v61  ;;  %v978_v9 = vsel %vm977_vm4, %v5328_v60, %v5327_v51  ;;  %vm1181_vm11 = vcmask 637952   ;;  %v5340_v60 = vld [vmem:[#allocation74_spill] sm:$0xff] }
 0x1ea   : > { %2620 = vperm.xlu1 %3142, %v2617_v63   ;;  %v492_v29 = vadd.f32 %v491_v39, %v442_v62  ;;  %vm1231_vm12 = vcmask 506880   ;;  %v591_v59 = vsel %vm4318_vm7, %v589_v57, 0.0  ;;  %v693_v47 = vrot.slane %v686_v14, %v3629_v36 }
 0x1eb   : > { %v786_v6 = vcombine.low %v782_v18, %v783_v32  ;;  %v882_v10 = vmul.f32 %v878_v31, %v5325_v17  ;;  %v836_v63 = vcombine.low %v832_v7, %v833_v12  ;;  %v979_v48 = vsel %vm977_vm4, %v5327_v51, %v5331_v5  ;;  %v4610_v57 = vpop.permute.xlu1 %1784  ;;  %2090 = vrot.lane.b32.xlu0 %v4394_v21, %s3378_s15  ;;  %v5332_v18 = vld [vmem:[#allocation16_spill] sm:$0xff]  ;;  %v5335_v12 = vld [vmem:[#allocation66_spill] sm:$0xff]  ;;  %v5338_v17 = vld [vmem:[#allocation35_spill] sm:$0xff] }
 0x1ec   : > { %v542_v39 = vadd.f32 %v541_v40, %v492_v29  ;;  %v932_v14 = vmul.f32 %v928_v26, %v5332_v18  ;;  %vm1281_vm14 = vcmask 375808   ;;  %v641_v53 = vsel %vm4318_vm7, %v639_v13, 0.0  ;;  %v4623_v7 = vpop.permute.xlu0 %1382  ;;  %v2667_v13 = vld [vmem:[%s5161_s0] sm:$0x3] }
 0x1ed   : > { %v743_v32 = vrot.slane %v736_v3, %v3629_v36  ;;  %v933_v52 = vmul.f32 %v929_v34, %v5332_v18  ;;  %v5333_v15 = vcombine.high %v4361_v33, %v4361_v33  ;;  %v982_v21 = vmul.f32 %v978_v9, %v5334_v22  ;;  %v5337_v3 = vld [vmem:[#allocation31_spill] sm:$0xff]  ;;  %v5344_v18 = vld [vmem:[#allocation18_spill] sm:$0xff] }
 0x1ee   : > { %v592_v31 = vadd.f32 %v591_v59, %v542_v39  ;;  %v886_v62 = vcombine.low %v882_v10, %v883_v42  ;;  %v1033_v16 = vsel %vm1031_vm8, %v5336_v4, %v5335_v12  ;;  %v3399_v40 = vmov 41   ;;  %v5339_v42 = vld [vmem:[#allocation33_spill] sm:$0xff]  ;;  %v5343_v10 = vld [vmem:[#allocation34_spill] sm:$0xff] }
 0x1ef   : > { %2542 = vrot.lane.b32.xlu1 %v5333_v15, %s3398_s24  ;;  %v1032_v58 = vsel %vm1031_vm8, %v5337_v3, %v5336_v4  ;;  %v695_v45 = vsel %vm4603_vm13, %v693_v47, 0.0  ;;  %v793_v26 = vrot.slane %v786_v6, %v3629_v36  ;;  %v983_v29 = vmul.f32 %v979_v48, %v5334_v22  ;;  %v4648_v59 = vpop.permute.xlu1 %1812  ;;  %v5341_v47 = vld [vmem:[#allocation46_spill] sm:$0xff]  ;;  %v5342_v6 = vld [vmem:[#allocation37_spill] sm:$0xff] }
 0x1f0   : > { %3143 = vset.pattern.permute.xlu1 %v3399_v40  ;;  %vm998_vm7 = vcmp.ge.s32.totalorder %v4503_v38, 0  ;;  %vm999_vm15 = vcmp.lt.s32.totalorder %v4503_v38, 16  ;;  %v1082_v61 = vsel %vm1081_vm9, %v5339_v42, %v5338_v17  ;;  %v642_v34 = vadd.f32 %v641_v53, %v592_v31  ;;  %2136 = vrot.lane.b32.xlu0 %v5341_v47, %s3380_s21  ;;  %v4658_v53 = vpop.permute.xlu0 %1428  ;;  %v5345_v12 = vld [vmem:[#allocation77_spill] sm:$0xff]  ;;  %v5346_v40 = vld [vmem:[#allocation19_spill] sm:$0xff] }
 0x1f1   : > { %v843_v51 = vrot.slane %v836_v63, %v3629_v36  ;;  %v1083_v9 = vsel %vm1081_vm9, %v5338_v17, %v5340_v60  ;;  %v1132_v39 = vsel %vm1131_vm10, %v5343_v10, %v5342_v6  ;;  %vm1331_vm0 = vcmask 244736   ;;  %v5351_v60 = vld [vmem:[#allocation36_spill] sm:$0xff]  ;;  %vm4722_vm4 = vmand %vm998_vm7, %vm999_vm15  ;;  %v5363_v38 = vld [vmem:[#allocation41_spill] sm:$0xff] }
 0x1f2   : > { %v745_v5 = vsel %vm4603_vm13, %v743_v32, 0.0  ;;  %v936_v48 = vcombine.low %v932_v14, %v933_v52  ;;  %v1037_v63 = vmul.f32 %v1033_v16, %v5344_v18  ;;  %v1036_v15 = vmul.f32 %v1032_v58, %v5344_v18  ;;  %v5347_v16 = vld [vmem:[#allocation20_spill] sm:$0xff]  ;;  %v5354_v18 = vld [vmem:[#allocation21_spill] sm:$0xff] }
 0x1f3   : > { %2670 = vperm.xlu1 %3143, %v2667_v13   ;;  %v696_v22 = vadd.f32 %v695_v45, %v642_v34  ;;  %v893_v31 = vrot.slane %v886_v62, %v3629_v36  ;;  %v1133_v4 = vsel %vm1131_vm10, %v5342_v6, %v5345_v12  ;;  %v1086_v3 = vmul.f32 %v1082_v61, %v5346_v40  ;;  %v5348_v62 = vld [vmem:[#allocation40_spill] sm:$0xff]  ;;  %v4675_v42 = vpop.permute.xlu1 %1834  ;;  %v5349_v61 = vld [vmem:[#allocation42_spill] sm:$0xff]  ;;  %v5356_v12 = vld [vmem:[#allocation39_spill] sm:$0xff] }
 0x1f4   : > { %v795_v32 = vsel %vm4603_vm13, %v793_v26, 0.0  ;;  %v986_v14 = vcombine.low %v982_v21, %v983_v29  ;;  %v1087_v52 = vmul.f32 %v1083_v9, %v5346_v40  ;;  %vm1384_vm1 = vcmask 1022976   ;;  %2140 = vrot.lane.b32.xlu0 %v4406_v28, %s3380_s21  ;;  %v5352_v9 = vld [vmem:[#allocation38_spill] sm:$0xff] }
 0x1f5   : > { %v1136_v13 = vmul.f32 %v1132_v39, %v5347_v16  ;;  %v746_v17 = vadd.f32 %v745_v5, %v696_v22  ;;  %v845_v58 = vsel %vm4603_vm13, %v843_v51, 0.0  ;;  %v1183_v45 = vsel %vm1181_vm11, %v5348_v62, %v4439_v43  ;;  %v1433_v51 = vpop.permute.xlu0 %1432  ;;  %v2717_v39 = vld [vmem:[%s5161_s0] sm:$0x3] }
 0x1f6   : > { %v943_v21 = vrot.slane %v936_v48, %v3629_v36  ;;  %v1040_v26 = vcombine.low %v1036_v15, %v1037_v63  ;;  %v1137_v29 = vmul.f32 %v1133_v4, %v5347_v16  ;;  %v1233_v34 = vsel %vm1231_vm12, %v5349_v61, %v4475_v2  ;;  %v5355_v15 = vld [vmem:[#allocation43_spill] sm:$0xff]  ;;  %v5357_v40 = vld [vmem:[#allocation22_spill] sm:$0xff] }
 0x1f7   : > { %vm1434_vm2 = vcmask 891904   ;;  %v5350_v43 = vcombine.high %v4370_v44, %v4370_v44  ;;  %v1182_v28 = vsel %vm1181_vm11, %v5351_v60, %v5348_v62  ;;  %v1232_v47 = vsel %vm1231_vm12, %v5352_v9, %v5349_v61  ;;  %v4709_v16 = vpop.permute.xlu1 %1862 }
 0x1f8   : > { %v796_v6 = vadd.f32 %v795_v32, %v746_v17  ;;  %v895_v2 = vsel %vm4603_vm13, %v893_v31, 0.0  ;;  %v5353_v10 = vmov 48   ;;  %v993_v5 = vrot.slane %v986_v14, %v3629_v36  ;;  %v5358_v17 = vld [vmem:[#allocation49_spill] sm:$0xff] }
 0x1f9   : > { %2592 = vrot.lane.b32.xlu1 %v5350_v43, %s3400_s16  ;;  %v1090_v48 = vcombine.low %v1086_v3, %v1087_v52  ;;  %v1187_v63 = vmul.f32 %v1183_v45, %v5354_v18  ;;  %v1283_v22 = vsel %vm1281_vm14, %v5355_v15, %v4516_v46  ;;  %v1282_v4 = vsel %vm1281_vm14, %v5356_v12, %v5355_v15  ;;  %v1479_v62 = vpop.permute.xlu0 %1478  ;;  %v5366_v15 = vld [vmem:[#allocation51_spill] sm:$0xff] }
 0x1fa   : > { %3144 = vset.pattern.permute.xlu1 %v5353_v10  ;;  %v846_v31 = vadd.f32 %v845_v58, %v796_v6  ;;  %v1237_v32 = vmul.f32 %v1233_v34, %v5357_v40  ;;  %2186 = vrot.lane.b32.xlu0 %v5358_v17, %s3382_s26  ;;  %vm1484_vm3 = vcmask 760832   ;;  %v1186_v3 = vmul.f32 %v1182_v28, %v5354_v18  ;;  %v5361_v34 = vld [vmem:[#allocation23_spill] sm:$0xff] }
 0x1fb   : > { %v945_v14 = vsel %vm4603_vm13, %v943_v21, 0.0  ;;  %v1047_v46 = vrot.slane %v1040_v26, %v3629_v36  ;;  %v1140_v52 = vcombine.low %v1136_v13, %v1137_v29  ;;  %v1236_v58 = vmul.f32 %v1232_v47, %v5357_v40  ;;  %v5362_v21 = vld [vmem:[#allocation45_spill] sm:$0xff]  ;;  %v5367_v40 = vld [vmem:[#allocation47_spill] sm:$0xff] }
 0x1fc   : > { %v896_v45 = vadd.f32 %v895_v2, %v846_v31  ;;  %v1287_v43 = vmul.f32 %v1283_v22, %v5361_v34  ;;  %v1333_v26 = vsel %vm1331_vm0, %v5362_v21, %v4553_v54  ;;  %v1286_v13 = vmul.f32 %v1282_v4, %v5361_v34  ;;  %v5364_v2 = vld [vmem:[#allocation48_spill] sm:$0xff]  ;;  %v5370_v34 = vld [vmem:[#allocation50_spill] sm:$0xff] }
 0x1fd   : > { %2720 = vperm.xlu1 %3144, %v2717_v39   ;;  %v995_v29 = vsel %vm4603_vm13, %v993_v5, 0.0  ;;  %v1097_v60 = vrot.slane %v1090_v48, %v3629_v36  ;;  %v1190_v28 = vcombine.low %v1186_v3, %v1187_v63  ;;  %v1332_v9 = vsel %vm1331_vm0, %v5363_v38, %v5362_v21  ;;  %v4740_v39 = vpop.permute.xlu1 %1884  ;;  %v5365_v5 = vld [vmem:[#allocation24_spill] sm:$0xff]  ;;  %v5371_v21 = vld [vmem:[#allocation79_spill] sm:$0xff] }
 0x1fe   : > { %v946_v47 = vadd.f32 %v945_v14, %v896_v45  ;;  %v1240_v6 = vcombine.low %v1236_v58, %v1237_v32  ;;  %v1386_v10 = vsel %vm1384_vm1, %v5364_v2, %v4623_v7  ;;  %2190 = vrot.lane.b32.xlu0 %v4451_v30, %s3382_s26  ;;  %v1049_v54 = vsel %vm4722_vm4, %v1047_v46, 0.0  ;;  %v1483_v7 = vpop.permute.xlu0 %1482  ;;  %v5369_v46 = vld [vmem:[#allocation52_spill] sm:$0xff]  ;;  %s3402_s26 = smov 42  }
 0x1ff   : > { %v1147_v27 = vrot.slane %v1140_v52, %v3629_v36  ;;  %v1337_v48 = vmul.f32 %v1333_v26, %v5365_v5  ;;  %vm1351_vm5 = vcmp.ge.s32.totalorder %v4273_v24, 0  ;;  %vm1352_vm6 = vcmp.lt.s32.totalorder %v4273_v24, 16 }
 0x200   : > { %vm1534_vm8 = vcmask 629760   ;;  %v996_v30 = vadd.f32 %v995_v29, %v946_v47  ;;  %v1290_v18 = vcombine.low %v1286_v13, %v1287_v43  ;;  %v1385_v63 = vsel %vm1384_vm1, %v4583_v25, %v5364_v2  ;;  %v5368_v25 = vld [vmem:[#allocation54_spill] sm:$0xff]  ;;  %vm4813_vm11 = vmand %vm1351_vm5, %vm1352_vm6 }
 0x201   : > { %2642 = vrot.lane.b32.xlu1 %v2639_v20, %s3401_s14  ;;  %v1436_v22 = vsel %vm1434_vm2, %v5366_v15, %v1433_v51  ;;  %v1336_v12 = vmul.f32 %v1332_v9, %v5365_v5  ;;  %v1099_v4 = vsel %vm4722_vm4, %v1097_v60, 0.0  ;;  %v1197_v31 = vrot.slane %v1190_v28, %v3629_v36  ;;  %v4770_v51 = vpop.permute.xlu1 %1962  ;;  %v5372_v9 = vld [vmem:[#allocation53_spill] sm:$0xff] }
 0x202   : > { %v1390_v20 = vmul.f32 %v1386_v10, %v5367_v40  ;;  %v1050_v32 = vadd.f32 %v1049_v54, %v996_v30  ;;  %v1247_v17 = vrot.slane %v1240_v6, %v3629_v36  ;;  %v1435_v3 = vsel %vm1434_vm2, %v4658_v53, %v5366_v15  ;;  %2236 = vrot.lane.b32.xlu0 %v5369_v46, %s3384_s6  ;;  %v1529_v53 = vpop.permute.xlu0 %1528  ;;  %v5373_v10 = vld [vmem:[#allocation58_spill] sm:$0xff] }
 0x203   : > { %v1486_v14 = vsel %vm1484_vm3, %v5368_v25, %v1483_v7  ;;  %v1149_v52 = vsel %vm4722_vm4, %v1147_v27, 0.0  ;;  %v1340_v58 = vcombine.low %v1336_v12, %v1337_v48  ;;  %v1389_v45 = vmul.f32 %v1385_v63, %v5367_v40 }
 0x204   : > { %v1440_v43 = vmul.f32 %v1436_v22, %v5370_v34  ;;  %v1100_v26 = vadd.f32 %v1099_v4, %v1050_v32  ;;  %v1297_v13 = vrot.slane %v1290_v18, %v3629_v36  ;;  %v1485_v29 = vsel %vm1484_vm3, %v1479_v62, %v5368_v25  ;;  %v5374_v4 = vld [vmem:[#allocation56_spill] sm:$0xff]  ;;  %v5377_v32 = vld [vmem:[#allocation55_spill] sm:$0xff] }
 0x205   : > { %2690 = vrot.lane.b32.xlu1 %v5371_v21, %s3402_s26  ;;  %vm1888_vm9 = vcmask 621568   ;;  %v1199_v60 = vsel %vm4722_vm4, %v1197_v31, 0.0  ;;  %v1393_v28 = vcombine.low %v1389_v45, %v1390_v20  ;;  %v1439_v38 = vmul.f32 %v1435_v3, %v5370_v34  ;;  %v1887_v27 = vpop.permute.xlu1 %1886 }
 0x206   : > { %v1490_v47 = vmul.f32 %v1486_v14, %v5372_v9  ;;  %v1150_v6 = vadd.f32 %v1149_v52, %v1100_v26  ;;  %v1249_v2 = vsel %vm4722_vm4, %v1247_v17, 0.0  ;;  %v1535_v54 = vsel %vm1534_vm8, %v1529_v53, %v5373_v10  ;;  %2240 = vrot.lane.b32.xlu0 %v4478_v0, %s3384_s6  ;;  %v1533_v30 = vpop.permute.xlu0 %1532  ;;  %s3403_s6 = smov 26   ;;  %v5378_v52 = vld [vmem:[#allocation64_spill] sm:$0xff] }
 0x207   : > { %vm1584_vm10 = vcmask 498688   ;;  %v1347_v62 = vrot.slane %v1340_v58, %v3629_v36  ;;  %v1443_v5 = vcombine.low %v1439_v38, %v1440_v43  ;;  %v1489_v48 = vmul.f32 %v1485_v29, %v5372_v9  ;;  %v5380_v38 = vld [vmem:[#allocation62_spill] sm:$0xff] }
 0x208   : > { %v1890_v7 = vsel %vm1888_vm9, %v4740_v39, %v1887_v27  ;;  %v1200_v18 = vadd.f32 %v1199_v60, %v1150_v6  ;;  %v1299_v63 = vsel %vm4722_vm4, %v1297_v13, 0.0  ;;  %v1536_v0 = vsel %vm1534_vm8, %v5373_v10, %v1533_v30 }
 0x209   : > { %2694 = vrot.lane.b32.xlu1 %v4490_v50, %s3402_s26  ;;  %v4802_v15 = vmul.f32 %v1890_v7, %v4709_v16  ;;  %v1400_v22 = vrot.slane %v1393_v28, %v3629_v36  ;;  %v1493_v12 = vcombine.low %v1489_v48, %v1490_v47  ;;  %v1539_v31 = vmul.f32 %v1535_v54, %v5374_v4  ;;  %v4839_v26 = vpop.permute.xlu1 %1932 }
 0x20a   : > { %v1540_v40 = vmul.f32 %v1536_v0, %v5374_v4  ;;  %v1250_v20 = vadd.f32 %v1249_v2, %v1200_v18  ;;  %2286 = vrot.lane.b32.xlu0 %v5377_v32, %s3386_s5  ;;  %v1349_v17 = vsel %vm4722_vm4, %v1347_v62, 0.0  ;;  %v1450_v3 = vrot.slane %v1443_v5, %v3629_v36  ;;  %v1579_v14 = vpop.permute.xlu0 %1578  ;;  %v5381_v2 = vld [vmem:[#allocation61_spill] sm:$0xff]  ;;  %v5382_v5 = vld [vmem:[#allocation75_spill] sm:$0xff] }
 0x20b   : > { %v1585_v58 = vsel %vm1584_vm10, %v1579_v14, %v5378_v52  ;;  %v2284_v61 = vrot.slane %v2270_v35, %v3629_v36  ;;  %v1402_v45 = vsel %vm4813_vm11, %v1400_v22, 0.0  ;;  %v1500_v34 = vrot.slane %v1493_v12, %v3629_v36  ;;  %v5379_v35 = vld [vmem:[#allocation59_spill] sm:$0xff] }
 0x20c   : > { %v1543_v25 = vcombine.low %v1539_v31, %v1540_v40  ;;  %v1300_v46 = vadd.f32 %v1299_v63, %v1250_v20  ;;  %v2320_v60 = vcombine.high %v5379_v35, %v5379_v35  ;;  %v1589_v9 = vmul.f32 %v1585_v58, %v5380_v38  ;;  %v5383_v31 = vld [vmem:[#allocation65_spill] sm:$0xff]  ;;  %v5384_v20 = vld [vmem:[#allocation71_spill] sm:$0xff] }
 0x20d   : > { %2742 = vrot.lane.b32.xlu1 %v2739_v11, %s3403_s6  ;;  %v1452_v11 = vsel %vm4813_vm11, %v1450_v3, 0.0  ;;  %v1502_v28 = vsel %vm4813_vm11, %v1500_v34, 0.0  ;;  %vm1634_vm12 = vcmask 367616   ;;  %v4856_v30 = vpop.permute.xlu1 %1934  ;;  %v2370_v40 = vcombine.high %v5383_v31, %v5383_v31  ;;  %v5385_v3 = vld [vmem:[#allocation69_spill] sm:$0xff] }
 0x20e   : > { %v1350_v43 = vadd.f32 %v1349_v17, %v1300_v46  ;;  %2290 = vrot.lane.b32.xlu0 %v2284_v61, %s3386_s5  ;;  %v1550_v53 = vrot.slane %v1543_v25, %v3629_v36  ;;  %v1583_v13 = vpop.permute.xlu0 %1582  ;;  %v2334_v7 = vrot.slane %v2320_v60, %v3629_v36  ;;  %vm1684_vm13 = vcmask 236544  }
 0x20f   : > { %v1586_v23 = vsel %vm1584_vm10, %v5378_v52, %v1583_v13  ;;  %v2384_v58 = vrot.slane %v2370_v40, %v3629_v36  ;;  %vm1738_vm14 = vcmask 1014784   ;;  %vm1788_vm0 = vcmask 883712  }
 0x210   : > { %v1403_v29 = vadd.f32 %v1402_v45, %v1350_v43  ;;  %v1590_v47 = vmul.f32 %v1586_v23, %v5380_v38  ;;  %v1552_v10 = vsel %vm4813_vm11, %v1550_v53, 0.0  ;;  %v5386_v53 = vld [vmem:[#allocation67_spill] sm:$0xff]  ;;  %v5387_v23 = vld [vmem:[#allocation78_spill] sm:$0xff]  ;;  %vm1838_vm2 = vcmask 752640  }
 0x211   : > { %v4870_v25 = vpop.permute.xlu1 %2066  ;;  %v2424_v13 = vcombine.high %v5386_v53, %v5386_v53  ;;  %vm1938_vm3 = vcmask 490496   ;;  %vm1988_vm4 = vcmask 359424   ;;  %vm2038_vm5 = vcmask 228352  }
 0x212   : > { %v1453_v6 = vadd.f32 %v1452_v11, %v1403_v29  ;;  %2336 = vrot.lane.b32.xlu0 %v5381_v2, %s3388_s30  ;;  %v1593_v54 = vcombine.low %v1589_v9, %v1590_v47  ;;  %v1629_v27 = vpop.permute.xlu0 %1628  ;;  %vm2092_vm6 = vcmask 1006592   ;;  %vm2142_vm10 = vcmask 875520  }
 0x213   : > { %v1635_v48 = vsel %vm1634_vm12, %v1629_v27, %v5382_v5 }
 0x214   : > { %v1503_v62 = vadd.f32 %v1502_v28, %v1453_v6  ;;  %v1600_v18 = vrot.slane %v1593_v54, %v3629_v36  ;;  %v1639_v32 = vmul.f32 %v1635_v48, %v5384_v20  ;;  %v5388_v28 = vld [vmem:[#allocation72_spill] sm:$0xff]  ;;  %v2438_v6 = vrot.slane %v2424_v13, %v3629_v36 }
 0x215   : > { %v4881_v29 = vpop.permute.xlu1 %1984  ;;  %v5389_v48 = vld [vmem:[#allocation68_spill] sm:$0xff] }
 0x216   : > { %v1553_v63 = vadd.f32 %v1552_v10, %v1503_v62  ;;  %2340 = vrot.lane.b32.xlu0 %v2334_v7, %s3388_s30  ;;  %v1602_v0 = vsel %vm4813_vm11, %v1600_v18, 0.0  ;;  %v1633_v22 = vpop.permute.xlu0 %1632  ;;  %v2474_v7 = vcombine.high %v5389_v48, %v5389_v48 }
 0x217   : > { %v1636_v4 = vsel %vm1634_vm12, %v5382_v5, %v1633_v22  ;;  %vm2192_vm12 = vcmask 744448  }
 0x218   : > { %v1603_v12 = vadd.f32 %v1602_v0, %v1553_v63  ;;  %v1640_v17 = vmul.f32 %v1636_v4, %v5384_v20  ;;  %v2488_v22 = vrot.slane %v2474_v7, %v3629_v36  ;;  %v5392_v20 = vld [vmem:[#allocation70_spill] sm:$0xff]  ;;  %v2724_v7 = vcombine.high %v4410_v41, %v4410_v41 }
 0x219   : > { %v4892_v10 = vpop.permute.xlu1 %2116 }
 0x21a   : > { %2386 = vrot.lane.b32.xlu0 %v5385_v3, %s3391_s9  ;;  %v1643_v14 = vcombine.low %v1639_v32, %v1640_v17  ;;  %v1679_v46 = vpop.permute.xlu0 %1678  ;;  %v2524_v32 = vcombine.high %v5392_v20, %v5392_v20 }
 0x21b   : > { %v1685_v52 = vsel %vm1684_vm13, %v1679_v46, %v4464_v1 }
 0x21c   : > { %v1650_v61 = vrot.slane %v1643_v14, %v3629_v36  ;;  %v1689_v35 = vmul.f32 %v1685_v52, %v5387_v23 }
 0x21e   : > { %2390 = vrot.lane.b32.xlu0 %v2384_v58, %s3391_s9  ;;  %v1652_v45 = vsel %vm4813_vm11, %v1650_v61, 0.0  ;;  %v1683_v34 = vpop.permute.xlu0 %1682  ;;  %v2538_v61 = vrot.slane %v2524_v32, %v3629_v36  ;;  %s2792_s9 = sld [smem:[#allocation4]] }
 0x21f   : > { %v1653_v43 = vadd.f32 %v1652_v45, %v1603_v12  ;;  %v1686_v11 = vsel %vm1684_vm13, %v4464_v1, %v1683_v34  ;;  %v1704_v1 = vadd.s32 1, %v4273_v24  ;;  %v4909_v12 = vpop.permute.xlu1 %2034  ;;  %vm2242_vm13 = vcmask 613376  }
 0x220   : > { %v1690_v60 = vmul.f32 %v1686_v11, %v5387_v23 }
 0x221   : > { %vm1705_vm7 = vcmp.ge.s32.totalorder %v1704_v1, 0  ;;  %vm1706_vm15 = vcmp.lt.s32.totalorder %v1704_v1, 16  ;;  %v5394_v1 = vld [vmem:[#allocation76_spill] sm:$0xff] }
 0x222   : > { %2440 = vrot.lane.b32.xlu0 %v5388_v28, %s3394_s10  ;;  %v1693_v38 = vcombine.low %v1689_v35, %v1690_v60  ;;  %v1733_v9 = vpop.permute.xlu0 %1732  ;;  %vm4903_vm1 = vmand %vm1705_vm7, %vm1706_vm15  ;;  %vm2342_vm7 = vcmask 351232   ;;  %vm2392_vm15 = vcmask 220160  }
 0x223   : > { %v1739_v47 = vsel %vm1738_vm14, %v1733_v9, %v4540_v8  ;;  %v4922_v14 = vpop.permute.xlu1 %2166 }
 0x224   : > { %v1700_v2 = vrot.slane %v1693_v38, %v3629_v36  ;;  %v1743_v18 = vmul.f32 %v1739_v47, %v4505_v56 }
 0x226   : > { %2444 = vrot.lane.b32.xlu0 %v2438_v6, %s3394_s10  ;;  %v1702_v54 = vsel %vm4813_vm11, %v1700_v2, 0.0  ;;  %v1737_v27 = vpop.permute.xlu0 %1736  ;;  %v2624_v2 = vcombine.high %v5394_v1, %v5394_v1  ;;  %s2948_s10 = sshll.u32 %s3454_s1, 7  ;;  %s3404_s1 = smov [#allocation8]  }
 0x227   : > { %v1703_v62 = vadd.f32 %v1702_v54, %v1653_v43  ;;  %v1740_v5 = vsel %vm1738_vm14, %v4540_v8, %v1737_v27  ;;  %v4933_v53 = vpop.permute.xlu1 %2088  ;;  %vm2292_vm14 = vcmask 482304   ;;  %s5117_s8 = scalar_lea.hbm %s5165_s4, %s2948_s10 }
 0x228   : > { %v1744_v24 = vmul.f32 %v1740_v5, %v4505_v56  ;;  %v2638_v27 = vrot.slane %v2624_v2, %v3629_v36 }
 0x22a   : > { %2490 = vrot.lane.b32.xlu0 %v4354_v49, %s3396_s23  ;;  %v1747_v63 = vcombine.low %v1743_v18, %v1744_v24  ;;  %v1783_v50 = vpop.permute.xlu0 %1782  ;;  %v2738_v24 = vrot.slane %v2724_v7, %v3629_v36 }
 0x22b   : > { %v1789_v8 = vsel %vm1788_vm0, %v1783_v50, %v4610_v57  ;;  %v4945_v47 = vpop.permute.xlu1 %2216 }
 0x22c   : > { %v1754_v4 = vrot.slane %v1747_v63, %v3629_v36  ;;  %v1793_v17 = vmul.f32 %v1789_v8, %v4576_v37 }
 0x22e   : > { %2494 = vrot.lane.b32.xlu0 %v2488_v22, %s3396_s23  ;;  %v1756_v56 = vsel %vm4903_vm1, %v1754_v4, 0.0  ;;  %v1787_v49 = vpop.permute.xlu0 %1786  ;;  %s5402_s23 = sshll.u32 %s3538_s7, 3 }
 0x22f   : > { %v1757_v31 = vadd.f32 %v1756_v56, %v1703_v62  ;;  %v1790_v40 = vsel %vm1788_vm0, %v4610_v57, %v1787_v49  ;;  %v4958_v62 = vpop.permute.xlu1 %2138  ;;  %vm2446_vm0 = vcmask 998400   ;;  %s214_s27 = scalar_lea.vmem [#allocation8], %s5402_s23 }
 0x230   : > { %v1794_v3 = vmul.f32 %v1790_v40, %v4576_v37  ;;  %s2860_s13 = sshll.u32 %s214_s27, 4  ;;  %s5119_s13 = int_to_ptr.vmem [resolvable:$true] %s2860_s13 }
 0x231   : > { %s3234_s21 = scalar_lea.vmem %s5119_s13, 128 }
 0x232   : > { %2540 = vrot.lane.b32.xlu0 %v4361_v33, %s3398_s24  ;;  %v1797_v46 = vcombine.low %v1793_v17, %v1794_v3  ;;  %v1833_v52 = vpop.permute.xlu0 %1832  ;;  %v5393_v33 = vld [vmem:[#allocation73_spill] sm:$0xff]  ;;  %p3235_p6 = scmp.ne.s32.totalorder %s5119_s13, %s3234_s21 }
 0x233   : > { %v1839_v58 = vsel %vm1838_vm2, %v1833_v52, %v4675_v42  ;;  %v2574_v11 = vcombine.high %v5393_v33, %v5393_v33  ;;  %v4964_v5 = vpop.permute.xlu1 %2266 }
 0x234   : > { %v1804_v57 = vrot.slane %v1797_v46, %v3629_v36  ;;  %v1843_v13 = vmul.f32 %v1839_v58, %v4648_v59  ;;  %p3236_p12 = pnand %p3235_p6, %p5403_p11 }
 0x235   : > { %v2588_v38 = vrot.slane %v2574_v11, %v3629_v36 }
 0x236   : > { %2544 = vrot.lane.b32.xlu0 %v2538_v61, %s3398_s24  ;;  %v1806_v45 = vsel %vm4903_vm1, %v1804_v57, 0.0  ;;  %v1837_v37 = vpop.permute.xlu0 %1836  ;;  %p3237_p13 = pneg %p3236_p12 }
 0x237   : > { %v1807_v34 = vadd.f32 %v1806_v45, %v1757_v31  ;;  %v1840_v43 = vsel %vm1838_vm2, %v4675_v42, %v1837_v37  ;;  %v4973_v63 = vpop.permute.xlu1 %2188  ;;  %vm2546_vm2 = vcmask 736256  }
 0x238   : > { %v1844_v23 = vmul.f32 %v1840_v43, %v4648_v59 }
 0x23a   : > { %2590 = vrot.lane.b32.xlu0 %v4370_v44, %s3400_s16  ;;  %v1847_v35 = vcombine.low %v1843_v13, %v1844_v23  ;;  %v1883_v60 = vpop.permute.xlu0 %1882  ;;  %v4999_v23 = vld [vmem:[%s5163_s2] sm:$0xf] }
 0x23b   : > { %v1889_v28 = vsel %vm1888_vm9, %v1883_v60, %v4740_v39  ;;  %v4977_v22 = vpop.permute.xlu1 %2316 }
 0x23c   : > { %v1854_v42 = vrot.slane %v1847_v35, %v3629_v36  ;;  %v1893_v9 = vmul.f32 %v1889_v28, %v4709_v16  ;;  %v2058_v35 = vadd.s32 2, %v4999_v23 }
 0x23e   : > { %2594 = vrot.lane.b32.xlu0 %v2588_v38, %s3400_s16  ;;  %v1856_v59 = vsel %vm4903_vm1, %v1854_v42, 0.0  ;;  %v1897_v44 = vcombine.low %v1893_v9, %v4802_v15  ;;  %v2689_v15 = vcombine.high %v5371_v21, %v5371_v21  ;;  %vm2059_vm8 = vcmp.ge.s32.totalorder %v2058_v35, 0  ;;  %s2846_s16 = scalar_lea.sflag [#allocation7], %s3538_s7 }
 0x23f   : > { %v1857_v6 = vadd.f32 %v1856_v59, %v1807_v34  ;;  %v4981_v49 = vpop.permute.xlu1 %2238  ;;  %vm2060_vm9 = vcmp.lt.s32.totalorder %v2058_v35, 16 }
 0x240   : > { %v1904_v39 = vrot.slane %v1897_v44, %v3629_v36  ;;  %vm5010_vm11 = vmand %vm2059_vm8, %vm2060_vm9  ;;  %vm2696_vm9 = vcmask 343040  }
 0x242   : > { %2640 = vrot.lane.b32.xlu0 %v4421_v19, %s3401_s14  ;;  %v1906_v16 = vsel %vm4903_vm1, %v1904_v39, 0.0  ;;  %v1939_v19 = vsel %vm1938_vm3, %v4839_v26, %v4856_v30 }
 0x243   : > { %v1907_v54 = vadd.f32 %v1906_v16, %v1857_v6  ;;  %v4989_v58 = vpop.permute.xlu1 %2366 }
 0x246   : > { %2644 = vrot.lane.b32.xlu0 %v2638_v27, %s3401_s14 }
 0x247   : > { %v2289_v33 = vpop.permute.xlu1 %2288 }
 0x249   : > { %v1913_v48 = vpop.permute.xlu0 %1912 }
 0x24a   : > { %2692 = vrot.lane.b32.xlu0 %v2689_v15, %s3402_s26  ;;  %v1943_v18 = vmul.f32 %v1939_v19, %v1913_v48 }
 0x24b   : > { %v5006_v9 = vpop.permute.xlu1 %2420 }
 0x24e   : > { %2740 = vrot.lane.b32.xlu0 %v4443_v55, %s3403_s6  ;;  %v2013_v21 = vpop.permute.xlu0 %2012 }
 0x252   : > { %2744 = vrot.lane.b32.xlu0 %v2738_v24, %s3403_s6  ;;  %v1937_v50 = vpop.permute.xlu0 %1936 }
 0x253   : > { %v1940_v8 = vsel %vm1938_vm3, %v4856_v30, %v1937_v50  ;;  %vm2596_vm3 = vcmask 605184  }
 0x254   : > { %v1944_v26 = vmul.f32 %v1940_v8, %v1913_v48 }
 0x256   : > { %v1947_v4 = vcombine.low %v1943_v18, %v1944_v26  ;;  %v1983_v41 = vpop.permute.xlu0 %1982 }
 0x257   : > { %v1989_v55 = vsel %vm1988_vm4, %v1983_v41, %v4881_v29 }
 0x258   : > { %v1954_v56 = vrot.slane %v1947_v4, %v3629_v36  ;;  %v1993_v30 = vmul.f32 %v1989_v55, %v4770_v51 }
 0x25a   : > { %v1956_v31 = vsel %vm4903_vm1, %v1954_v56, 0.0  ;;  %v1987_v40 = vpop.permute.xlu0 %1986 }
 0x25b   : > { %v1957_v20 = vadd.f32 %v1956_v31, %v1907_v54  ;;  %v1990_v32 = vsel %vm1988_vm4, %v4881_v29, %v1987_v40  ;;  %vm2646_vm4 = vcmask 474112  }
 0x25c   : > { %v1994_v17 = vmul.f32 %v1990_v32, %v4770_v51 }
 0x25e   : > { %v1997_v3 = vcombine.low %v1993_v30, %v1994_v17  ;;  %v2033_v46 = vpop.permute.xlu0 %2032 }
 0x25f   : > { %v2039_v52 = vsel %vm2038_vm5, %v2033_v46, %v4909_v12 }
 0x260   : > { %v2004_v61 = vrot.slane %v1997_v3, %v3629_v36  ;;  %v2043_v57 = vmul.f32 %v2039_v52, %v2013_v21 }
 0x262   : > { %v2006_v45 = vsel %vm4903_vm1, %v2004_v61, 0.0  ;;  %v2037_v37 = vpop.permute.xlu0 %2036 }
 0x263   : > { %v2007_v34 = vadd.f32 %v2006_v45, %v1957_v20  ;;  %v2040_v29 = vsel %vm2038_vm5, %v4909_v12, %v2037_v37 }
 0x264   : > { %v2044_v43 = vmul.f32 %v2040_v29, %v2013_v21 }
 0x266   : > { %v2047_v51 = vcombine.low %v2043_v57, %v2044_v43  ;;  %v2087_v11 = vpop.permute.xlu0 %2086 }
 0x267   : > { %v2093_v60 = vsel %vm2092_vm6, %v2087_v11, %v4933_v53 }
 0x268   : > { %v2054_v13 = vrot.slane %v2047_v51, %v3629_v36  ;;  %v2097_v59 = vmul.f32 %v2093_v60, %v4870_v25 }
 0x26a   : > { %v2056_v28 = vsel %vm4903_vm1, %v2054_v13, 0.0  ;;  %v2091_v12 = vpop.permute.xlu0 %2090  ;;  %vm2496_vm1 = vcmask 867328  }
 0x26b   : > { %v2057_v38 = vadd.f32 %v2056_v28, %v2007_v34  ;;  %v2094_v42 = vsel %vm2092_vm6, %v4933_v53, %v2091_v12  ;;  %v2339_v53 = vpop.permute.xlu1 %2338 }
 0x26c   : > { %v2098_v44 = vmul.f32 %v2094_v42, %v4870_v25 }
 0x26e   : > { %v2101_v6 = vcombine.low %v2097_v59, %v2098_v44  ;;  %v2137_v1 = vpop.permute.xlu0 %2136 }
 0x26f   : > { %v2143_v39 = vsel %vm2142_vm10, %v2137_v1, %v4958_v62  ;;  %v5021_v18 = vpop.permute.xlu1 %2470 }
 0x270   : > { %v2108_v0 = vrot.slane %v2101_v6, %v3629_v36  ;;  %v2147_v25 = vmul.f32 %v2143_v39, %v4892_v10 }
 0x272   : > { %v2110_v16 = vsel %vm5010_vm11, %v2108_v0, 0.0  ;;  %v2141_v54 = vpop.permute.xlu0 %2140 }
 0x273   : > { %v2111_v27 = vadd.f32 %v2110_v16, %v2057_v38  ;;  %v2144_v15 = vsel %vm2142_vm10, %v4958_v62, %v2141_v54  ;;  %v2389_v41 = vpop.permute.xlu1 %2388  ;;  %vm2746_vm10 = vcmask 211968  }
 0x274   : > { %v2148_v19 = vmul.f32 %v2144_v15, %v4892_v10 }
 0x276   : > { %v2151_v48 = vcombine.low %v2147_v25, %v2148_v19  ;;  %v2187_v7 = vpop.permute.xlu0 %2186 }
 0x277   : > { %v2193_v21 = vsel %vm2192_vm12, %v2187_v7, %v4973_v63  ;;  %v5033_v30 = vpop.permute.xlu1 %2520 }
 0x278   : > { %v2158_v24 = vrot.slane %v2151_v48, %v3629_v36  ;;  %v2197_v4 = vmul.f32 %v2193_v21, %v4922_v14 }
 0x27a   : > { %v2160_v50 = vsel %vm5010_vm11, %v2158_v24, 0.0  ;;  %v2191_v8 = vpop.permute.xlu0 %2190 }
 0x27b   : > { %v2161_v26 = vadd.f32 %v2160_v50, %v2111_v27  ;;  %v2194_v62 = vsel %vm2192_vm12, %v4973_v63, %v2191_v8  ;;  %v2443_v52 = vpop.permute.xlu1 %2442 }
 0x27c   : > { %v2198_v10 = vmul.f32 %v2194_v62, %v4922_v14 }
 0x27e   : > { %v2201_v56 = vcombine.low %v2197_v4, %v2198_v10  ;;  %v2237_v55 = vpop.permute.xlu0 %2236 }
 0x27f   : > { %v2243_v3 = vsel %vm2242_vm13, %v2237_v55, %v4981_v49  ;;  %v5041_v11 = vpop.permute.xlu1 %2570 }
 0x280   : > { %v2208_v31 = vrot.slane %v2201_v56, %v3629_v36  ;;  %v2247_v61 = vmul.f32 %v2243_v3, %v4945_v47 }
 0x282   : > { %v2210_v40 = vsel %vm5010_vm11, %v2208_v31, 0.0  ;;  %v2241_v20 = vpop.permute.xlu0 %2240 }
 0x283   : > { %v2211_v32 = vadd.f32 %v2210_v40, %v2161_v26  ;;  %v2244_v17 = vsel %vm2242_vm13, %v4981_v49, %v2241_v20 }
 0x284   : > { %v2248_v14 = vmul.f32 %v2244_v17, %v4945_v47  ;;  %v2412_v17 = vadd.s32 3, %v4999_v23 }
 0x286   : > { %v2287_v63 = vpop.permute.xlu0 %2286  ;;  %v2251_v37 = vcombine.low %v2247_v61, %v2248_v14  ;;  %vm2413_vm5 = vcmp.ge.s32.totalorder %v2412_v17, 0  ;;  %vm2414_vm6 = vcmp.lt.s32.totalorder %v2412_v17, 16 }
 0x287   : > { %v2293_v46 = vsel %vm2292_vm14, %v2287_v63, %v2289_v33  ;;  %vm5072_vm8 = vmand %vm2413_vm5, %vm2414_vm6 }
 0x288   : > { %v2297_v34 = vmul.f32 %v2293_v46, %v4964_v5  ;;  %v2258_v49 = vrot.slane %v2251_v37, %v3629_v36 }
 0x28a   : > { %v2291_v57 = vpop.permute.xlu0 %2290  ;;  %v2260_v47 = vsel %vm5010_vm11, %v2258_v49, 0.0 }
 0x28b   : > { %v2294_v45 = vsel %vm2292_vm14, %v2289_v33, %v2291_v57  ;;  %v2261_v44 = vadd.f32 %v2260_v47, %v2211_v32 }
 0x28c   : > { %v2298_v29 = vmul.f32 %v2294_v45, %v4964_v5  ;;  %v2493_v5 = vpop.permute.xlu1 %2492 }
 0x28e   : > { %v2301_v43 = vcombine.low %v2297_v34, %v2298_v29  ;;  %v2337_v51 = vpop.permute.xlu0 %2336 }
 0x28f   : > { %v2343_v13 = vsel %vm2342_vm7, %v2337_v51, %v2339_v53 }
 0x290   : > { %v2308_v35 = vrot.slane %v2301_v43, %v3629_v36  ;;  %v2347_v33 = vmul.f32 %v2343_v13, %v4977_v22  ;;  %v2621_v16 = vpop.permute.xlu1 %2620 }
 0x292   : > { %v2341_v60 = vpop.permute.xlu0 %2340  ;;  %v2310_v38 = vsel %vm5010_vm11, %v2308_v35, 0.0 }
 0x293   : > { %v2344_v28 = vsel %vm2342_vm7, %v2339_v53, %v2341_v60  ;;  %v2311_v1 = vadd.f32 %v2310_v38, %v2261_v44 }
 0x294   : > { %v2348_v12 = vmul.f32 %v2344_v28, %v4977_v22  ;;  %v2543_v27 = vpop.permute.xlu1 %2542 }
 0x296   : > { %v2351_v42 = vcombine.low %v2347_v33, %v2348_v12  ;;  %v2387_v59 = vpop.permute.xlu0 %2386 }
 0x297   : > { %v2393_v62 = vsel %vm2392_vm15, %v2387_v59, %v2389_v41 }
 0x298   : > { %v2358_v6 = vrot.slane %v2351_v42, %v3629_v36  ;;  %v5056_v25 = vpop.permute.xlu1 %2670  ;;  %v2397_v20 = vmul.f32 %v2393_v62, %v4989_v58 }
 0x29a   : > { %v2360_v0 = vsel %vm5010_vm11, %v2358_v6, 0.0  ;;  %v2391_v39 = vpop.permute.xlu0 %2390 }
 0x29b   : > { %v5054_v53 = vadd.f32 %v2360_v0, %v2311_v1  ;;  %v2394_v8 = vsel %vm2392_vm15, %v2389_v41, %v2391_v39 }
 0x29c   : > { %v2593_v48 = vpop.permute.xlu1 %2592  ;;  %v2398_v10 = vmul.f32 %v2394_v8, %v4989_v58 }
 0x29e   : > { %v2441_v54 = vpop.permute.xlu0 %2440  ;;  %v2401_v14 = vcombine.low %v2397_v20, %v2398_v10 }
 0x29f   : > { %v2447_v56 = vsel %vm2446_vm0, %v2441_v54, %v2443_v52 }
 0x2a0   : > { %v5058_v21 = vpop.permute.xlu1 %2720  ;;  %v2451_v32 = vmul.f32 %v2447_v56, %v5006_v9  ;;  %v2408_v23 = vrot.slane %v2401_v14, %v3629_v36 }
 0x2a2   : > { %v2445_v22 = vpop.permute.xlu0 %2444 }
 0x2a3   : > { %v2448_v26 = vsel %vm2446_vm0, %v2443_v52, %v2445_v22 }
 0x2a4   : > { %v2643_v4 = vpop.permute.xlu1 %2642  ;;  %v2452_v31 = vmul.f32 %v2448_v26, %v5006_v9 }
 0x2a6   : > { %v2491_v15 = vpop.permute.xlu0 %2490  ;;  %v2455_v52 = vcombine.low %v2451_v32, %v2452_v31 }
 0x2a7   : > { %v2497_v63 = vsel %vm2496_vm1, %v2491_v15, %v2493_v5 }
 0x2a8   : > { %v2691_v45 = vpop.permute.xlu1 %2690  ;;  %v2501_v37 = vmul.f32 %v2497_v63, %v5021_v18  ;;  %v2462_v49 = vrot.slane %v2455_v52, %v3629_v36 }
 0x2aa   : > { %v2495_v19 = vpop.permute.xlu0 %2494  ;;  %v2464_v59 = vsel %vm5072_vm8, %v2462_v49, 0.0 }
 0x2ab   : > { %v2498_v40 = vsel %vm2496_vm1, %v2493_v5, %v2495_v19 }
 0x2ac   : > { %v2502_v41 = vmul.f32 %v2498_v40, %v5021_v18  ;;  %v2695_v33 = vpop.permute.xlu1 %2694 }
 0x2ae   : > { %v2541_v7 = vpop.permute.xlu0 %2540  ;;  %v2505_v34 = vcombine.low %v2501_v37, %v2502_v41 }
 0x2af   : > { %v2547_v61 = vsel %vm2546_vm2, %v2541_v7, %v2543_v27 }
 0x2b0   : > { %v2551_v29 = vmul.f32 %v2547_v61, %v5033_v30  ;;  %v2512_v12 = vrot.slane %v2505_v34, %v3629_v36  ;;  %v2743_v19 = vpop.permute.xlu1 %2742 }
 0x2b2   : > { %v2545_v24 = vpop.permute.xlu0 %2544  ;;  %v2514_v54 = vsel %vm5072_vm8, %v2512_v12, 0.0 }
 0x2b3   : > { %v2548_v3 = vsel %vm2546_vm2, %v2543_v27, %v2545_v24 }
 0x2b4   : > { %v2552_v58 = vmul.f32 %v2548_v3, %v5033_v30  ;;  %v2410_v30 = vsel %vm5010_vm11, %v2408_v23, 0.0  ;;  %vm2777_vm11 = vcmask 1041408  }
 0x2b5   : > { %v2411_v2 = vadd.f32 %v2410_v30, %v5054_v53 }
 0x2b6   : > { %v2591_v50 = vpop.permute.xlu0 %2590  ;;  %v2555_v60 = vcombine.low %v2551_v29, %v2552_v58  ;;  %v2793_v29 = vstv %s2792_s9 }
 0x2b7   : > { %v2597_v9 = vsel %vm2596_vm3, %v2591_v50, %v2593_v48  ;;  %v2465_v15 = vadd.f32 %v2464_v59, %v2411_v2  ;;  %v5400_v59 = vlaneseq }
 0x2b8   : > { %v2601_v28 = vmul.f32 %v2597_v9, %v5041_v11  ;;  %v2562_v1 = vrot.slane %v2555_v60, %v3629_v36 }
 0x2b9   : > { %v2515_v24 = vadd.f32 %v2514_v54, %v2465_v15  ;;  %vm2827_vm12 = vcmp.lt.s32.totalorder %v5400_v59, 256  ;;  %v2830_v54 = vld [vmem:[%s3544_s12] sm:$0xff]  ;;  %s3238_s12 = sshll.u32 %s3404_s1, 4  ;;  %s3239_s12 = int_to_ptr.vmem [resolvable:$false] %s3238_s12 }
 0x2ba   : > { %v2595_v55 = vpop.permute.xlu0 %2594  ;;  %s3240_s11 = scalar_lea.vmem %s3239_s12, 256  ;;  %p3241_p7 = scmp.lt.s32.totalorder %s5119_s13, %s3239_s12 }
 0x2bb   : > { %v2598_v57 = vsel %vm2596_vm3, %v2593_v48, %v2595_v55  ;;  %v2564_v48 = vsel %vm5072_vm8, %v2562_v1, 0.0  ;;  %p3242_p10 = scmp.lt.s32.totalorder %s3240_s11, %s3234_s21 }
 0x2bc   : > { %v2602_v43 = vmul.f32 %v2598_v57, %v5041_v11  ;;  %v2565_v26 = vadd.f32 %v2564_v48, %v2515_v24 }
 0x2bd   : > { %p3243_p2 = por %p3242_p10, %p3241_p7 }
 0x2be   : > { %v2641_v46 = vpop.permute.xlu0 %2640  ;;  %v2605_v5 = vcombine.low %v2601_v28, %v2602_v43 }
 0x2bf   : > { %v2647_v13 = vsel %vm2646_vm4, %v2641_v46, %v2643_v4  ;;  %p3244_p4 = pnand %p3243_p2, %p3237_p13 }
 0x2c0   : > { %v2651_v38 = vmul.f32 %v2647_v13, %v2621_v16 }
 0x2c2   : > { %v2645_v51 = vpop.permute.xlu0 %2644 }
 0x2c3   : > { %v2648_v35 = vsel %vm2646_vm4, %v2643_v4, %v2645_v51 }
 0x2c4   : > { %v2652_v47 = vmul.f32 %v2648_v35, %v2621_v16  ;;  %v2612_v16 = vrot.slane %v2605_v5, %v3629_v36 }
 0x2c6   : > { %v2693_v42 = vpop.permute.xlu0 %2692  ;;  %v2655_v0 = vcombine.low %v2651_v38, %v2652_v47  ;;  %v2614_v53 = vsel %vm5072_vm8, %v2612_v16, 0.0  ;;  %v5399_v38 = vld [vmem:[#allocation12_spill] sm:$0xff] }
 0x2c7   : > { %v2697_v44 = vsel %vm2696_vm9, %v2691_v45, %v2693_v42  ;;  %v2698_v6 = vsel %vm2696_vm9, %v2693_v42, %v2695_v33  ;;  %v2615_v55 = vadd.f32 %v2614_v53, %v2565_v26 }
 0x2c8   : > { %v2701_v11 = vmul.f32 %v2697_v44, %v5056_v25  ;;  %v2702_v39 = vmul.f32 %v2698_v6, %v5056_v25  ;;  %v2662_v7 = vrot.slane %v2655_v0, %v3629_v36  ;;  %v5401_v6 = vld [vmem:[#allocation11_spill] sm:$0xff] }
 0x2c9   : > { %v2835_v1 = vsub.s32 0, %v5401_v6  ;;  %v2839_v0 = vsub.s32 1, %v5401_v6 }
 0x2ca   : > { %v2705_v27 = vcombine.low %v2701_v11, %v2702_v39  ;;  %v2741_v22 = vpop.permute.xlu0 %2740  ;;  %v2664_v4 = vsel %vm5072_vm8, %v2662_v7, 0.0 }
 0x2cb   : > { %v2747_v50 = vsel %vm2746_vm10, %v2741_v22, %v2743_v19  ;;  %v2665_v20 = vadd.f32 %v2664_v4, %v2615_v55 }
 0x2cc   : > { %v2712_v25 = vrot.slane %v2705_v27, %v3629_v36  ;;  %v2751_v10 = vmul.f32 %v2747_v50, %v5058_v21 }
 0x2ce   : > { %v2745_v8 = vpop.permute.xlu0 %2744  ;;  %v2714_v31 = vsel %vm5072_vm8, %v2712_v25, 0.0 }
 0x2cf   : > { %v2748_v62 = vsel %vm2746_vm10, %v2743_v19, %v2745_v8  ;;  %v2715_v17 = vadd.f32 %v2714_v31, %v2665_v20 }
 0x2d0   : > { %v2752_v56 = vmul.f32 %v2748_v62, %v5058_v21 }
 0x2d2   : > { %v2755_v40 = vcombine.low %v2751_v10, %v2752_v56 }
 0x2d4   : > { %v2762_v32 = vrot.slane %v2755_v40, %v3629_v36 }
 0x2d6   : > { %v2764_v63 = vsel %vm5072_vm8, %v2762_v32, 0.0 }
 0x2d7   : > { %v2765_v3 = vadd.f32 %v2764_v63, %v2715_v17 }
 0x2d9   : > { %v2773_v14 = vrot.slane %v2765_v3, %v3629_v36 }
 0x2db   : > { %v2774_v41 = vcombine.high %v2773_v14, %v2773_v14  ;;  %v2778_v46 = vsel %vm2777_vm11, %v2773_v14, 0.0 }
 0x2dc   : > { %v2779_v52 = vrot.slane %v2778_v46, 4 }
 0x2dd   : > { %v2785_v21 = vsel %vm2777_vm11, %v2774_v41, 0.0 }
 0x2de   : > { %v2780_v61 = vadd.f32 %v2779_v52, %v2778_v46  ;;  %v2786_v57 = vrot.slane %v2785_v21, 4 }
 0x2e0   : > { %v2781_v45 = vrot.slane %v2780_v61, 2  ;;  %v2787_v37 = vadd.f32 %v2786_v57, %v2785_v21 }
 0x2e2   : > { %v2782_v58 = vadd.f32 %v2781_v45, %v2780_v61  ;;  %v2788_v9 = vrot.slane %v2787_v37, 2 }
 0x2e4   : > { %v2783_v23 = vrot.slane %v2782_v58, 1  ;;  %v2789_v34 = vadd.f32 %v2788_v9, %v2787_v37 }
 0x2e6   : > { %v2784_v43 = vadd.f32 %v2783_v23, %v2782_v58  ;;  %v2790_v51 = vrot.slane %v2789_v34, 1 }
 0x2e8   : > { %v2791_v49 = vadd.f32 %v2790_v51, %v2789_v34  ;;  %v2794_v13 = vadd.f32 %v2793_v29, %v2784_v43 }
 0x2ea   : > { %v2795_v35 = vadd.f32 %v2793_v29, %v2791_v49  ;;  %v2940_v36 = vmul.f32 -1.442695, %v2794_v13 }
 0x2ec   : > { %3195 = vpow2.f32 %v2940_v36  ;;  %v2941_v18 = vmul.f32 -1.442695, %v2795_v35 }
 0x2ee   : > { %3197 = vpow2.f32 %v2941_v18 }
 0x2f6   : > { %v3196_v60 = vpop.eup %3195 }
 0x2f7   : > { %v2802_v28 = vadd.f32 1.0, %v3196_v60 }
 0x2f8   : > { %v3198_v47 = vpop.eup %3197 }
 0x2f9   : > { %v2803_v33 = vadd.f32 1.0, %v3198_v47  ;;  %3199 = vrcp.f32 %v2802_v28 }
 0x2fb   : > { %3201 = vrcp.f32 %v2803_v33 }
 0x303   : > { %v3200_v30 = vpop.eup %3199 }
 0x305   : > { %v3202_v12 = vpop.eup %3201 }
 0x306   : > { %v2810_v5 = vcombine.low %v3200_v30, %v3202_v12 }
 0x308   : > { %v2817_v42 = vrot.slane %v2810_v5, %v5399_v38 }
 0x30a   : > { %v2824_v44 = vrot.slane %v2817_v42, %v5399_v38 }
 0x30c   : > { %2829 = vst.msk [vmem:[#allocation3] sm:$0x3] %vm2827_vm12, %v2824_v44 }
 0x313   : > { %v2831_v11 = vld [vmem:[#allocation3] sm:$0x3] }
 0x314   : > { %v2836_v39 = vrot.slane %v2831_v11, %v2835_v1  ;;  %v2840_v2 = vrot.slane %v2831_v11, %v2839_v0 }
 0x316   : > { %v2841_v16 = vcombine.low %v2836_v39, %v2840_v2 }
 0x318   : > { %v2843_v27 = vmul.f32 %v2841_v16, %v2830_v54 }
 0x31a   : > { %2844 = vst [vmem:[%s214_s27] sm:$0xff] %v2843_v27 }
 0x31b   : > { %3247 = shalt.err (!%p3244_p4)
}
 0x31c   : > { %s3248_s7 = scalar_lea.hbm %s5117_s8, 128  ;;  %s3252_s6 = scalar_lea.hbm %s5165_s4, 256 }
 0x31d   : > { %p3249_p5 = scmp.ne.s32.totalorder %s5117_s8, %s3248_s7  ;;  %p3253_p0 = scmp.lt.u32.totalorder %s5117_s8, %s5165_s4 }
 0x31e   : > { %p3254_p1 = scmp.lt.u32.totalorder %s3252_s6, %s3248_s7  ;;  %p3256_p6 = scmp.lt.u32.totalorder %s3248_s7, %s5117_s8 }
 0x31f   : > { %p3250_p8 = pnand %p3249_p5, %p5403_p11 }
 0x320   : > { %p3255_p3 = por %p3254_p1, %p3253_p0 }
 0x321   : > { %p3251_p9 = pneg %p3250_p8 }
 0x322   : > { %p3257_p12 = por %p3256_p6, %p3255_p3 }
 0x324   : > { %p3258_p13 = pnand %p3257_p12, %p3251_p9 }
 0x326   : > { %3261 = shalt.err (!%p3258_p13)
}
 0x327   : > { %2951 = dma.vmem_to_hbm [thread:$0]  (%p5403_p11), %s5119_s13, 128, %s5117_s8, %s2846_s16  }
 0x328 PF: > { %s2872_s9 = sand.u32 1, %s3288_s17   ;;  %p5404_p7 = scmp.ne.s32.totalorder %s5234_s29, 0 }
 0x329   : > { %p5405_p10 = scmp.ge.s32.totalorder %s3300_s20, 2  ;;  %s2873_s10 = scalar_lea.sflag [#allocation7], %s2872_s9 }
 0x32b   : > { %p2958_p2 = pnand %p5405_p10, %p5404_p7 }
 0x32d   : > { %3283 = dma.done.wait (!%p2958_p2), %s2873_s10, 128  }
 0x32e   : > { %3285 = vsyncadd (!%p2958_p2), %s2873_s10, 4294967168  ;;  %p18_p4 = scmp.ge.s32.totalorder %s3458_s22, 4   ;;  %s5406_s17 = smov %s3292_s18 }
 0x32f   : > { %s5407_s18 = smov %s3296_s19  ;;  %s5408_s19 = smov %s3470_s25 }
 0x330   : > { %s5409_s20 = smov %s3458_s22  ;;  %20 = sbr.rel (!%p18_p4) target bundleno = 7 (0x7), region = 82 }
 0x337   :  { %2878 = vsyncpa [#allocation6], 1 }
 0x338   :  { %2880 = vsyncpa [#allocation6 + $0x1], 1 }
 0x339   :  { %2881 = vsyncpa [#allocation7], 1 }
 0x33a   :  { %2883 = vsyncpa [#allocation7 + $0x1], 1 }

</bundles_post_ra>
